<compile_context>
chip_gen: v7x
topology: tpu7x:2x2x1
jax: 0.10.0
libtpu: 0.0.40
codegen_flags: <defaults>
</compile_context>

<pallas_src>
import functools

import jax
import jax.numpy as jnp
from jax.experimental import pallas as pl
from jax.experimental.pallas import tpu as pltpu

COUT_PAD = 128          # lane-dense conv output channels
K1_PAD = 128            # conv1 im2col K: 9*3 = 27  -> 128
K2_PAD = 384            # conv2 im2col K: 9*32 = 288 -> 384


# ----------------------------------------------------------------------------
# Pallas kernels
# ----------------------------------------------------------------------------
def _conv_bn_relu_pool_kernel(x_ref, w_ref, scale_ref, bias_ref, o_ref, *, n_pix):
    """Fused 3x3 SAME conv + folded BN + ReLU + 2x2 maxpool, one image, one matmul.

    x_ref:     (1, 4*n_pix, Kp) bf16  phase-stacked im2col (pool phases along M).
    w_ref:     (Kp, 128)        bf16  rows ordered (dh, dw, cin), zero-padded K/cout.
    scale_ref: (1, 128)         f32   folded BN scale (gamma / sqrt(var + eps)).
    bias_ref:  (1, 128)         f32   folded BN bias  (beta + conv_b * scale).
    o_ref:     (1, n_pix, 128)  bf16  pooled output, rows = (i, j) row-major.
    """
    # One MXU matmul per image per block; weights are pushed once for all phases.
    acc = jnp.dot(x_ref[0], w_ref[...], preferred_element_type=jnp.float32)
    y = acc * scale_ref[...] + bias_ref[...]            # folded BN, f32 epilogue
    # 2x2 maxpool = max over the 4 stacked pooling phases (row slices, sublane-aligned).
    pooled = jnp.maximum(
        jnp.maximum(y[0:n_pix], y[n_pix:2 * n_pix]),
        jnp.maximum(y[2 * n_pix:3 * n_pix], y[3 * n_pix:4 * n_pix]))
    pooled = jnp.maximum(pooled, 0.0)                   # ReLU (commutes with max)
    o_ref[0] = pooled.astype(o_ref.dtype)               # lane-dense bf16 store


def _mlp_kernel(x_ref, w1_ref, b1_ref, w2_ref, b2_ref, o_ref):
    """Fused fc1(ReLU) + fc2: whole K resident, no K grid / accumulator needed."""
    h = jnp.dot(x_ref[...], w1_ref[...], preferred_element_type=jnp.float32)
    h = jnp.maximum(h + b1_ref[...], 0.0)
    y = jnp.dot(h.astype(w2_ref.dtype), w2_ref[...],
                preferred_element_type=jnp.float32)
    o_ref[...] = y + b2_ref[...]


# ----------------------------------------------------------------------------
# Wrappers (pallas_call + layout glue)
# ----------------------------------------------------------------------------
def im2col_pool_phases(x, cin, k_pad):
    """(N,H,W,C>=cin) -> (N, 4*(H/2)*(W/2), k_pad) bf16 phase-stacked im2col.

    Pure XLA glue done once per block; ~9x the (tiny) input, and it lets the conv
    kernel run as a single tile-aligned matmul per image.  Rows within each phase
    are (i, j) row-major; phases are stacked along M in (a, b) order.
    """
    x = x[..., :cin]
    N, H, W, _ = x.shape
    hh, wh = H // 2, W // 2
    xp = jnp.pad(x, ((0, 0), (1, 1), (1, 1), (0, 0)))
    phases = []
    for a in range(2):                      # pooling-window row phase
        for b in range(2):                  # pooling-window col phase
            taps = [xp[:, a + dh:a + dh + 2 * hh:2, b + dw:b + dw + 2 * wh:2, :]
                    for dh in range(3) for dw in range(3)]
            phases.append(jnp.concatenate(taps, axis=-1).reshape(N, hh * wh, 9 * cin))
    cols = jnp.concatenate(phases, axis=1)                  # (N, 4*hh*wh, 9*cin)
    cols = jnp.pad(cols, ((0, 0), (0, 0), (0, k_pad - 9 * cin)))
    return cols.astype(jnp.bfloat16)


def conv_block(x_im2col, w, scale, bias):
    """Fused conv+BN+ReLU+maxpool. (N, 4*P, Kp) bf16 -> (N, P, COUT_PAD) bf16."""
    N, m4, kp = x_im2col.shape
    n_pix = m4 // 4
    coutp = w.shape[1]
    kernel = functools.partial(_conv_bn_relu_pool_kernel, n_pix=n_pix)
    return pl.pallas_call(
        kernel,
        out_shape=jax.ShapeDtypeStruct((N, n_pix, coutp), jnp.bfloat16),
        grid=(N,),                                      # one image per grid step
        in_specs=[
            pl.BlockSpec((1, m4, kp), lambda n: (n, 0, 0)),
            pl.BlockSpec((kp, coutp), lambda n: (0, 0)),      # weights stay resident
            pl.BlockSpec((1, coutp), lambda n: (0, 0)),
            pl.BlockSpec((1, coutp), lambda n: (0, 0)),
        ],
        out_specs=pl.BlockSpec((1, n_pix, coutp), lambda n: (n, 0, 0)),
        compiler_params=pltpu.CompilerParams(
            dimension_semantics=("parallel",),          # batch splits across v7x TCs
            vmem_limit_bytes=32 * 1024 * 1024),
    )(x_im2col, w, scale, bias)


def fused_mlp(x, w1, b1, w2, b2):
    """logits = (relu(x @ w1 + b1)) @ w2 + b2 in one kernel. x:(M,K) bf16 -> (M,N) f32."""
    M, K = x.shape
    H = w1.shape[1]
    Nout = w2.shape[1]
    return pl.pallas_call(
        _mlp_kernel,
        out_shape=jax.ShapeDtypeStruct((M, Nout), jnp.float32),
        grid=(1,),
        in_specs=[
            pl.BlockSpec((M, K), lambda i: (0, 0)),
            pl.BlockSpec((K, H), lambda i: (0, 0)),     # full fc1 weight resident (2 MiB)
            pl.BlockSpec((1, H), lambda i: (0, 0)),
            pl.BlockSpec((H, Nout), lambda i: (0, 0)),
            pl.BlockSpec((1, Nout), lambda i: (0, 0)),
        ],
        out_specs=pl.BlockSpec((M, Nout), lambda i: (0, 0)),
        compiler_params=pltpu.CompilerParams(
            dimension_semantics=("arbitrary",),
            vmem_limit_bytes=32 * 1024 * 1024),
    )(x, w1, b1, w2, b2)


# ----------------------------------------------------------------------------
# Parameters: torch-like layout + one-time prep (fold BN, pad lanes, permute fc1)
# ----------------------------------------------------------------------------
def init_params(key):
    ks = jax.random.split(key, 12)
    p = {}
    p["conv1_w"] = 0.1 * jax.random.normal(ks[0], (3, 3, 3, 32), jnp.float32)   # HWIO
    p["conv1_b"] = 0.1 * jax.random.normal(ks[1], (32,), jnp.float32)
    p["bn1_gamma"] = 1.0 + 0.1 * jax.random.normal(ks[2], (32,), jnp.float32)
    p["bn1_beta"] = 0.1 * jax.random.normal(ks[3], (32,), jnp.float32)
    p["conv2_w"] = 0.1 * jax.random.normal(ks[4], (3, 3, 32, 64), jnp.float32)  # HWIO
    p["conv2_b"] = 0.1 * jax.random.normal(ks[5], (64,), jnp.float32)
    p["bn2_gamma"] = 1.0 + 0.1 * jax.random.normal(ks[6], (64,), jnp.float32)
    p["bn2_beta"] = 0.1 * jax.random.normal(ks[7], (64,), jnp.float32)
    # fc weights stored (in, out); fc1 rows are in torch NCHW-flatten order (c,h,w).
    p["fc1_w"] = 0.02 * jax.random.normal(ks[8], (64 * 8 * 8, 256), jnp.float32)
    p["fc1_b"] = 0.02 * jax.random.normal(ks[9], (256,), jnp.float32)
    p["fc2_w"] = 0.02 * jax.random.normal(ks[10], (256, 100), jnp.float32)
    p["fc2_b"] = 0.02 * jax.random.normal(ks[11], (100,), jnp.float32)
    return p


def prepare_params(p, *, eps=1e-5):
    """One-time prep: fold eval-mode BN (mean=0, var=1), zero-pad K and cout to lane
    multiples, permute fc1 rows from torch NCHW-flatten to NHWC-flatten order, cast
    matmul operands to bf16 (f32 accumulation happens in-kernel)."""
    q = {}
    for i, cin, cout, kpad in ((1, 3, 32, K1_PAD), (2, 32, 64, K2_PAD)):
        w = p[f"conv{i}_w"].reshape(9 * cin, cout)            # rows (dh, dw, cin)
        scale = p[f"bn{i}_gamma"] / jnp.sqrt(1.0 + eps)       # running_var = 1
        bias = p[f"bn{i}_beta"] + p[f"conv{i}_b"] * scale     # running_mean = 0
        cpad = COUT_PAD - cout
        w = jnp.pad(w, ((0, kpad - 9 * cin), (0, cpad)))
        q[f"conv{i}_w"] = w.astype(jnp.bfloat16)
        q[f"conv{i}_scale"] = jnp.pad(scale, (0, cpad)).reshape(1, COUT_PAD).astype(jnp.float32)
        q[f"conv{i}_bias"] = jnp.pad(bias, (0, cpad)).reshape(1, COUT_PAD).astype(jnp.float32)
    # fc1: fold the NCHW flatten permutation into the weight rows (no runtime transpose).
    w1 = p["fc1_w"].reshape(64, 8, 8, 256).transpose(1, 2, 0, 3).reshape(64 * 8 * 8, 256)
    q["fc1_w"] = w1.astype(jnp.bfloat16)
    q["fc1_b"] = p["fc1_b"].reshape(1, 256).astype(jnp.float32)
    # fc2: pad N 100 -> 128 for lane-dense stores; padded logits sliced off at the end.
    q["fc2_w"] = jnp.pad(p["fc2_w"], ((0, 0), (0, 128 - 100))).astype(jnp.bfloat16)
    q["fc2_b"] = jnp.pad(p["fc2_b"], (0, 128 - 100)).reshape(1, 128).astype(jnp.float32)
    return q


# ----------------------------------------------------------------------------
# Full forward
# ----------------------------------------------------------------------------
def simple_cnn_forward(x_nchw, qp):
    """Forward pass matching SimpleCNN.forward (BN in eval mode). Input NCHW."""
    x = jnp.transpose(x_nchw, (0, 2, 3, 1))                       # -> NHWC once
    N, H, W, _ = x.shape
    # Block 1: 32x32x3 -> 16x16x32 (stored lane-padded to 128, bf16)
    cols1 = im2col_pool_phases(x, 3, K1_PAD)                      # (N, 1024, 128) bf16
    y1 = conv_block(cols1, qp["conv1_w"], qp["conv1_scale"], qp["conv1_bias"])
    y1 = y1.reshape(N, H // 2, W // 2, COUT_PAD)
    # Block 2: 16x16x32 -> 8x8x64
    cols2 = im2col_pool_phases(y1, 32, K2_PAD)                    # (N, 256, 384) bf16
    y2 = conv_block(cols2, qp["conv2_w"], qp["conv2_scale"], qp["conv2_bias"])
    y2 = y2.reshape(N, H // 4, W // 4, COUT_PAD)[..., :64]        # strip lane padding
    # Flatten in NHWC order (torch's NCHW permutation already lives in fc1_w rows).
    x_flat = y2.reshape(N, (H // 4) * (W // 4) * 64)              # (N, 4096) bf16
    logits = fused_mlp(x_flat, qp["fc1_w"], qp["fc1_b"], qp["fc2_w"], qp["fc2_b"])
    return logits[:, :100]                                        # strip fc2 padding


# ----------------------------------------------------------------------------
# Pure-JAX reference (mirrors the bf16-operand / f32-accumulate numerics)
# ----------------------------------------------------------------------------
def reference_forward(x_nchw, p, eps=1e-5):
    x = jnp.transpose(x_nchw, (0, 2, 3, 1))

    def block(x, w, b, g, bt):
        y = jax.lax.conv_general_dilated(
            x.astype(jnp.bfloat16), w.astype(jnp.bfloat16), (1, 1), "SAME",
            dimension_numbers=("NHWC", "HWIO", "NHWC"),
            preferred_element_type=jnp.float32) + b
        y = y / jnp.sqrt(1.0 + eps) * g + bt          # BN eval: mean=0, var=1
        y = jnp.maximum(y, 0.0)
        n, hh, ww, c = y.shape
        y = y.reshape(n, hh // 2, 2, ww // 2, 2, c).max(axis=(2, 4))
        return y.astype(jnp.bfloat16)                 # kernel stores pooled act as bf16

    x = block(x, p["conv1_w"], p["conv1_b"], p["bn1_gamma"], p["bn1_beta"])
    x = block(x, p["conv2_w"], p["conv2_b"], p["bn2_gamma"], p["bn2_beta"])
    n = x.shape[0]
    x = jnp.transpose(x, (0, 3, 1, 2)).reshape(n, -1)       # torch-style NCHW flatten
    h = jnp.maximum(
        jnp.dot(x.astype(jnp.bfloat16), p["fc1_w"].astype(jnp.bfloat16),
                preferred_element_type=jnp.float32) + p["fc1_b"], 0.0)
    return jnp.dot(h.astype(jnp.bfloat16), p["fc2_w"].astype(jnp.bfloat16),
                   preferred_element_type=jnp.float32) + p["fc2_b"]


if __name__ == "__main__":
    key = jax.random.PRNGKey(0)
    kx, kp = jax.random.split(key)
    # Input implied by fc1 = 64*8*8: 32x32 spatial, 3 channels. Small batch = 2.
    x = jax.random.normal(kx, (2, 3, 32, 32), jnp.float32)   # NCHW, like PyTorch
    params = init_params(kp)
    qparams = prepare_params(params)

    out = jax.block_until_ready(jax.jit(simple_cnn_forward)(x, qparams))
    assert out.shape == (2, 100), out.shape

    ref = jax.block_until_ready(jax.jit(reference_forward)(x, params))
    max_err = float(jnp.max(jnp.abs(out - ref)))
    assert jnp.allclose(out, ref, rtol=1e-2, atol=1e-2), max_err

    print("KERNEL_OK")
</pallas_src>

<mosaic_0001>
module attributes {stable_mosaic.version = 11 : i64} {
  func.func @_conv_bn_relu_pool_kernel(%arg0: i32, %arg1: memref<1x1024x128xbf16, #tpu.memory_space<vmem>>, %arg2: memref<128x128xbf16, #tpu.memory_space<vmem>>, %arg3: memref<1x128xf32, #tpu.memory_space<vmem>>, %arg4: memref<1x128xf32, #tpu.memory_space<vmem>>, %arg5: memref<1x256x128xbf16, #tpu.memory_space<vmem>>) attributes {dimension_semantics = [#tpu.dimension_semantics<parallel>], iteration_bounds = array<i64: 2>, scalar_prefetch = 0 : i64, scratch_operands = 0 : i64, tpu.core_type = #tpu.core_type<tc>, window_params = [{transform_indices = @transform_0, window_bounds = array<i64: 1, 1024, 128>}, {pipeline_mode = #tpu.pipeline_mode<synchronous>, transform_indices = @transform_1, window_bounds = array<i64: 128, 128>}, {pipeline_mode = #tpu.pipeline_mode<synchronous>, transform_indices = @transform_2, window_bounds = array<i64: 1, 128>}, {pipeline_mode = #tpu.pipeline_mode<synchronous>, transform_indices = @transform_3, window_bounds = array<i64: 1, 128>}, {transform_indices = @transform_4, window_bounds = array<i64: 1, 256, 128>}]} {
    %c0 = arith.constant 0 : index
    %c0_0 = arith.constant 0 : index
    %c0_1 = arith.constant 0 : index
    %0 = vector.load %arg1[%c0, %c0_0, %c0_1] : memref<1x1024x128xbf16, #tpu.memory_space<vmem>>, vector<1x1024x128xbf16>
    %1 = vector.shape_cast %0 : vector<1x1024x128xbf16> to vector<1024x128xbf16>
    %c0_2 = arith.constant 0 : index
    %c0_3 = arith.constant 0 : index
    %2 = vector.load %arg2[%c0_2, %c0_3] : memref<128x128xbf16, #tpu.memory_space<vmem>>, vector<128x128xbf16>
    %cst = arith.constant dense<0.000000e+00> : vector<1024x128xf32>
    %3 = tpu.matmul %1, %2, %cst {dimension_numbers = #tpu.dot_dimension_numbers<[1], [0], [0], [1], [0, 0, 1, 1], [], []>} : vector<1024x128xbf16>, vector<128x128xbf16>, vector<1024x128xf32> -> vector<1024x128xf32>
    %c0_4 = arith.constant 0 : index
    %c0_5 = arith.constant 0 : index
    %4 = vector.load %arg3[%c0_4, %c0_5] : memref<1x128xf32, #tpu.memory_space<vmem>>, vector<1x128xf32>
    %5 = vector.broadcast %4 : vector<1x128xf32> to vector<1024x128xf32>
    %6 = arith.mulf %3, %5 : vector<1024x128xf32>
    %c0_6 = arith.constant 0 : index
    %c0_7 = arith.constant 0 : index
    %7 = vector.load %arg4[%c0_6, %c0_7] : memref<1x128xf32, #tpu.memory_space<vmem>>, vector<1x128xf32>
    %8 = vector.broadcast %7 : vector<1x128xf32> to vector<1024x128xf32>
    %9 = arith.addf %6, %8 : vector<1024x128xf32>
    %10 = vector.extract_strided_slice %9 {offsets = [0, 0], sizes = [256, 128], strides = [1, 1]} : vector<1024x128xf32> to vector<256x128xf32>
    %11 = vector.extract_strided_slice %9 {offsets = [256, 0], sizes = [256, 128], strides = [1, 1]} : vector<1024x128xf32> to vector<256x128xf32>
    %12 = arith.maximumf %10, %11 : vector<256x128xf32>
    %13 = vector.extract_strided_slice %9 {offsets = [512, 0], sizes = [256, 128], strides = [1, 1]} : vector<1024x128xf32> to vector<256x128xf32>
    %14 = vector.extract_strided_slice %9 {offsets = [768, 0], sizes = [256, 128], strides = [1, 1]} : vector<1024x128xf32> to vector<256x128xf32>
    %15 = arith.maximumf %13, %14 : vector<256x128xf32>
    %16 = arith.maximumf %12, %15 : vector<256x128xf32>
    %cst_8 = arith.constant 0.000000e+00 : f32
    %17 = vector.broadcast %cst_8 : f32 to vector<256x128xf32>
    %18 = arith.maximumf %16, %17 : vector<256x128xf32>
    %19 = arith.truncf %18 : vector<256x128xf32> to vector<256x128xbf16>
    %c0_9 = arith.constant 0 : index
    %c0_10 = arith.constant 0 : index
    %c0_11 = arith.constant 0 : index
    %20 = vector.load %arg5[%c0_9, %c0_10, %c0_11] : memref<1x256x128xbf16, #tpu.memory_space<vmem>>, vector<1x256x128xbf16>
    %21 = vector.shape_cast %20 : vector<1x256x128xbf16> to vector<256x128xbf16>
    %22 = vector.shape_cast %19 : vector<256x128xbf16> to vector<1x256x128xbf16>
    tpu.vector_store %arg5[%c0_9, %c0_10, %c0_11], %22 {strides = array<i32>} : memref<1x256x128xbf16, #tpu.memory_space<vmem>>, vector<1x256x128xbf16>,
    return
  }
  func.func @transform_0(%arg0: i32) -> (i32, i32, i32) {
    %c0_i32 = arith.constant 0 : i32
    %c0_i32_0 = arith.constant 0 : i32
    %c0_i32_1 = arith.constant 0 : i32
    return %arg0, %c0_i32, %c0_i32_0 : i32, i32, i32
  }
  func.func @transform_1(%arg0: i32) -> (i32, i32) {
    %c0_i32 = arith.constant 0 : i32
    %c0_i32_0 = arith.constant 0 : i32
    %c0_i32_1 = arith.constant 0 : i32
    return %c0_i32, %c0_i32_0 : i32, i32
  }
  func.func @transform_2(%arg0: i32) -> (i32, i32) {
    %c0_i32 = arith.constant 0 : i32
    %c0_i32_0 = arith.constant 0 : i32
    %c0_i32_1 = arith.constant 0 : i32
    return %c0_i32, %c0_i32_0 : i32, i32
  }
  func.func @transform_3(%arg0: i32) -> (i32, i32) {
    %c0_i32 = arith.constant 0 : i32
    %c0_i32_0 = arith.constant 0 : i32
    %c0_i32_1 = arith.constant 0 : i32
    return %c0_i32, %c0_i32_0 : i32, i32
  }
  func.func @transform_4(%arg0: i32) -> (i32, i32, i32) {
    %c0_i32 = arith.constant 0 : i32
    %c0_i32_0 = arith.constant 0 : i32
    %c0_i32_1 = arith.constant 0 : i32
    return %arg0, %c0_i32, %c0_i32_0 : i32, i32, i32
  }
}

module attributes {stable_mosaic.version = 11 : i64} {
  func.func @_conv_bn_relu_pool_kernel(%arg0: i32, %arg1: memref<1x256x384xbf16, #tpu.memory_space<vmem>>, %arg2: memref<384x128xbf16, #tpu.memory_space<vmem>>, %arg3: memref<1x128xf32, #tpu.memory_space<vmem>>, %arg4: memref<1x128xf32, #tpu.memory_space<vmem>>, %arg5: memref<1x64x128xbf16, #tpu.memory_space<vmem>>) attributes {dimension_semantics = [#tpu.dimension_semantics<parallel>], iteration_bounds = array<i64: 2>, scalar_prefetch = 0 : i64, scratch_operands = 0 : i64, tpu.core_type = #tpu.core_type<tc>, window_params = [{transform_indices = @transform_0, window_bounds = array<i64: 1, 256, 384>}, {pipeline_mode = #tpu.pipeline_mode<synchronous>, transform_indices = @transform_1, window_bounds = array<i64: 384, 128>}, {pipeline_mode = #tpu.pipeline_mode<synchronous>, transform_indices = @transform_2, window_bounds = array<i64: 1, 128>}, {pipeline_mode = #tpu.pipeline_mode<synchronous>, transform_indices = @transform_3, window_bounds = array<i64: 1, 128>}, {transform_indices = @transform_4, window_bounds = array<i64: 1, 64, 128>}]} {
    %c0 = arith.constant 0 : index
    %c0_0 = arith.constant 0 : index
    %c0_1 = arith.constant 0 : index
    %0 = vector.load %arg1[%c0, %c0_0, %c0_1] : memref<1x256x384xbf16, #tpu.memory_space<vmem>>, vector<1x256x384xbf16>
    %1 = vector.shape_cast %0 : vector<1x256x384xbf16> to vector<256x384xbf16>
    %c0_2 = arith.constant 0 : index
    %c0_3 = arith.constant 0 : index
    %2 = vector.load %arg2[%c0_2, %c0_3] : memref<384x128xbf16, #tpu.memory_space<vmem>>, vector<384x128xbf16>
    %cst = arith.constant dense<0.000000e+00> : vector<256x128xf32>
    %3 = tpu.matmul %1, %2, %cst {dimension_numbers = #tpu.dot_dimension_numbers<[1], [0], [0], [1], [0, 0, 1, 1], [], []>} : vector<256x384xbf16>, vector<384x128xbf16>, vector<256x128xf32> -> vector<256x128xf32>
    %c0_4 = arith.constant 0 : index
    %c0_5 = arith.constant 0 : index
    %4 = vector.load %arg3[%c0_4, %c0_5] : memref<1x128xf32, #tpu.memory_space<vmem>>, vector<1x128xf32>
    %5 = vector.broadcast %4 : vector<1x128xf32> to vector<256x128xf32>
    %6 = arith.mulf %3, %5 : vector<256x128xf32>
    %c0_6 = arith.constant 0 : index
    %c0_7 = arith.constant 0 : index
    %7 = vector.load %arg4[%c0_6, %c0_7] : memref<1x128xf32, #tpu.memory_space<vmem>>, vector<1x128xf32>
    %8 = vector.broadcast %7 : vector<1x128xf32> to vector<256x128xf32>
    %9 = arith.addf %6, %8 : vector<256x128xf32>
    %10 = vector.extract_strided_slice %9 {offsets = [0, 0], sizes = [64, 128], strides = [1, 1]} : vector<256x128xf32> to vector<64x128xf32>
    %11 = vector.extract_strided_slice %9 {offsets = [64, 0], sizes = [64, 128], strides = [1, 1]} : vector<256x128xf32> to vector<64x128xf32>
    %12 = arith.maximumf %10, %11 : vector<64x128xf32>
    %13 = vector.extract_strided_slice %9 {offsets = [128, 0], sizes = [64, 128], strides = [1, 1]} : vector<256x128xf32> to vector<64x128xf32>
    %14 = vector.extract_strided_slice %9 {offsets = [192, 0], sizes = [64, 128], strides = [1, 1]} : vector<256x128xf32> to vector<64x128xf32>
    %15 = arith.maximumf %13, %14 : vector<64x128xf32>
    %16 = arith.maximumf %12, %15 : vector<64x128xf32>
    %cst_8 = arith.constant 0.000000e+00 : f32
    %17 = vector.broadcast %cst_8 : f32 to vector<64x128xf32>
    %18 = arith.maximumf %16, %17 : vector<64x128xf32>
    %19 = arith.truncf %18 : vector<64x128xf32> to vector<64x128xbf16>
    %c0_9 = arith.constant 0 : index
    %c0_10 = arith.constant 0 : index
    %c0_11 = arith.constant 0 : index
    %20 = vector.load %arg5[%c0_9, %c0_10, %c0_11] : memref<1x64x128xbf16, #tpu.memory_space<vmem>>, vector<1x64x128xbf16>
    %21 = vector.shape_cast %20 : vector<1x64x128xbf16> to vector<64x128xbf16>
    %22 = vector.shape_cast %19 : vector<64x128xbf16> to vector<1x64x128xbf16>
    tpu.vector_store %arg5[%c0_9, %c0_10, %c0_11], %22 {strides = array<i32>} : memref<1x64x128xbf16, #tpu.memory_space<vmem>>, vector<1x64x128xbf16>,
    return
  }
  func.func @transform_0(%arg0: i32) -> (i32, i32, i32) {
    %c0_i32 = arith.constant 0 : i32
    %c0_i32_0 = arith.constant 0 : i32
    %c0_i32_1 = arith.constant 0 : i32
    return %arg0, %c0_i32, %c0_i32_0 : i32, i32, i32
  }
  func.func @transform_1(%arg0: i32) -> (i32, i32) {
    %c0_i32 = arith.constant 0 : i32
    %c0_i32_0 = arith.constant 0 : i32
    %c0_i32_1 = arith.constant 0 : i32
    return %c0_i32, %c0_i32_0 : i32, i32
  }
  func.func @transform_2(%arg0: i32) -> (i32, i32) {
    %c0_i32 = arith.constant 0 : i32
    %c0_i32_0 = arith.constant 0 : i32
    %c0_i32_1 = arith.constant 0 : i32
    return %c0_i32, %c0_i32_0 : i32, i32
  }
  func.func @transform_3(%arg0: i32) -> (i32, i32) {
    %c0_i32 = arith.constant 0 : i32
    %c0_i32_0 = arith.constant 0 : i32
    %c0_i32_1 = arith.constant 0 : i32
    return %c0_i32, %c0_i32_0 : i32, i32
  }
  func.func @transform_4(%arg0: i32) -> (i32, i32, i32) {
    %c0_i32 = arith.constant 0 : i32
    %c0_i32_0 = arith.constant 0 : i32
    %c0_i32_1 = arith.constant 0 : i32
    return %arg0, %c0_i32, %c0_i32_0 : i32, i32, i32
  }
}

module attributes {stable_mosaic.version = 11 : i64} {
  func.func @_mlp_kernel(%arg0: i32, %arg1: memref<2x4096xbf16, #tpu.memory_space<vmem>>, %arg2: memref<4096x256xbf16, #tpu.memory_space<vmem>>, %arg3: memref<1x256xf32, #tpu.memory_space<vmem>>, %arg4: memref<256x128xbf16, #tpu.memory_space<vmem>>, %arg5: memref<1x128xf32, #tpu.memory_space<vmem>>, %arg6: memref<2x128xf32, #tpu.memory_space<vmem>>) attributes {dimension_semantics = [#tpu.dimension_semantics<arbitrary>], iteration_bounds = array<i64: 1>, scalar_prefetch = 0 : i64, scratch_operands = 0 : i64, tpu.core_type = #tpu.core_type<tc>, window_params = [{pipeline_mode = #tpu.pipeline_mode<synchronous>, transform_indices = @transform_0, window_bounds = array<i64: 2, 4096>}, {pipeline_mode = #tpu.pipeline_mode<synchronous>, transform_indices = @transform_1, window_bounds = array<i64: 4096, 256>}, {pipeline_mode = #tpu.pipeline_mode<synchronous>, transform_indices = @transform_2, window_bounds = array<i64: 1, 256>}, {pipeline_mode = #tpu.pipeline_mode<synchronous>, transform_indices = @transform_3, window_bounds = array<i64: 256, 128>}, {pipeline_mode = #tpu.pipeline_mode<synchronous>, transform_indices = @transform_4, window_bounds = array<i64: 1, 128>}, {pipeline_mode = #tpu.pipeline_mode<synchronous>, transform_indices = @transform_5, window_bounds = array<i64: 2, 128>}]} {
    %c0 = arith.constant 0 : index
    %c0_0 = arith.constant 0 : index
    %0 = vector.load %arg1[%c0, %c0_0] : memref<2x4096xbf16, #tpu.memory_space<vmem>>, vector<2x4096xbf16>
    %c0_1 = arith.constant 0 : index
    %c0_2 = arith.constant 0 : index
    %1 = vector.load %arg2[%c0_1, %c0_2] : memref<4096x256xbf16, #tpu.memory_space<vmem>>, vector<4096x256xbf16>
    %cst = arith.constant dense<0.000000e+00> : vector<2x256xf32>
    %2 = tpu.matmul %0, %1, %cst {dimension_numbers = #tpu.dot_dimension_numbers<[1], [0], [0], [1], [0, 0, 1, 1], [], []>} : vector<2x4096xbf16>, vector<4096x256xbf16>, vector<2x256xf32> -> vector<2x256xf32>
    %c0_3 = arith.constant 0 : index
    %c0_4 = arith.constant 0 : index
    %3 = vector.load %arg3[%c0_3, %c0_4] : memref<1x256xf32, #tpu.memory_space<vmem>>, vector<1x256xf32>
    %4 = vector.broadcast %3 : vector<1x256xf32> to vector<2x256xf32>
    %5 = arith.addf %2, %4 : vector<2x256xf32>
    %cst_5 = arith.constant 0.000000e+00 : f32
    %6 = vector.broadcast %cst_5 : f32 to vector<2x256xf32>
    %7 = arith.maximumf %5, %6 : vector<2x256xf32>
    %8 = arith.truncf %7 : vector<2x256xf32> to vector<2x256xbf16>
    %c0_6 = arith.constant 0 : index
    %c0_7 = arith.constant 0 : index
    %9 = vector.load %arg4[%c0_6, %c0_7] : memref<256x128xbf16, #tpu.memory_space<vmem>>, vector<256x128xbf16>
    %cst_8 = arith.constant dense<0.000000e+00> : vector<2x128xf32>
    %10 = tpu.matmul %8, %9, %cst_8 {dimension_numbers = #tpu.dot_dimension_numbers<[1], [0], [0], [1], [0, 0, 1, 1], [], []>} : vector<2x256xbf16>, vector<256x128xbf16>, vector<2x128xf32> -> vector<2x128xf32>
    %c0_9 = arith.constant 0 : index
    %c0_10 = arith.constant 0 : index
    %11 = vector.load %arg5[%c0_9, %c0_10] : memref<1x128xf32, #tpu.memory_space<vmem>>, vector<1x128xf32>
    %12 = vector.broadcast %11 : vector<1x128xf32> to vector<2x128xf32>
    %13 = arith.addf %10, %12 : vector<2x128xf32>
    %c0_11 = arith.constant 0 : index
    %c0_12 = arith.constant 0 : index
    %14 = vector.load %arg6[%c0_11, %c0_12] : memref<2x128xf32, #tpu.memory_space<vmem>>, vector<2x128xf32>
    tpu.vector_store %arg6[%c0_11, %c0_12], %13 {strides = array<i32>} : memref<2x128xf32, #tpu.memory_space<vmem>>, vector<2x128xf32>,
    return
  }
  func.func @transform_0(%arg0: i32) -> (i32, i32) {
    %c0_i32 = arith.constant 0 : i32
    %c0_i32_0 = arith.constant 0 : i32
    %c0_i32_1 = arith.constant 0 : i32
    return %c0_i32, %c0_i32_0 : i32, i32
  }
  func.func @transform_1(%arg0: i32) -> (i32, i32) {
    %c0_i32 = arith.constant 0 : i32
    %c0_i32_0 = arith.constant 0 : i32
    %c0_i32_1 = arith.constant 0 : i32
    return %c0_i32, %c0_i32_0 : i32, i32
  }
  func.func @transform_2(%arg0: i32) -> (i32, i32) {
    %c0_i32 = arith.constant 0 : i32
    %c0_i32_0 = arith.constant 0 : i32
    %c0_i32_1 = arith.constant 0 : i32
    return %c0_i32, %c0_i32_0 : i32, i32
  }
  func.func @transform_3(%arg0: i32) -> (i32, i32) {
    %c0_i32 = arith.constant 0 : i32
    %c0_i32_0 = arith.constant 0 : i32
    %c0_i32_1 = arith.constant 0 : i32
    return %c0_i32, %c0_i32_0 : i32, i32
  }
  func.func @transform_4(%arg0: i32) -> (i32, i32) {
    %c0_i32 = arith.constant 0 : i32
    %c0_i32_0 = arith.constant 0 : i32
    %c0_i32_1 = arith.constant 0 : i32
    return %c0_i32, %c0_i32_0 : i32, i32
  }
  func.func @transform_5(%arg0: i32) -> (i32, i32) {
    %c0_i32 = arith.constant 0 : i32
    %c0_i32_0 = arith.constant 0 : i32
    %c0_i32_1 = arith.constant 0 : i32
    return %c0_i32, %c0_i32_0 : i32, i32
  }
}

</mosaic_0001>

<bundles_post_ra>
// kernel: simple_cnn_forward.3
= control target key start
LH: loop header
LB: loop body
LE: loop exit
PB: predicated region body
PF: predicated region fallthrough
CT: control target
= control target key end

     0   :  { %s2524_s15 = smov 0   ;;  %s3180_s0 = inlined_call_operand.vmem [shape: bf16[2,1024,128], index: 0, kind: input, shape index: {}]   ;;  %s3181_s1 = inlined_call_operand.vmem [shape: bf16[128,128], index: 1, kind: input, shape index: {}]   ;;  %s3182_s2 = inlined_call_operand.vmem [shape: f32[1,128], index: 2, kind: input, shape index: {}]   ;;  %s3183_s3 = inlined_call_operand.vmem [shape: f32[1,128], index: 3, kind: input, shape index: {}]   ;;  %s3184_s4 = inlined_call_operand.vmem [shape: bf16[2,256,128], index: 4, kind: output, shape index: {}]  }
   0x1 LB: > { %s1933_s16 = sadd.s32 4294967295, %s2497_s15   ;;  %p1937_p0 = scmp.ge.s32.totalorder %s2497_s15, 1  ;;  %s2497_s15 = sphi %s2524_s15, %s14_s15  }
   0x2   : > { %p162_p1 = scmp.lt.s32.totalorder %s2497_s15, 3 }
   0x4   : > { %p163_p2 = pnand %p1937_p0, %p162_p1 }
   0x6   : > { %166 = sbr.rel (%p163_p2) target bundleno = 401 (0x191), region = 36 }
   0xd   : > { %v2419_v0 = vld [vmem:[%s3181_s1] sm:$0xff]   ;;  %p188_p3 = scmp.lt.s32.totalorder %s1933_s16, 1  ;;  %v2420_v1 = vld [vmem:[%s3181_s1 + $0x8] sm:$0xff]   ;;  %v2421_v2 = vld [vmem:[%s3181_s1 + $0x10] sm:$0xff]  }
   0xe   : > { %2251 = vmatprep.subr.bf16.mxu0 %v2419_v0  ;;  %2395 = vmatprep.subr.bf16.mxu1 %v2419_v0  ;;  %v2422_v3 = vld [vmem:[%s3181_s1 + $0x18] sm:$0xff]   ;;  %v2423_v6 = vld [vmem:[%s3181_s1 + $0x20] sm:$0xff]   ;;  %v2424_v7 = vld [vmem:[%s3181_s1 + $0x28] sm:$0xff]  }
   0xf   : > { %s3226_s16 = smov (!%p188_p3, %s1933_s16), 1  ;;  %2252 = vmatpush3.bf16.msra.mxu0 %v2419_v0  ;;  %2403 = vmatpush3.bf16.msra.mxu1 %v2419_v0  ;;  %v2425_v8 = vld [vmem:[%s3181_s1 + $0x30] sm:$0xff]   ;;  %v2426_v9 = vld [vmem:[%s3181_s1 + $0x38] sm:$0xff]  }
  0x10   : > { %2253 = vmatprep.subr.bf16.mxu0 %v2420_v1  ;;  %2396 = vmatprep.subr.bf16.mxu1 %v2420_v1  ;;  %s2050_s23 = sshll.u32 %s3226_s16, 9  ;;  %s2051_s17 = sshll.u32 %s3226_s16, 7 }
  0x11   : > { %s2547_s26 = scalar_lea.vmem %s3180_s0, %s2050_s23  ;;  %s2990_s19 = scalar_lea.vmem %s3184_s4, %s2051_s17 }
  0x12   : > { %v2427_v4 = vld [vmem:[%s2547_s26] sm:$0xff]   ;;  %v2429_v10 = vld [vmem:[%s2547_s26 + $0x8] sm:$0xff]   ;;  %v2431_v12 = vld [vmem:[%s2547_s26 + $0x10] sm:$0xff]  }
  0x13   : > { %2254 = vmatpush3.bf16.msra.mxu0 %v2420_v1  ;;  %2404 = vmatpush3.bf16.msra.mxu1 %v2420_v1  ;;  %v2428_v5 = vld [vmem:[%s2547_s26 + $0x100] sm:$0xff]   ;;  %v2430_v11 = vld [vmem:[%s2547_s26 + $0x108] sm:$0xff]   ;;  %v2432_v13 = vld [vmem:[%s2547_s26 + $0x110] sm:$0xff]  }
  0x14   : > { %2255 = vmatprep.subr.bf16.mxu0 %v2421_v2  ;;  %2397 = vmatprep.subr.bf16.mxu1 %v2421_v2  ;;  %v2433_v14 = vld [vmem:[%s2547_s26 + $0x18] sm:$0xff]   ;;  %v2435_v16 = vld [vmem:[%s2547_s26 + $0x20] sm:$0xff]   ;;  %v2437_v18 = vld [vmem:[%s2547_s26 + $0x28] sm:$0xff]  }
  0x15   : > { %2267 = vmatprep.mubr.bf16.mxu0 %v2427_v4  ;;  %2331 = vmatprep.mubr.bf16.mxu1 %v2428_v5  ;;  %v2434_v15 = vld [vmem:[%s2547_s26 + $0x118] sm:$0xff]   ;;  %v2436_v17 = vld [vmem:[%s2547_s26 + $0x120] sm:$0xff]   ;;  %v2438_v19 = vld [vmem:[%s2547_s26 + $0x128] sm:$0xff]  }
  0x16   : > { %v2439_v20 = vld [vmem:[%s2547_s26 + $0x30] sm:$0xff]   ;;  %v2441_v22 = vld [vmem:[%s2547_s26 + $0x38] sm:$0xff]   ;;  %v2443_v24 = vld [vmem:[%s2547_s26 + $0x40] sm:$0xff]  }
  0x17   : > { %2256 = vmatpush3.bf16.msra.mxu0 %v2421_v2  ;;  %2405 = vmatpush3.bf16.msra.mxu1 %v2421_v2  ;;  %v2440_v21 = vld [vmem:[%s2547_s26 + $0x130] sm:$0xff]   ;;  %v2442_v23 = vld [vmem:[%s2547_s26 + $0x138] sm:$0xff]   ;;  %v2444_v25 = vld [vmem:[%s2547_s26 + $0x140] sm:$0xff]  }
  0x18   : > { %2257 = vmatprep.subr.bf16.mxu0 %v2422_v3  ;;  %2398 = vmatprep.subr.bf16.mxu1 %v2422_v3  ;;  %v2445_v26 = vld [vmem:[%s2547_s26 + $0x48] sm:$0xff]   ;;  %v2447_v28 = vld [vmem:[%s2547_s26 + $0x50] sm:$0xff]   ;;  %v2449_v30 = vld [vmem:[%s2547_s26 + $0x58] sm:$0xff]  }
  0x19   : > { %v2446_v27 = vld [vmem:[%s2547_s26 + $0x148] sm:$0xff]   ;;  %v2448_v29 = vld [vmem:[%s2547_s26 + $0x150] sm:$0xff]   ;;  %v2450_v31 = vld [vmem:[%s2547_s26 + $0x158] sm:$0xff]  }
  0x1a   : > { %v2451_v32 = vld [vmem:[%s2547_s26 + $0x60] sm:$0xff]   ;;  %v2453_v34 = vld [vmem:[%s2547_s26 + $0x68] sm:$0xff]   ;;  %v2455_v36 = vld [vmem:[%s2547_s26 + $0x70] sm:$0xff]  }
  0x1b   : > { %2258 = vmatpush3.bf16.msra.mxu0 %v2422_v3  ;;  %2406 = vmatpush3.bf16.msra.mxu1 %v2422_v3  ;;  %v2452_v33 = vld [vmem:[%s2547_s26 + $0x160] sm:$0xff]   ;;  %v2454_v35 = vld [vmem:[%s2547_s26 + $0x168] sm:$0xff]   ;;  %v2456_v37 = vld [vmem:[%s2547_s26 + $0x170] sm:$0xff]  }
  0x1c   : > { %2259 = vmatprep.subr.bf16.mxu0 %v2423_v6  ;;  %2399 = vmatprep.subr.bf16.mxu1 %v2423_v6  ;;  %v2457_v38 = vld [vmem:[%s2547_s26 + $0x78] sm:$0xff]   ;;  %v2459_v40 = vld [vmem:[%s2547_s26 + $0x80] sm:$0xff]   ;;  %v2461_v42 = vld [vmem:[%s2547_s26 + $0x88] sm:$0xff]  }
  0x1d   : > { %v2458_v39 = vld [vmem:[%s2547_s26 + $0x178] sm:$0xff]   ;;  %v2460_v41 = vld [vmem:[%s2547_s26 + $0x180] sm:$0xff]   ;;  %v2462_v43 = vld [vmem:[%s2547_s26 + $0x188] sm:$0xff]  }
  0x1e   : > { %v2463_v44 = vld [vmem:[%s2547_s26 + $0x90] sm:$0xff]   ;;  %v2465_v46 = vld [vmem:[%s2547_s26 + $0x98] sm:$0xff]   ;;  %v2467_v48 = vld [vmem:[%s2547_s26 + $0xa0] sm:$0xff]  }
  0x1f   : > { %2260 = vmatpush3.bf16.msra.mxu0 %v2423_v6  ;;  %2407 = vmatpush3.bf16.msra.mxu1 %v2423_v6  ;;  %v2464_v45 = vld [vmem:[%s2547_s26 + $0x190] sm:$0xff]   ;;  %v2466_v47 = vld [vmem:[%s2547_s26 + $0x198] sm:$0xff]   ;;  %v2468_v49 = vld [vmem:[%s2547_s26 + $0x1a0] sm:$0xff]  }
  0x20   : > { %2261 = vmatprep.subr.bf16.mxu0 %v2424_v7  ;;  %2400 = vmatprep.subr.bf16.mxu1 %v2424_v7  ;;  %v2469_v50 = vld [vmem:[%s2547_s26 + $0xa8] sm:$0xff]   ;;  %v2471_v52 = vld [vmem:[%s2547_s26 + $0xb0] sm:$0xff]   ;;  %v2473_v54 = vld [vmem:[%s2547_s26 + $0xb8] sm:$0xff]  }
  0x21   : > { %v2470_v51 = vld [vmem:[%s2547_s26 + $0x1a8] sm:$0xff]   ;;  %v2472_v53 = vld [vmem:[%s2547_s26 + $0x1b0] sm:$0xff]   ;;  %v2474_v55 = vld [vmem:[%s2547_s26 + $0x1b8] sm:$0xff]  }
  0x22   : > { %v2475_v56 = vld [vmem:[%s2547_s26 + $0xc0] sm:$0xff]   ;;  %v2477_v58 = vld [vmem:[%s2547_s26 + $0xc8] sm:$0xff]   ;;  %v2479_v60 = vld [vmem:[%s2547_s26 + $0xd0] sm:$0xff]  }
  0x23   : > { %2262 = vmatpush3.bf16.msra.mxu0 %v2424_v7  ;;  %2408 = vmatpush3.bf16.msra.mxu1 %v2424_v7  ;;  %v2476_v57 = vld [vmem:[%s2547_s26 + $0x1c0] sm:$0xff]   ;;  %v2478_v59 = vld [vmem:[%s2547_s26 + $0x1c8] sm:$0xff]   ;;  %v2480_v61 = vld [vmem:[%s2547_s26 + $0x1d0] sm:$0xff]  }
  0x24   : > { %2263 = vmatprep.subr.bf16.mxu0 %v2425_v8  ;;  %2401 = vmatprep.subr.bf16.mxu1 %v2425_v8  ;;  %v2481_v62 = vld [vmem:[%s2547_s26 + $0xd8] sm:$0xff]   ;;  %v2483_v0 = vld [vmem:[%s2547_s26 + $0xe0] sm:$0xff]   ;;  %v2485_v2 = vld [vmem:[%s2547_s26 + $0xe8] sm:$0xff]  }
  0x25   : > { %v2482_v63 = vld [vmem:[%s2547_s26 + $0x1d8] sm:$0xff]   ;;  %v2484_v1 = vld [vmem:[%s2547_s26 + $0x1e0] sm:$0xff]   ;;  %v2486_v3 = vld [vmem:[%s2547_s26 + $0x1e8] sm:$0xff]  }
  0x26   : > { %v2487_v4 = vld [vmem:[%s2547_s26 + $0xf0] sm:$0xff]   ;;  %v2489_v6 = vld [vmem:[%s2547_s26 + $0xf8] sm:$0xff]  }
  0x27   : > { %2264 = vmatpush3.bf16.msra.mxu0 %v2425_v8  ;;  %2409 = vmatpush3.bf16.msra.mxu1 %v2425_v8  ;;  %v2488_v5 = vld [vmem:[%s2547_s26 + $0x1f0] sm:$0xff]   ;;  %v2490_v7 = vld [vmem:[%s2547_s26 + $0x1f8] sm:$0xff]  }
  0x28   : > { %2265 = vmatprep.subr.bf16.mxu0 %v2426_v9  ;;  %2402 = vmatprep.subr.bf16.mxu1 %v2426_v9 }
  0x2b   : > { %2266 = vmatpush3.bf16.msra.mxu0 %v2426_v9  ;;  %2410 = vmatpush3.bf16.msra.mxu1 %v2426_v9 }
  0x2e   : > { %2268 = vmatmul.mubr.bf16.vlgmr.msra.gmra.mrb[0].mxu0 %v2429_v10  ;;  %2332 = vmatmul.mubr.bf16.vlgmr.msra.gmra.mrb[0].mxu1 %v2430_v11 }
  0x2f   : > { %2271 = vmatprep.mubr.bf16.mxu0 %v2431_v12  ;;  %2335 = vmatprep.mubr.bf16.mxu1 %v2432_v13 }
  0x36   : > { %2272 = vmatmul.mubr.bf16.gmra.mrb[4].mxu0 %v2433_v14  ;;  %2336 = vmatmul.mubr.bf16.gmra.mrb[4].mxu1 %v2434_v15 }
  0x37   : > { %2275 = vmatprep.mubr.bf16.mxu0 %v2435_v16  ;;  %2339 = vmatprep.mubr.bf16.mxu1 %v2436_v17 }
  0x3e   : > { %2276 = vmatmul.mubr.bf16.gmra.mrb[8].mxu0 %v2437_v18  ;;  %2340 = vmatmul.mubr.bf16.gmra.mrb[8].mxu1 %v2438_v19 }
  0x3f   : > { %2279 = vmatprep.mubr.bf16.mxu0 %v2439_v20  ;;  %2343 = vmatprep.mubr.bf16.mxu1 %v2440_v21 }
  0x46   : > { %2280 = vmatmul.mubr.bf16.gmra.mrb[12].mxu0 %v2441_v22  ;;  %2344 = vmatmul.mubr.bf16.gmra.mrb[12].mxu1 %v2442_v23 }
  0x47   : > { %2283 = vmatprep.mubr.bf16.mxu0 %v2443_v24  ;;  %2347 = vmatprep.mubr.bf16.mxu1 %v2444_v25 }
  0x4e   : > { %2284 = vmatmul.mubr.bf16.gmra.mrb[16].mxu0 %v2445_v26  ;;  %2348 = vmatmul.mubr.bf16.gmra.mrb[16].mxu1 %v2446_v27 }
  0x4f   : > { %2287 = vmatprep.mubr.bf16.mxu0 %v2447_v28  ;;  %2351 = vmatprep.mubr.bf16.mxu1 %v2448_v29 }
  0x56   : > { %2288 = vmatmul.mubr.bf16.gmra.mrb[20].mxu0 %v2449_v30  ;;  %2352 = vmatmul.mubr.bf16.gmra.mrb[20].mxu1 %v2450_v31 }
  0x57   : > { %2291 = vmatprep.mubr.bf16.mxu0 %v2451_v32  ;;  %2355 = vmatprep.mubr.bf16.mxu1 %v2452_v33 }
  0x5e   : > { %2292 = vmatmul.mubr.bf16.gmra.mrb[24].mxu0 %v2453_v34  ;;  %2356 = vmatmul.mubr.bf16.gmra.mrb[24].mxu1 %v2454_v35 }
  0x5f   : > { %2295 = vmatprep.mubr.bf16.mxu0 %v2455_v36  ;;  %2359 = vmatprep.mubr.bf16.mxu1 %v2456_v37 }
  0x66   : > { %2296 = vmatmul.mubr.bf16.gmra.mrb[28].mxu0 %v2457_v38  ;;  %2360 = vmatmul.mubr.bf16.gmra.mrb[28].mxu1 %v2458_v39 }
  0x67   : > { %2299 = vmatprep.mubr.bf16.mxu0 %v2459_v40  ;;  %2363 = vmatprep.mubr.bf16.mxu1 %v2460_v41  ;;  %v2647_v40 = vld [vmem:[%s3182_s2] ss:$0 sm:$0xff] }
  0x6e   : > { %2300 = vmatmul.mubr.bf16.gmra.mrb[32].mxu0 %v2461_v42  ;;  %2364 = vmatmul.mubr.bf16.gmra.mrb[32].mxu1 %v2462_v43 }
  0x6f   : > { %2303 = vmatprep.mubr.bf16.mxu0 %v2463_v44  ;;  %2367 = vmatprep.mubr.bf16.mxu1 %v2464_v45 }
  0x76   : > { %2304 = vmatmul.mubr.bf16.gmra.mrb[36].mxu0 %v2465_v46  ;;  %2368 = vmatmul.mubr.bf16.gmra.mrb[36].mxu1 %v2466_v47 }
  0x77   : > { %2307 = vmatprep.mubr.bf16.mxu0 %v2467_v48  ;;  %2371 = vmatprep.mubr.bf16.mxu1 %v2468_v49 }
  0x7e   : > { %2308 = vmatmul.mubr.bf16.gmra.mrb[40].mxu0 %v2469_v50  ;;  %2372 = vmatmul.mubr.bf16.gmra.mrb[40].mxu1 %v2470_v51  ;;  %v2668_v51 = vld [vmem:[%s3183_s3] ss:$0 sm:$0xff] }
  0x7f   : > { %2311 = vmatprep.mubr.bf16.mxu0 %v2471_v52  ;;  %2375 = vmatprep.mubr.bf16.mxu1 %v2472_v53 }
  0x86   : > { %2312 = vmatmul.mubr.bf16.gmra.mrb[44].mxu0 %v2473_v54  ;;  %2376 = vmatmul.mubr.bf16.gmra.mrb[44].mxu1 %v2474_v55 }
  0x87   : > { %2315 = vmatprep.mubr.bf16.mxu0 %v2475_v56  ;;  %2379 = vmatprep.mubr.bf16.mxu1 %v2476_v57 }
  0x8e   : > { %2316 = vmatmul.mubr.bf16.gmra.mrb[48].mxu0 %v2477_v58  ;;  %2380 = vmatmul.mubr.bf16.gmra.mrb[48].mxu1 %v2478_v59 }
  0x8f   : > { %2319 = vmatprep.mubr.bf16.mxu0 %v2479_v60  ;;  %2383 = vmatprep.mubr.bf16.mxu1 %v2480_v61 }
  0x96   : > { %2320 = vmatmul.mubr.bf16.gmra.mrb[52].mxu0 %v2481_v62  ;;  %2384 = vmatmul.mubr.bf16.gmra.mrb[52].mxu1 %v2482_v63 }
  0x97   : > { %2323 = vmatprep.mubr.bf16.mxu0 %v2483_v0  ;;  %2387 = vmatprep.mubr.bf16.mxu1 %v2484_v1 }
  0x9e   : > { %2324 = vmatmul.mubr.bf16.gmra.mrb[56].mxu0 %v2485_v2  ;;  %2388 = vmatmul.mubr.bf16.gmra.mrb[56].mxu1 %v2486_v3 }
  0x9f   : > { %2327 = vmatprep.mubr.bf16.mxu0 %v2487_v4  ;;  %2391 = vmatprep.mubr.bf16.mxu1 %v2488_v5 }
  0xa6   : > { %2328 = vmatmul.mubr.bf16.gmra.mrb[60].mxu0 %v2489_v6  ;;  %2392 = vmatmul.mubr.bf16.gmra.mrb[60].mxu1 %v2490_v7 }
 0x101   : > { %v2269_v8 = vpop.f32.mrb[0].mxu0  ;;  %v2333_v9 = vpop.f32.mrb[0].mxu1 }
 0x102   : > { %v809_v10 = vpop.f32.mrb[1].mxu0  ;;  %v1065_v11 = vpop.f32.mrb[1].mxu1  ;;  %v1329_v45 = vmul.f32 %v2269_v8, %v2647_v40  ;;  %v1393_v46 = vmul.f32 %v2333_v9, %v2647_v40 }
 0x103   : > { %v2270_v12 = vpop.f32.mrb[2].mxu0  ;;  %v2334_v13 = vpop.f32.mrb[2].mxu1  ;;  %v1327_v47 = vmul.f32 %v2647_v40, %v809_v10  ;;  %v1391_v48 = vmul.f32 %v2647_v40, %v1065_v11 }
 0x104   : > { %v812_v14 = vpop.f32.mrb[3].mxu0  ;;  %v1068_v15 = vpop.f32.mrb[3].mxu1  ;;  %v1330_v52 = vmul.f32 %v2270_v12, %v2647_v40  ;;  %v1394_v53 = vmul.f32 %v2334_v13, %v2647_v40  ;;  %v2682_v61 = vadd.f32 %v2668_v51, %v1329_v45  ;;  %v2685_v62 = vadd.f32 %v2668_v51, %v1393_v46 }
 0x105   : > { %v1328_v54 = vmul.f32 %v2647_v40, %v812_v14  ;;  %v1392_v55 = vmul.f32 %v2647_v40, %v1068_v15  ;;  %v2688_v63 = vadd.f32 %v2668_v51, %v1327_v47  ;;  %v2691_v0 = vadd.f32 %v2668_v51, %v1391_v48 }
 0x106   : > { %v2694_v1 = vadd.f32 %v2668_v51, %v1330_v52  ;;  %v2697_v2 = vadd.f32 %v2668_v51, %v1394_v53 }
 0x107   : > { %v2700_v3 = vadd.f32 %v2668_v51, %v1328_v54  ;;  %v2703_v4 = vadd.f32 %v2668_v51, %v1392_v55 }
 0x109   : > { %v2273_v16 = vpop.f32.mrb[4].mxu0  ;;  %v2337_v17 = vpop.f32.mrb[4].mxu1 }
 0x10a   : > { %v825_v18 = vpop.f32.mrb[5].mxu0  ;;  %v1081_v19 = vpop.f32.mrb[5].mxu1  ;;  %v1333_v58 = vmul.f32 %v2273_v16, %v2647_v40  ;;  %v1397_v59 = vmul.f32 %v2337_v17, %v2647_v40 }
 0x10b   : > { %v2274_v20 = vpop.f32.mrb[6].mxu0  ;;  %v2338_v21 = vpop.f32.mrb[6].mxu1  ;;  %v1331_v60 = vmul.f32 %v2647_v40, %v825_v18  ;;  %v1395_v7 = vmul.f32 %v2647_v40, %v1081_v19 }
 0x10c   : > { %v828_v22 = vpop.f32.mrb[7].mxu0  ;;  %v1084_v23 = vpop.f32.mrb[7].mxu1  ;;  %v2706_v5 = vadd.f32 %v2668_v51, %v1333_v58  ;;  %v2709_v6 = vadd.f32 %v2668_v51, %v1397_v59  ;;  %v1334_v8 = vmul.f32 %v2274_v20, %v2647_v40  ;;  %v1398_v12 = vmul.f32 %v2338_v21, %v2647_v40 }
 0x10d   : > { %v2714_v11 = vadd.f32 %v2668_v51, %v1331_v60  ;;  %v1332_v13 = vmul.f32 %v2647_v40, %v828_v22  ;;  %v1396_v14 = vmul.f32 %v2647_v40, %v1084_v23 }
 0x111   : > { %v2277_v24 = vpop.f32.mrb[8].mxu0  ;;  %v2341_v25 = vpop.f32.mrb[8].mxu1 }
 0x112   : > { %v841_v26 = vpop.f32.mrb[9].mxu0  ;;  %v1097_v27 = vpop.f32.mrb[9].mxu1  ;;  %v1337_v17 = vmul.f32 %v2277_v24, %v2647_v40  ;;  %v1401_v18 = vmul.f32 %v2341_v25, %v2647_v40  ;;  %v2738_v25 = vadd.f32 %v2668_v51, %v1395_v7 }
 0x113   : > { %v2278_v28 = vpop.f32.mrb[10].mxu0  ;;  %v2342_v29 = vpop.f32.mrb[10].mxu1  ;;  %v1335_v19 = vmul.f32 %v2647_v40, %v841_v26  ;;  %v1399_v20 = vmul.f32 %v2647_v40, %v1097_v27  ;;  %v2741_v26 = vadd.f32 %v2668_v51, %v1334_v8 }
 0x114   : > { %v844_v30 = vpop.f32.mrb[11].mxu0  ;;  %v1100_v31 = vpop.f32.mrb[11].mxu1  ;;  %v1338_v21 = vmul.f32 %v2278_v28, %v2647_v40  ;;  %v1402_v22 = vmul.f32 %v2342_v29, %v2647_v40  ;;  %v2748_v29 = vadd.f32 %v2668_v51, %v1398_v12  ;;  %v2759_v53 = vadd.f32 %v2668_v51, %v1337_v17 }
 0x115   : > { %v1336_v23 = vmul.f32 %v2647_v40, %v844_v30  ;;  %v1400_v47 = vmul.f32 %v2647_v40, %v1100_v31  ;;  %v2751_v30 = vadd.f32 %v2668_v51, %v1332_v13  ;;  %v2754_v31 = vadd.f32 %v2668_v51, %v1396_v14 }
 0x116   : > { %v2768_v54 = vadd.f32 %v2668_v51, %v1399_v20  ;;  %v2771_v55 = vadd.f32 %v2668_v51, %v1338_v21  ;;  %v2774_v58 = vadd.f32 %v2668_v51, %v1402_v22 }
 0x117   : > { %v2780_v59 = vadd.f32 %v2668_v51, %v1400_v47 }
 0x119   : > { %v2628_v32 = vpop.f32.mrb[12].mxu0  ;;  %v2630_v33 = vpop.f32.mrb[12].mxu1 }
 0x11a   : > { %v2632_v34 = vpop.f32.mrb[13].mxu0  ;;  %v2634_v35 = vpop.f32.mrb[13].mxu1  ;;  %v1341_v27 = vmul.f32 %v2628_v32, %v2647_v40  ;;  %v1405_v28 = vmul.f32 %v2630_v33, %v2647_v40  ;;  %v2762_v32 = vadd.f32 %v2668_v51, %v1401_v18  ;;  %v2765_v33 = vadd.f32 %v2668_v51, %v1335_v19 }
 0x11b   : > { %v2636_v36 = vpop.f32.mrb[14].mxu0  ;;  %v2638_v37 = vpop.f32.mrb[14].mxu1  ;;  %v1339_v52 = vmul.f32 %v2647_v40, %v2632_v34  ;;  %v2777_v34 = vadd.f32 %v2668_v51, %v1336_v23  ;;  %v1403_v8 = vmul.f32 %v2647_v40, %v2634_v35 }
 0x11c   : > { %v2640_v38 = vpop.f32.mrb[15].mxu0  ;;  %v2642_v39 = vpop.f32.mrb[15].mxu1  ;;  %v2783_v60 = vadd.f32 %v2668_v51, %v1341_v27  ;;  %v2786_v7 = vadd.f32 %v2668_v51, %v1405_v28  ;;  %v1342_v12 = vmul.f32 %v2636_v36, %v2647_v40  ;;  %v1406_v18 = vmul.f32 %v2638_v37, %v2647_v40 }
 0x11d   : > { %v2793_v17 = vadd.f32 %v2668_v51, %v1339_v52  ;;  %v1340_v19 = vmul.f32 %v2647_v40, %v2640_v38  ;;  %v1404_v20 = vmul.f32 %v2647_v40, %v2642_v39 }
 0x11e   : > { %3185 = vst [vmem:[#allocation2_spill] sm:$0xff] %v2786_v7 }
 0x11f   : > { %3186 = vst [vmem:[#allocation3_spill] sm:$0xff] %v2793_v17 }
 0x121   : > { %v2649_v41 = vpop.f32.mrb[16].mxu0  ;;  %v2651_v42 = vpop.f32.mrb[16].mxu1 }
 0x122   : > { %v2653_v43 = vpop.f32.mrb[17].mxu0  ;;  %v2655_v44 = vpop.f32.mrb[17].mxu1  ;;  %v1345_v35 = vmul.f32 %v2649_v41, %v2647_v40  ;;  %v1409_v36 = vmul.f32 %v2651_v42, %v2647_v40 }
 0x123   : > { %v2661_v49 = vpop.f32.mrb[18].mxu0  ;;  %v2663_v50 = vpop.f32.mrb[18].mxu1  ;;  %v1343_v23 = vmul.f32 %v2647_v40, %v2653_v43  ;;  %v1407_v37 = vmul.f32 %v2647_v40, %v2655_v44  ;;  %v2818_v43 = vadd.f32 %v2668_v51, %v1403_v8  ;;  %v2821_v44 = vadd.f32 %v2668_v51, %v1342_v12 }
 0x124   : > { %v2674_v56 = vpop.f32.mrb[19].mxu0  ;;  %v2676_v57 = vpop.f32.mrb[19].mxu1  ;;  %v1346_v38 = vmul.f32 %v2661_v49, %v2647_v40  ;;  %v1410_v39 = vmul.f32 %v2663_v50, %v2647_v40  ;;  %v2826_v50 = vadd.f32 %v2668_v51, %v1406_v18  ;;  %v2836_v8 = vadd.f32 %v2668_v51, %v1345_v35 }
 0x125   : > { %v1344_v41 = vmul.f32 %v2647_v40, %v2674_v56  ;;  %v1408_v42 = vmul.f32 %v2647_v40, %v2676_v57  ;;  %v2829_v56 = vadd.f32 %v2668_v51, %v1340_v19  ;;  %v2832_v57 = vadd.f32 %v2668_v51, %v1404_v20 }
 0x126   : > { %v2839_v12 = vadd.f32 %v2668_v51, %v1409_v36  ;;  %v2848_v18 = vadd.f32 %v2668_v51, %v1346_v38  ;;  %v2851_v19 = vadd.f32 %v2668_v51, %v1410_v39 }
 0x127   : > { %v2857_v20 = vadd.f32 %v2668_v51, %v1408_v42 }
 0x128   : > { %3188 = vst [vmem:[#allocation5_spill] sm:$0xff] %v2848_v18  ;;  %3189 = vst [vmem:[#allocation6_spill] sm:$0xff] %v2851_v19 }
 0x129   : > { %v2289_v9 = vpop.f32.mrb[20].mxu0  ;;  %v2353_v10 = vpop.f32.mrb[20].mxu1  ;;  %3191 = vst [vmem:[#allocation8_spill] sm:$0xff] %v2857_v20 }
 0x12a   : > { %v889_v15 = vpop.f32.mrb[21].mxu0  ;;  %v2719_v16 = vpop.f32.mrb[21].mxu1  ;;  %v1349_v17 = vmul.f32 %v2289_v9, %v2647_v40  ;;  %v1413_v49 = vmul.f32 %v2353_v10, %v2647_v40  ;;  %v2842_v9 = vadd.f32 %v2668_v51, %v1343_v23  ;;  %v2845_v10 = vadd.f32 %v2668_v51, %v1407_v37 }
 0x12b   : > { %v2725_v45 = vpop.f32.mrb[22].mxu0  ;;  %v2727_v46 = vpop.f32.mrb[22].mxu1  ;;  %v1347_v7 = vmul.f32 %v2647_v40, %v889_v15  ;;  %v2854_v15 = vadd.f32 %v2668_v51, %v1344_v41  ;;  %v1411_v23 = vmul.f32 %v2647_v40, %v2719_v16 }
 0x12c   : > { %v2733_v48 = vpop.f32.mrb[23].mxu0  ;;  %v2735_v24 = vpop.f32.mrb[23].mxu1  ;;  %3187 = vst [vmem:[#allocation4_spill] sm:$0xff] %v2845_v10  ;;  %v2860_v35 = vadd.f32 %v2668_v51, %v1349_v17  ;;  %v2863_v36 = vadd.f32 %v2668_v51, %v1413_v49  ;;  %v1350_v37 = vmul.f32 %v2725_v45, %v2647_v40  ;;  %v1414_v42 = vmul.f32 %v2727_v46, %v2647_v40 }
 0x12d   : > { %3190 = vst [vmem:[#allocation7_spill] sm:$0xff] %v2854_v15  ;;  %v2870_v41 = vadd.f32 %v2668_v51, %v1347_v7  ;;  %v1348_v17 = vmul.f32 %v2647_v40, %v2733_v48  ;;  %v1412_v49 = vmul.f32 %v2647_v40, %v2735_v24 }
 0x12e   : > { %3192 = vst [vmem:[#allocation9_spill] sm:$0xff] %v2860_v35  ;;  %3193 = vst [vmem:[#allocation10_spill] sm:$0xff] %v2863_v36 }
 0x12f   : > { %3194 = vst [vmem:[#allocation11_spill] sm:$0xff] %v2870_v41 }
 0x131   : > { %v2293_v13 = vpop.f32.mrb[24].mxu0  ;;  %v2357_v14 = vpop.f32.mrb[24].mxu1 }
 0x132   : > { %v905_v21 = vpop.f32.mrb[25].mxu0  ;;  %v1161_v22 = vpop.f32.mrb[25].mxu1  ;;  %v1353_v16 = vmul.f32 %v2293_v13, %v2647_v40  ;;  %v1417_v45 = vmul.f32 %v2357_v14, %v2647_v40 }
 0x133   : > { %v2294_v47 = vpop.f32.mrb[26].mxu0  ;;  %v2358_v27 = vpop.f32.mrb[26].mxu1  ;;  %v1351_v46 = vmul.f32 %v2647_v40, %v905_v21  ;;  %v1415_v48 = vmul.f32 %v2647_v40, %v1161_v22  ;;  %v2899_v21 = vadd.f32 %v2668_v51, %v1411_v23  ;;  %v2902_v22 = vadd.f32 %v2668_v51, %v1350_v37 }
 0x134   : > { %v908_v28 = vpop.f32.mrb[27].mxu0  ;;  %v1164_v52 = vpop.f32.mrb[27].mxu1  ;;  %v1354_v24 = vmul.f32 %v2294_v47, %v2647_v40  ;;  %v1418_v19 = vmul.f32 %v2358_v27, %v2647_v40  ;;  %v2917_v23 = vadd.f32 %v2668_v51, %v1348_v17  ;;  %v2920_v37 = vadd.f32 %v2668_v51, %v1412_v49 }
 0x135   : > { %v1352_v47 = vmul.f32 %v2647_v40, %v908_v28  ;;  %v1416_v27 = vmul.f32 %v2647_v40, %v1164_v52  ;;  %v2923_v28 = vadd.f32 %v2668_v51, %v1353_v16  ;;  %v2926_v52 = vadd.f32 %v2668_v51, %v1417_v45 }
 0x136   : > { %v2938_v17 = vadd.f32 %v2668_v51, %v1418_v19 }
 0x137   : > { %v2941_v16 = vadd.f32 %v2668_v51, %v1352_v47  ;;  %v2944_v45 = vadd.f32 %v2668_v51, %v1416_v27 }
 0x138   : > { %3201 = vst [vmem:[#allocation18_spill] sm:$0xff] %v2938_v17 }
 0x139   : > { %v2297_v38 = vpop.f32.mrb[28].mxu0  ;;  %v2361_v39 = vpop.f32.mrb[28].mxu1  ;;  %3202 = vst [vmem:[#allocation19_spill] sm:$0xff] %v2941_v16  ;;  %3203 = vst [vmem:[#allocation20_spill] sm:$0xff] %v2944_v45 }
 0x13a   : > { %v921_v36 = vpop.f32.mrb[29].mxu0  ;;  %v1177_v35 = vpop.f32.mrb[29].mxu1  ;;  %v1421_v19 = vmul.f32 %v2361_v39, %v2647_v40 }
 0x13b   : > { %v1355_v20 = vmul.f32 %v2647_v40, %v921_v36  ;;  %v1419_v7 = vmul.f32 %v2647_v40, %v1177_v35  ;;  %v2882_v41 = vpop.f32.mrb[30].mxu0  ;;  %v2884_v15 = vpop.f32.mrb[30].mxu1 }
 0x13c   : > { %v924_v18 = vpop.f32.mrb[31].mxu0  ;;  %v1180_v13 = vpop.f32.mrb[31].mxu1 }
 0x13d   : > { %v2891_v14 = vadd.f32 %v2668_v51, %v1355_v20  ;;  %v2894_v36 = vadd.f32 %v2668_v51, %v1419_v7  ;;  %v1356_v35 = vmul.f32 %v2647_v40, %v924_v18  ;;  %v1420_v10 = vmul.f32 %v2647_v40, %v1180_v13 }
 0x13e   : > { %v2907_v20 = vadd.f32 %v2668_v51, %v1414_v42  ;;  %v1357_v7 = vmul.f32 %v2297_v38, %v2647_v40  ;;  %v2929_v38 = vadd.f32 %v2668_v51, %v1351_v46  ;;  %v2932_v42 = vadd.f32 %v2668_v51, %v1415_v48 }
 0x13f   : > { %3195 = vst [vmem:[#allocation12_spill] sm:$0xff] %v2891_v14  ;;  %3196 = vst [vmem:[#allocation13_spill] sm:$0xff] %v2894_v36  ;;  %v2911_v36 = vadd.f32 %v2668_v51, %v1356_v35  ;;  %v2914_v18 = vadd.f32 %v2668_v51, %v1420_v10  ;;  %v2935_v10 = vadd.f32 %v2668_v51, %v1354_v24 }
 0x140   : > { %3199 = vst [vmem:[#allocation16_spill] sm:$0xff] %v2932_v42  ;;  %v2949_v24 = vadd.f32 %v2668_v51, %v1357_v7 }
 0x141   : > { %3197 = vst [vmem:[#allocation14_spill] sm:$0xff] %v2911_v36  ;;  %3198 = vst [vmem:[#allocation15_spill] sm:$0xff] %v2914_v18  ;;  %v2301_v49 = vpop.f32.mrb[32].mxu0  ;;  %v2365_v13 = vpop.f32.mrb[32].mxu1 }
 0x142   : > { %3200 = vst [vmem:[#allocation17_spill] sm:$0xff] %v2935_v10  ;;  %v1361_v46 = vmul.f32 %v2301_v49, %v2647_v40  ;;  %v1425_v35 = vmul.f32 %v2365_v13, %v2647_v40  ;;  %v937_v48 = vpop.f32.mrb[33].mxu0  ;;  %v1193_v18 = vpop.f32.mrb[33].mxu1  ;;  %3204 = vst [vmem:[#allocation21_spill] sm:$0xff] %v2949_v24 }
 0x143   : > { %v1359_v36 = vmul.f32 %v2647_v40, %v937_v48  ;;  %v1423_v14 = vmul.f32 %v2647_v40, %v1193_v18  ;;  %v2302_v47 = vpop.f32.mrb[34].mxu0  ;;  %v2366_v16 = vpop.f32.mrb[34].mxu1 }
 0x144   : > { %v1496_v27 = vadd.f32 %v2668_v51, %v1361_v46  ;;  %v1560_v45 = vadd.f32 %v2668_v51, %v1425_v35  ;;  %v1362_v49 = vmul.f32 %v2302_v47, %v2647_v40  ;;  %v1426_v13 = vmul.f32 %v2366_v16, %v2647_v40  ;;  %v940_v17 = vpop.f32.mrb[35].mxu0  ;;  %v1196_v10 = vpop.f32.mrb[35].mxu1 }
 0x145   : > { %v1494_v7 = vadd.f32 %v2668_v51, %v1359_v36  ;;  %v1558_v39 = vadd.f32 %v2668_v51, %v1423_v14  ;;  %v1360_v48 = vmul.f32 %v2647_v40, %v940_v17  ;;  %v1424_v18 = vmul.f32 %v2647_v40, %v1196_v10 }
 0x146   : > { %v1592_v24 = vmax.f32 %v2682_v61, %v1496_v27  ;;  %v1624_v46 = vmax.f32 %v2685_v62, %v1560_v45  ;;  %v1497_v35 = vadd.f32 %v2668_v51, %v1362_v49  ;;  %v1561_v47 = vadd.f32 %v2668_v51, %v1426_v13 }
 0x147   : > { %v1590_v16 = vmax.f32 %v2688_v63, %v1494_v7  ;;  %v1622_v42 = vmax.f32 %v2691_v0, %v1558_v39  ;;  %v1495_v36 = vadd.f32 %v2668_v51, %v1360_v48  ;;  %v1559_v14 = vadd.f32 %v2668_v51, %v1424_v18 }
 0x148   : > { %v2971_v17 = vadd.f32 %v2668_v51, %v1421_v19  ;;  %v1656_v10 = vmax.f32 %v1592_v24, %v1624_v46  ;;  %v1593_v61 = vmax.f32 %v2694_v1, %v1497_v35  ;;  %v1625_v62 = vmax.f32 %v2697_v2, %v1561_v47 }
 0x149   : > { %v1358_v45 = vmul.f32 %v2882_v41, %v2647_v40  ;;  %v1654_v27 = vmax.f32 %v1590_v16, %v1622_v42  ;;  %v1591_v63 = vmax.f32 %v2700_v3, %v1495_v36  ;;  %v1623_v0 = vmax.f32 %v2703_v4, %v1559_v14  ;;  %v2305_v49 = vpop.f32.mrb[36].mxu0  ;;  %v2369_v13 = vpop.f32.mrb[36].mxu1 }
 0x14a   : > { %v1688_v7 = vmax.f32 %v1656_v10, 0.0  ;;  %v1657_v39 = vmax.f32 %v1593_v61, %v1625_v62  ;;  %v1365_v19 = vmul.f32 %v2305_v49, %v2647_v40  ;;  %v1429_v24 = vmul.f32 %v2369_v13, %v2647_v40  ;;  %v953_v1 = vpop.f32.mrb[37].mxu0  ;;  %v1209_v48 = vpop.f32.mrb[37].mxu1 }
 0x14b   : > { %v1686_v2 = vmax.f32 %v1654_v27, 0.0  ;;  %v1655_v18 = vmax.f32 %v1591_v63, %v1623_v0  ;;  %v1363_v41 = vmul.f32 %v2647_v40, %v953_v1  ;;  %v1427_v42 = vmul.f32 %v2647_v40, %v1209_v48  ;;  %v2306_v3 = vpop.f32.mrb[38].mxu0  ;;  %v2370_v46 = vpop.f32.mrb[38].mxu1 }
 0x14c   : > { %v1689_v4 = vmax.f32 %v1657_v39, 0.0  ;;  %v1500_v35 = vadd.f32 %v2668_v51, %v1365_v19  ;;  %v1564_v47 = vadd.f32 %v2668_v51, %v1429_v24  ;;  %v1366_v16 = vmul.f32 %v2306_v3, %v2647_v40  ;;  %v956_v36 = vpop.f32.mrb[39].mxu0  ;;  %v1212_v14 = vpop.f32.mrb[39].mxu1 }
 0x14d   : > { %v1687_v10 = vmax.f32 %v1655_v18, 0.0  ;;  %v1498_v61 = vadd.f32 %v2668_v51, %v1363_v41  ;;  %v1562_v62 = vadd.f32 %v2668_v51, %v1427_v42  ;;  %v1430_v27 = vmul.f32 %v2370_v46, %v2647_v40 }
 0x14e   : > { %v2092_v63 = vpack.c.bf16 %v1689_v4, %v1688_v7  ;;  %v1596_v0 = vmax.f32 %v2706_v5, %v1500_v35  ;;  %v1628_v49 = vmax.f32 %v2709_v6, %v1564_v47  ;;  %v1501_v13 = vadd.f32 %v2668_v51, %v1366_v16 }
 0x14f   : > { %v2087_v39 = vpack.c.bf16 %v1687_v10, %v1686_v2  ;;  %v1594_v19 = vmax.f32 %v2714_v11, %v1498_v61  ;;  %v1626_v24 = vmax.f32 %v2738_v25, %v1562_v62  ;;  %v1565_v1 = vadd.f32 %v2668_v51, %v1430_v27 }
 0x150   : > { %2164 = vst [vmem:[%s2990_s19 + $0x8] sm:$0xff] %v2092_v63   ;;  %v1660_v48 = vmax.f32 %v1596_v0, %v1628_v49  ;;  %v1597_v18 = vmax.f32 %v2741_v26, %v1501_v13  ;;  %v1364_v41 = vmul.f32 %v2647_v40, %v956_v36  ;;  %v1428_v7 = vmul.f32 %v2647_v40, %v1212_v14 }
 0x151   : > { %v3006_v5 = vadd.f32 %v2668_v51, %v1358_v45  ;;  %v1422_v6 = vmul.f32 %v2884_v15, %v2647_v40  ;;  %2088 = vst [vmem:[%s2990_s19] sm:$0xff] %v2087_v39   ;;  %v1658_v11 = vmax.f32 %v1594_v19, %v1626_v24  ;;  %v1629_v25 = vmax.f32 %v2748_v29, %v1565_v1  ;;  %v2309_v2 = vpop.f32.mrb[40].mxu0  ;;  %v2373_v42 = vpop.f32.mrb[40].mxu1 }
 0x152   : > { %v1692_v3 = vmax.f32 %v1660_v48, 0.0  ;;  %v1499_v46 = vadd.f32 %v2668_v51, %v1364_v41  ;;  %v1563_v26 = vadd.f32 %v2668_v51, %v1428_v7  ;;  %v1369_v4 = vmul.f32 %v2309_v2, %v2647_v40  ;;  %v969_v35 = vpop.f32.mrb[41].mxu0  ;;  %v1225_v47 = vpop.f32.mrb[41].mxu1 }
 0x153   : > { %v1690_v45 = vmax.f32 %v1658_v11, 0.0  ;;  %v1661_v16 = vmax.f32 %v1597_v18, %v1629_v25  ;;  %v1433_v36 = vmul.f32 %v2373_v42, %v2647_v40  ;;  %v1367_v15 = vmul.f32 %v2647_v40, %v969_v35  ;;  %v2310_v14 = vpop.f32.mrb[42].mxu0  ;;  %v2374_v10 = vpop.f32.mrb[42].mxu1 }
 0x154   : > { %v1595_v29 = vmax.f32 %v2751_v30, %v1499_v46  ;;  %v1627_v61 = vmax.f32 %v2754_v31, %v1563_v26  ;;  %v1504_v62 = vadd.f32 %v2668_v51, %v1369_v4  ;;  %v1431_v27 = vmul.f32 %v2647_v40, %v1225_v47  ;;  %v972_v63 = vpop.f32.mrb[43].mxu0  ;;  %v1228_v0 = vpop.f32.mrb[43].mxu1 }
 0x155   : > { %v1693_v49 = vmax.f32 %v1661_v16, 0.0  ;;  %v1568_v13 = vadd.f32 %v2668_v51, %v1433_v36  ;;  %v1502_v39 = vadd.f32 %v2668_v51, %v1367_v15  ;;  %v1370_v19 = vmul.f32 %v2310_v14, %v2647_v40 }
 0x156   : > { %v1659_v24 = vmax.f32 %v1595_v29, %v1627_v61  ;;  %v1600_v1 = vmax.f32 %v2759_v53, %v1504_v62  ;;  %v1566_v30 = vadd.f32 %v2668_v51, %v1431_v27  ;;  %v1434_v31 = vmul.f32 %v2374_v10, %v2647_v40 }
 0x157   : > { %v2102_v48 = vpack.c.bf16 %v1693_v49, %v1692_v3  ;;  %v1632_v18 = vmax.f32 %v2762_v32, %v1568_v13  ;;  %v1598_v41 = vmax.f32 %v2765_v33, %v1502_v39  ;;  %v1505_v7 = vadd.f32 %v2668_v51, %v1370_v19 }
 0x158   : > { %v1691_v11 = vmax.f32 %v1659_v24, 0.0  ;;  %v1630_v25 = vmax.f32 %v2768_v54, %v1566_v30  ;;  %v1569_v2 = vadd.f32 %v2668_v51, %v1434_v31  ;;  %v1368_v42 = vmul.f32 %v2647_v40, %v972_v63 }
 0x159   : > { %v3034_v53 = vadd.f32 %v2668_v51, %v1422_v6  ;;  %2166 = vst [vmem:[%s2990_s19 + $0x18] sm:$0xff] %v2102_v48   ;;  %v1664_v46 = vmax.f32 %v1600_v1, %v1632_v18  ;;  %v1601_v3 = vmax.f32 %v2771_v55, %v1505_v7  ;;  %v1432_v32 = vmul.f32 %v2647_v40, %v1228_v0  ;;  %v2313_v33 = vpop.f32.mrb[44].mxu0  ;;  %v2377_v26 = vpop.f32.mrb[44].mxu1  ;;  %v3205_v48 = vld [vmem:[#allocation2_spill] sm:$0xff]  ;;  %v3206_v7 = vld [vmem:[#allocation3_spill] sm:$0xff] }
 0x15a   : > { %v2097_v4 = vpack.c.bf16 %v1691_v11, %v1690_v45  ;;  %v1662_v35 = vmax.f32 %v1598_v41, %v1630_v25  ;;  %v1633_v54 = vmax.f32 %v2774_v58, %v1569_v2  ;;  %v1503_v47 = vadd.f32 %v2668_v51, %v1368_v42  ;;  %v985_v16 = vpop.f32.mrb[45].mxu0  ;;  %v1241_v36 = vpop.f32.mrb[45].mxu1 }
 0x15b   : > { %v1696_v15 = vmax.f32 %v1664_v46, 0.0  ;;  %v1567_v6 = vadd.f32 %v2668_v51, %v1432_v32  ;;  %v1373_v14 = vmul.f32 %v2313_v33, %v2647_v40  ;;  %v1437_v55 = vmul.f32 %v2377_v26, %v2647_v40  ;;  %v2314_v10 = vpop.f32.mrb[46].mxu0  ;;  %v2378_v29 = vpop.f32.mrb[46].mxu1 }
 0x15c   : > { %2165 = vst [vmem:[%s2990_s19 + $0x10] sm:$0xff] %v2097_v4   ;;  %v1694_v61 = vmax.f32 %v1662_v35, 0.0  ;;  %v1665_v62 = vmax.f32 %v1601_v3, %v1633_v54  ;;  %v1599_v45 = vmax.f32 %v2777_v34, %v1503_v47  ;;  %v1371_v58 = vmul.f32 %v2647_v40, %v985_v16  ;;  %v988_v27 = vpop.f32.mrb[47].mxu0  ;;  %v1244_v63 = vpop.f32.mrb[47].mxu1 }
 0x15d   : > { %v1631_v0 = vmax.f32 %v2780_v59, %v1567_v6  ;;  %v1508_v49 = vadd.f32 %v2668_v51, %v1373_v14  ;;  %v1572_v13 = vadd.f32 %v2668_v51, %v1437_v55  ;;  %v1435_v39 = vmul.f32 %v2647_v40, %v1241_v36 }
 0x15e   : > { %v1697_v19 = vmax.f32 %v1665_v62, 0.0  ;;  %v1506_v24 = vadd.f32 %v2668_v51, %v1371_v58  ;;  %v1374_v1 = vmul.f32 %v2314_v10, %v2647_v40  ;;  %v1438_v34 = vmul.f32 %v2378_v29, %v2647_v40 }
 0x15f   : > { %v1663_v30 = vmax.f32 %v1599_v45, %v1631_v0  ;;  %v1604_v31 = vmax.f32 %v2783_v60, %v1508_v49  ;;  %v1636_v18 = vmax.f32 %v3205_v48, %v1572_v13  ;;  %v1570_v59 = vadd.f32 %v2668_v51, %v1435_v39 }
 0x160   : > { %v2112_v41 = vpack.c.bf16 %v1697_v19, %v1696_v15  ;;  %v1602_v11 = vmax.f32 %v3206_v7, %v1506_v24  ;;  %v1509_v25 = vadd.f32 %v2668_v51, %v1374_v1  ;;  %v1573_v2 = vadd.f32 %v2668_v51, %v1438_v34 }
 0x161   : > { %v1695_v42 = vmax.f32 %v1663_v30, 0.0  ;;  %v1668_v46 = vmax.f32 %v1604_v31, %v1636_v18  ;;  %v1634_v3 = vmax.f32 %v2818_v43, %v1570_v59  ;;  %v1372_v32 = vmul.f32 %v2647_v40, %v988_v27  ;;  %v2317_v33 = vpop.f32.mrb[48].mxu0  ;;  %v2381_v26 = vpop.f32.mrb[48].mxu1 }
 0x162   : > { %2168 = vst [vmem:[%s2990_s19 + $0x28] sm:$0xff] %v2112_v41   ;;  %v1605_v60 = vmax.f32 %v2821_v44, %v1509_v25  ;;  %v1637_v4 = vmax.f32 %v2826_v50, %v1573_v2  ;;  %v1436_v35 = vmul.f32 %v2647_v40, %v1244_v63  ;;  %v1377_v54 = vmul.f32 %v2317_v33, %v2647_v40  ;;  %v1001_v47 = vpop.f32.mrb[49].mxu0  ;;  %v1257_v16 = vpop.f32.mrb[49].mxu1  ;;  %v3208_v33 = vld [vmem:[#allocation5_spill] sm:$0xff] }
 0x163   : > { %v2107_v36 = vpack.c.bf16 %v1695_v42, %v1694_v61  ;;  %v1700_v15 = vmax.f32 %v1668_v46, 0.0  ;;  %v1666_v6 = vmax.f32 %v1602_v11, %v1634_v3  ;;  %v1507_v43 = vadd.f32 %v2668_v51, %v1372_v32  ;;  %v2318_v14 = vpop.f32.mrb[50].mxu0  ;;  %v2382_v55 = vpop.f32.mrb[50].mxu1 }
 0x164   : > { %v1669_v10 = vmax.f32 %v1605_v60, %v1637_v4  ;;  %v1571_v29 = vadd.f32 %v2668_v51, %v1436_v35  ;;  %v1512_v44 = vadd.f32 %v2668_v51, %v1377_v54  ;;  %v1441_v50 = vmul.f32 %v2381_v26, %v2647_v40  ;;  %v1004_v62 = vpop.f32.mrb[51].mxu0  ;;  %v1260_v45 = vpop.f32.mrb[51].mxu1  ;;  %v3209_v26 = vld [vmem:[#allocation6_spill] sm:$0xff] }
 0x165   : > { %2167 = vst [vmem:[%s2990_s19 + $0x20] sm:$0xff] %v2107_v36   ;;  %v1698_v58 = vmax.f32 %v1666_v6, 0.0  ;;  %v1603_v27 = vmax.f32 %v2829_v56, %v1507_v43  ;;  %v1375_v61 = vmul.f32 %v2647_v40, %v1001_v47  ;;  %v1439_v63 = vmul.f32 %v2647_v40, %v1257_v16  ;;  %v3210_v36 = vld [vmem:[#allocation7_spill] sm:$0xff] }
 0x166   : > { %v1701_v0 = vmax.f32 %v1669_v10, 0.0  ;;  %v1635_v49 = vmax.f32 %v2832_v57, %v1571_v29  ;;  %v1608_v13 = vmax.f32 %v2836_v8, %v1512_v44  ;;  %v1576_v39 = vadd.f32 %v2668_v51, %v1441_v50  ;;  %v3207_v8 = vld [vmem:[#allocation4_spill] sm:$0xff] }
 0x167   : > { %v1510_v19 = vadd.f32 %v2668_v51, %v1375_v61  ;;  %v1574_v24 = vadd.f32 %v2668_v51, %v1439_v63  ;;  %v1378_v1 = vmul.f32 %v2318_v14, %v2647_v40  ;;  %v1442_v56 = vmul.f32 %v2382_v55, %v2647_v40  ;;  %v3211_v50 = vld [vmem:[#allocation8_spill] sm:$0xff]  ;;  %v3212_v63 = vld [vmem:[#allocation9_spill] sm:$0xff] }
 0x168   : > { %v2122_v34 = vpack.c.bf16 %v1701_v0, %v1700_v15  ;;  %v1667_v30 = vmax.f32 %v1603_v27, %v1635_v49  ;;  %v1640_v31 = vmax.f32 %v2839_v12, %v1576_v39  ;;  %v1376_v48 = vmul.f32 %v2647_v40, %v1004_v62 }
 0x169   : > { %v1606_v57 = vmax.f32 %v2842_v9, %v1510_v19  ;;  %v1638_v18 = vmax.f32 %v3207_v8, %v1574_v24  ;;  %v1513_v59 = vadd.f32 %v2668_v51, %v1378_v1  ;;  %v1577_v41 = vadd.f32 %v2668_v51, %v1442_v56  ;;  %v2321_v7 = vpop.f32.mrb[52].mxu0  ;;  %v2385_v11 = vpop.f32.mrb[52].mxu1 }
 0x16a   : > { %2170 = vst [vmem:[%s2990_s19 + $0x38] sm:$0xff] %v2122_v34   ;;  %v1699_v25 = vmax.f32 %v1667_v30, 0.0  ;;  %v1672_v2 = vmax.f32 %v1608_v13, %v1640_v31  ;;  %v1511_v42 = vadd.f32 %v2668_v51, %v1376_v48  ;;  %v1440_v46 = vmul.f32 %v2647_v40, %v1260_v45  ;;  %v1017_v12 = vpop.f32.mrb[53].mxu0  ;;  %v1273_v3 = vpop.f32.mrb[53].mxu1  ;;  %v3213_v34 = vld [vmem:[#allocation10_spill] sm:$0xff] }
 0x16b   : > { %v1670_v32 = vmax.f32 %v1606_v57, %v1638_v18  ;;  %v1609_v9 = vmax.f32 %v3208_v33, %v1513_v59  ;;  %v1641_v60 = vmax.f32 %v3209_v26, %v1577_v41  ;;  %v1381_v4 = vmul.f32 %v2321_v7, %v2647_v40  ;;  %v2322_v35 = vpop.f32.mrb[54].mxu0  ;;  %v2386_v54 = vpop.f32.mrb[54].mxu1  ;;  %v3214_v59 = vld [vmem:[#allocation11_spill] sm:$0xff] }
 0x16c   : > { %v2117_v47 = vpack.c.bf16 %v1699_v25, %v1698_v58  ;;  %v1704_v16 = vmax.f32 %v1672_v2, 0.0  ;;  %v1607_v15 = vmax.f32 %v3210_v36, %v1511_v42  ;;  %v1575_v6 = vadd.f32 %v2668_v51, %v1440_v46  ;;  %v1020_v43 = vpop.f32.mrb[55].mxu0  ;;  %v1276_v14 = vpop.f32.mrb[55].mxu1 }
 0x16d   : > { %v1702_v55 = vmax.f32 %v1670_v32, 0.0  ;;  %v1673_v10 = vmax.f32 %v1609_v9, %v1641_v60  ;;  %v1516_v29 = vadd.f32 %v2668_v51, %v1381_v4  ;;  %v1445_v44 = vmul.f32 %v2385_v11, %v2647_v40 }
 0x16e   : > { %2169 = vst [vmem:[%s2990_s19 + $0x30] sm:$0xff] %v2117_v47   ;;  %v1639_v62 = vmax.f32 %v3211_v50, %v1575_v6  ;;  %v1379_v45 = vmul.f32 %v2647_v40, %v1017_v12  ;;  %v1443_v58 = vmul.f32 %v2647_v40, %v1273_v3  ;;  %v1382_v27 = vmul.f32 %v2322_v35, %v2647_v40 }
 0x16f   : > { %v1705_v61 = vmax.f32 %v1673_v10, 0.0  ;;  %v1612_v0 = vmax.f32 %v3212_v63, %v1516_v29  ;;  %v1580_v49 = vadd.f32 %v2668_v51, %v1445_v44  ;;  %v1446_v13 = vmul.f32 %v2386_v54, %v2647_v40 }
 0x170   : > { %v1671_v39 = vmax.f32 %v1607_v15, %v1639_v62  ;;  %v1514_v19 = vadd.f32 %v2668_v51, %v1379_v45  ;;  %v1578_v24 = vadd.f32 %v2668_v51, %v1443_v58  ;;  %v1517_v1 = vadd.f32 %v2668_v51, %v1382_v27 }
 0x171   : > { %v2132_v56 = vpack.c.bf16 %v1705_v61, %v1704_v16  ;;  %v1644_v30 = vmax.f32 %v3213_v34, %v1580_v49  ;;  %v1581_v31 = vadd.f32 %v2668_v51, %v1446_v13  ;;  %v1380_v48 = vmul.f32 %v2647_v40, %v1020_v43  ;;  %v2325_v57 = vpop.f32.mrb[56].mxu0  ;;  %v2389_v8 = vpop.f32.mrb[56].mxu1 }
 0x172   : > { %v1703_v18 = vmax.f32 %v1671_v39, 0.0  ;;  %v1610_v41 = vmax.f32 %v3214_v59, %v1514_v19  ;;  %v1642_v7 = vmax.f32 %v2899_v21, %v1578_v24  ;;  %v1613_v11 = vmax.f32 %v2902_v22, %v1517_v1  ;;  %v1033_v25 = vpop.f32.mrb[57].mxu0  ;;  %v1289_v2 = vpop.f32.mrb[57].mxu1  ;;  %v3215_v19 = vld [vmem:[#allocation16_spill] sm:$0xff]  ;;  %v3216_v1 = vld [vmem:[#allocation17_spill] sm:$0xff] }
 0x173   : > { %2172 = vst [vmem:[%s2990_s19 + $0x48] sm:$0xff] %v2132_v56   ;;  %v1676_v42 = vmax.f32 %v1612_v0, %v1644_v30  ;;  %v1645_v46 = vmax.f32 %v2907_v20, %v1581_v31  ;;  %v1515_v12 = vadd.f32 %v2668_v51, %v1380_v48  ;;  %v1444_v3 = vmul.f32 %v2647_v40, %v1276_v14  ;;  %v2326_v32 = vpop.f32.mrb[58].mxu0  ;;  %v2390_v33 = vpop.f32.mrb[58].mxu1 }
 0x174   : > { %v2127_v9 = vpack.c.bf16 %v1703_v18, %v1702_v55  ;;  %v1674_v26 = vmax.f32 %v1610_v41, %v1642_v7  ;;  %v1385_v60 = vmul.f32 %v2325_v57, %v2647_v40  ;;  %v1449_v21 = vmul.f32 %v2389_v8, %v2647_v40  ;;  %v1036_v22 = vpop.f32.mrb[59].mxu0  ;;  %v1292_v4 = vpop.f32.mrb[59].mxu1  ;;  %v3217_v57 = vld [vmem:[#allocation18_spill] sm:$0xff] }
 0x175   : > { %v1708_v35 = vmax.f32 %v1676_v42, 0.0  ;;  %v1677_v54 = vmax.f32 %v1613_v11, %v1645_v46  ;;  %v1611_v47 = vmax.f32 %v2917_v23, %v1515_v12  ;;  %v1579_v20 = vadd.f32 %v2668_v51, %v1444_v3  ;;  %v3218_v46 = vld [vmem:[#allocation19_spill] sm:$0xff] }
 0x176   : > { %2171 = vst [vmem:[%s2990_s19 + $0x40] sm:$0xff] %v2127_v9   ;;  %v1706_v16 = vmax.f32 %v1674_v26, 0.0  ;;  %v1520_v36 = vadd.f32 %v2668_v51, %v1385_v60  ;;  %v1584_v15 = vadd.f32 %v2668_v51, %v1449_v21  ;;  %v1383_v6 = vmul.f32 %v2647_v40, %v1033_v25  ;;  %v3219_v9 = vld [vmem:[#allocation20_spill] sm:$0xff] }
 0x177   : > { %v1709_v43 = vmax.f32 %v1677_v54, 0.0  ;;  %v1643_v14 = vmax.f32 %v2920_v37, %v1579_v20  ;;  %v1447_v55 = vmul.f32 %v2647_v40, %v1289_v2  ;;  %v1386_v10 = vmul.f32 %v2326_v32, %v2647_v40 }
 0x178   : > { %v1616_v29 = vmax.f32 %v2923_v28, %v1520_v36  ;;  %v1648_v23 = vmax.f32 %v2926_v52, %v1584_v15  ;;  %v1518_v44 = vadd.f32 %v2668_v51, %v1383_v6  ;;  %v1450_v50 = vmul.f32 %v2390_v33, %v2647_v40 }
 0x179   : > { %v2142_v62 = vpack.c.bf16 %v1709_v43, %v1708_v35  ;;  %v1675_v45 = vmax.f32 %v1611_v47, %v1643_v14  ;;  %v1582_v58 = vadd.f32 %v2668_v51, %v1447_v55  ;;  %v1521_v27 = vadd.f32 %v2668_v51, %v1386_v10  ;;  %v2329_v37 = vpop.f32.mrb[60].mxu0  ;;  %v2393_v61 = vpop.f32.mrb[60].mxu1  ;;  %v3221_v43 = vld [vmem:[#allocation12_spill] sm:$0xff] }
 0x17a   : > { %v1680_v63 = vmax.f32 %v1616_v29, %v1648_v23  ;;  %v1614_v0 = vmax.f32 %v2929_v38, %v1518_v44  ;;  %v1585_v28 = vadd.f32 %v2668_v51, %v1450_v50  ;;  %v1384_v49 = vmul.f32 %v2647_v40, %v1036_v22  ;;  %v1049_v52 = vpop.f32.mrb[61].mxu0  ;;  %v1305_v13 = vpop.f32.mrb[61].mxu1  ;;  %v3222_v44 = vld [vmem:[#allocation13_spill] sm:$0xff] }
 0x17b   : > { %2174 = vst [vmem:[%s2990_s19 + $0x58] sm:$0xff] %v2142_v62   ;;  %v1707_v39 = vmax.f32 %v1675_v45, 0.0  ;;  %v1646_v24 = vmax.f32 %v3215_v19, %v1582_v58  ;;  %v1617_v56 = vmax.f32 %v3216_v1, %v1521_v27  ;;  %v1448_v34 = vmul.f32 %v2647_v40, %v1292_v4  ;;  %v2330_v30 = vpop.f32.mrb[62].mxu0  ;;  %v2394_v31 = vpop.f32.mrb[62].mxu1  ;;  %v3220_v4 = vld [vmem:[#allocation21_spill] sm:$0xff] }
 0x17c   : > { %v1712_v48 = vmax.f32 %v1680_v63, 0.0  ;;  %v1649_v38 = vmax.f32 %v3217_v57, %v1585_v28  ;;  %v1519_v8 = vadd.f32 %v2668_v51, %v1384_v49  ;;  %v1389_v18 = vmul.f32 %v2329_v37, %v2647_v40  ;;  %v1052_v59 = vpop.f32.mrb[63].mxu0  ;;  %v1308_v41 = vpop.f32.mrb[63].mxu1  ;;  %v3223_v63 = vld [vmem:[#allocation14_spill] sm:$0xff] }
 0x17d   : > { %v2137_v7 = vpack.c.bf16 %v1707_v39, %v1706_v16  ;;  %v1678_v11 = vmax.f32 %v1614_v0, %v1646_v24  ;;  %v1583_v25 = vadd.f32 %v2668_v51, %v1448_v34  ;;  %v1453_v2 = vmul.f32 %v2393_v61, %v2647_v40 }
 0x17e   : > { %v1681_v42 = vmax.f32 %v1617_v56, %v1649_v38  ;;  %v1615_v12 = vmax.f32 %v3218_v46, %v1519_v8  ;;  %v1524_v3 = vadd.f32 %v2668_v51, %v1389_v18  ;;  %v1387_v32 = vmul.f32 %v2647_v40, %v1049_v52  ;;  %v3224_v52 = vld [vmem:[#allocation15_spill] sm:$0xff] }
 0x17f   : > { %2173 = vst [vmem:[%s2990_s19 + $0x50] sm:$0xff] %v2137_v7   ;;  %v1710_v33 = vmax.f32 %v1678_v11, 0.0  ;;  %v1647_v26 = vmax.f32 %v3219_v9, %v1583_v25  ;;  %v1588_v60 = vadd.f32 %v2668_v51, %v1453_v2  ;;  %v1451_v21 = vmul.f32 %v2647_v40, %v1305_v13 }
 0x180   : > { %v1713_v22 = vmax.f32 %v1681_v42, 0.0  ;;  %v1620_v35 = vmax.f32 %v3220_v4, %v1524_v3  ;;  %v1522_v54 = vadd.f32 %v2668_v51, %v1387_v32  ;;  %v1390_v47 = vmul.f32 %v2330_v30, %v2647_v40 }
 0x181   : > { %v1679_v20 = vmax.f32 %v1615_v12, %v1647_v26  ;;  %v1652_v16 = vmax.f32 %v2971_v17, %v1588_v60  ;;  %v1586_v36 = vadd.f32 %v2668_v51, %v1451_v21  ;;  %v1454_v15 = vmul.f32 %v2394_v31, %v2647_v40 }
 0x182   : > { %v2152_v6 = vpack.c.bf16 %v1713_v22, %v1712_v48  ;;  %v1618_v14 = vmax.f32 %v3221_v43, %v1522_v54  ;;  %v1525_v55 = vadd.f32 %v2668_v51, %v1390_v47  ;;  %v1388_v10 = vmul.f32 %v2647_v40, %v1052_v59 }
 0x183   : > { %v1711_v29 = vmax.f32 %v1679_v20, 0.0  ;;  %v1684_v23 = vmax.f32 %v1620_v35, %v1652_v16  ;;  %v1650_v50 = vmax.f32 %v3222_v44, %v1586_v36  ;;  %v1589_v62 = vadd.f32 %v2668_v51, %v1454_v15 }
 0x184   : > { %2176 = vst [vmem:[%s2990_s19 + $0x68] sm:$0xff] %v2152_v6   ;;  %v1621_v17 = vmax.f32 %v3006_v5, %v1525_v55  ;;  %v1523_v45 = vadd.f32 %v2668_v51, %v1388_v10  ;;  %v1452_v58 = vmul.f32 %v2647_v40, %v1308_v41 }
 0x185   : > { %v2147_v27 = vpack.c.bf16 %v1711_v29, %v1710_v33  ;;  %v1682_v37 = vmax.f32 %v1618_v14, %v1650_v50  ;;  %v1653_v61 = vmax.f32 %v3034_v53, %v1589_v62  ;;  %v1716_v39 = vmax.f32 %v1684_v23, 0.0 }
 0x186   : > { %v1619_v0 = vmax.f32 %v3223_v63, %v1523_v45  ;;  %v1587_v28 = vadd.f32 %v2668_v51, %v1452_v58 }
 0x187   : > { %2175 = vst [vmem:[%s2990_s19 + $0x60] sm:$0xff] %v2147_v27   ;;  %v1685_v49 = vmax.f32 %v1621_v17, %v1653_v61  ;;  %v1714_v1 = vmax.f32 %v1682_v37, 0.0 }
 0x188   : > { %v1651_v13 = vmax.f32 %v3224_v52, %v1587_v28 }
 0x189   : > { %v1717_v5 = vmax.f32 %v1685_v49, 0.0 }
 0x18a   : > { %v1683_v19 = vmax.f32 %v1619_v0, %v1651_v13 }
 0x18b   : > { %v2162_v24 = vpack.c.bf16 %v1717_v5, %v1716_v39 }
 0x18c   : > { %v1715_v56 = vmax.f32 %v1683_v19, 0.0 }
 0x18d   : > { %2178 = vst [vmem:[%s2990_s19 + $0x78] sm:$0xff] %v2162_v24  }
 0x18e   : > { %v2157_v40 = vpack.c.bf16 %v1715_v56, %v1714_v1 }
 0x190   : > { %2177 = vst [vmem:[%s2990_s19 + $0x70] sm:$0xff] %v2157_v40  }
 0x191 PF: > { %s14_s15 = sadd.s32 1, %s2497_s15  }
 0x192   : > { %p11_p4 = scmp.ge.s32.totalorder %s14_s15, 4  }
 0x194   :  { %13 = sbr.rel (!%p11_p4) target bundleno = 1 (0x1), region = 66 }

// kernel: simple_cnn_forward.4
= control target key start
LH: loop header
LB: loop body
LE: loop exit
PB: predicated region body
PF: predicated region fallthrough
CT: control target
= control target key end

     0   :  { %s1692_s15 = smov 0   ;;  %s2017_s0 = inlined_call_operand.vmem [shape: bf16[2,256,384], index: 0, kind: input, shape index: {}]   ;;  %s2018_s1 = inlined_call_operand.vmem [shape: bf16[384,128], index: 1, kind: input, shape index: {}]   ;;  %s2019_s2 = inlined_call_operand.vmem [shape: f32[1,128], index: 2, kind: input, shape index: {}]   ;;  %s2020_s3 = inlined_call_operand.vmem [shape: f32[1,128], index: 3, kind: input, shape index: {}]   ;;  %s2021_s4 = inlined_call_operand.vmem [shape: bf16[2,64,128], index: 4, kind: output, shape index: {}]  }
   0x1 LB: > { %s1238_s16 = sadd.s32 4294967295, %s1665_s15   ;;  %p1242_p0 = scmp.ge.s32.totalorder %s1665_s15, 1  ;;  %s1665_s15 = sphi %s1692_s15, %s14_s15  }
   0x2   : > { %p162_p1 = scmp.lt.s32.totalorder %s1665_s15, 3 }
   0x4   : > { %p163_p2 = pnand %p1242_p0, %p162_p1 }
   0x5   : > { %v1571_v0 = vld [vmem:[%s2018_s1 + $0x40] sm:$0xff] (!%p163_p2)   ;;  %v1573_v2 = vld [vmem:[%s2018_s1 + $0x48] sm:$0xff] (!%p163_p2)   ;;  %p188_p3 = scmp.lt.s32.totalorder (!%p163_p2), %s1238_s16, 1  ;;  %v1575_v4 = vld [vmem:[%s2018_s1 + $0x50] sm:$0xff] (!%p163_p2)  }
   0x6   : > { %166 = sbr.rel (%p163_p2) target bundleno = 358 (0x166), region = 36  ;;  %v1572_v1 = vld [vmem:[%s2018_s1] sm:$0xff] (!%p163_p2)   ;;  %1362 = vmatprep.subr.bf16.mxu0 (!%p163_p2), %v1571_v0  ;;  %1546 = vmatprep.subr.bf16.mxu1 (!%p163_p2), %v1571_v0  ;;  %v1574_v3 = vld [vmem:[%s2018_s1 + $0x8] sm:$0xff] (!%p163_p2)   ;;  %v1576_v5 = vld [vmem:[%s2018_s1 + $0x10] sm:$0xff] (!%p163_p2)  }
   0x7   : > { %1363 = vmatpush3.bf16.msra.mxu0 (!%p163_p2), %v1572_v1  ;;  %1554 = vmatpush3.bf16.msra.mxu1 (!%p163_p2), %v1572_v1  ;;  %v1577_v6 = vld [vmem:[%s2018_s1 + $0x58] sm:$0xff] (!%p163_p2)   ;;  %v1579_v8 = vld [vmem:[%s2018_s1 + $0x60] sm:$0xff] (!%p163_p2)   ;;  %v1581_v10 = vld [vmem:[%s2018_s1 + $0x68] sm:$0xff] (!%p163_p2)  }
   0x8   : > { %1364 = vmatprep.subr.bf16.mxu0 (!%p163_p2), %v1573_v2  ;;  %1547 = vmatprep.subr.bf16.mxu1 (!%p163_p2), %v1573_v2  ;;  %v1578_v7 = vld [vmem:[%s2018_s1 + $0x18] sm:$0xff] (!%p163_p2)   ;;  %v1580_v9 = vld [vmem:[%s2018_s1 + $0x20] sm:$0xff] (!%p163_p2)   ;;  %v1582_v13 = vld [vmem:[%s2018_s1 + $0x28] sm:$0xff] (!%p163_p2)  }
   0x9   : > { %v1583_v14 = vld [vmem:[%s2018_s1 + $0x70] sm:$0xff] (!%p163_p2)   ;;  %v1585_v16 = vld [vmem:[%s2018_s1 + $0x78] sm:$0xff] (!%p163_p2)   ;;  %v1593_v18 = vld [vmem:[%s2018_s1 + $0x80] sm:$0xff] (!%p163_p2)  }
   0xa   : > { %v1584_v15 = vld [vmem:[%s2018_s1 + $0x30] sm:$0xff] (!%p163_p2)   ;;  %v1586_v17 = vld [vmem:[%s2018_s1 + $0x38] sm:$0xff] (!%p163_p2)   ;;  %v1594_v22 = vld [vmem:[%s2018_s1 + $0x88] sm:$0xff] (!%p163_p2)  }
   0xb   : > { %1365 = vmatpush3.bf16.msra.mxu0 (!%p163_p2), %v1574_v3  ;;  %1555 = vmatpush3.bf16.msra.mxu1 (!%p163_p2), %v1574_v3  ;;  %v1601_v25 = vld [vmem:[%s2018_s1 + $0x90] sm:$0xff] (!%p163_p2)   ;;  %v1602_v27 = vld [vmem:[%s2018_s1 + $0x98] sm:$0xff] (!%p163_p2)   ;;  %v1609_v30 = vld [vmem:[%s2018_s1 + $0xa0] sm:$0xff] (!%p163_p2)  }
   0xc   : > { %1366 = vmatprep.subr.bf16.mxu0 (!%p163_p2), %v1575_v4  ;;  %1548 = vmatprep.subr.bf16.mxu1 (!%p163_p2), %v1575_v4  ;;  %v1610_v33 = vld [vmem:[%s2018_s1 + $0xa8] sm:$0xff] (!%p163_p2)   ;;  %v1617_v36 = vld [vmem:[%s2018_s1 + $0xb0] sm:$0xff] (!%p163_p2)   ;;  %v1618_v40 = vld [vmem:[%s2018_s1 + $0xb8] sm:$0xff] (!%p163_p2)  }
   0xd   : > { %s2023_s16 = smov (!%p188_p3, %s1238_s16), 1 }
   0xe   : > { %s1562_s5 = smul.u32 384, %s2023_s16  ;;  %s1330_s25 = sshll.u32 %s2023_s16, 5 }
   0xf   : > { %1367 = vmatpush3.bf16.msra.mxu0 %v1576_v5  ;;  %1556 = vmatpush3.bf16.msra.mxu1 %v1576_v5  ;;  %s1983_s27 = scalar_lea.vmem %s2021_s4, %s1330_s25 }
  0x10   : > { %1368 = vmatprep.subr.bf16.mxu0 %v1577_v6  ;;  %1549 = vmatprep.subr.bf16.mxu1 %v1577_v6  ;;  %s1733_s12 = scalar_lea.vmem %s2017_s0, %s1562_s5 }
  0x11   : > { %v1589_v11 = vld [vmem:[%s1733_s12 + $0x4] ss:$12 sps:$4 sm:$0xff]   ;;  %v1587_v19 = vld [vmem:[%s1733_s12] ss:$12 sps:$4 sm:$0xff]   ;;  %v1595_v21 = vld [vmem:[%s1733_s12 + $0x1c] ss:$12 sps:$4 sm:$0xff]  }
  0x12   : > { %v1592_v12 = vld [vmem:[%s1733_s12 + $0x124] ss:$12 sps:$4 sm:$0xff]   ;;  %743 = vmatprep.mubr.bf16.mxu0 %v1589_v11  ;;  %v1590_v20 = vld [vmem:[%s1733_s12 + $0x120] ss:$12 sps:$4 sm:$0xff]   ;;  %v1597_v23 = vld [vmem:[%s1733_s12 + $0x13c] ss:$12 sps:$4 sm:$0xff]  }
  0x13   : > { %1369 = vmatpush3.bf16.msra.mxu0 %v1578_v7  ;;  %1557 = vmatpush3.bf16.msra.mxu1 %v1578_v7  ;;  %v1599_v24 = vld [vmem:[%s1733_s12 + $0x18] ss:$12 sps:$4 sm:$0xff]   ;;  %v1603_v28 = vld [vmem:[%s1733_s12 + $0x34] ss:$12 sps:$4 sm:$0xff]   ;;  %v1607_v31 = vld [vmem:[%s1733_s12 + $0x30] ss:$12 sps:$4 sm:$0xff]  }
  0x14   : > { %1370 = vmatprep.subr.bf16.mxu0 %v1579_v8  ;;  %1550 = vmatprep.subr.bf16.mxu1 %v1579_v8  ;;  %v1600_v26 = vld [vmem:[%s1733_s12 + $0x138] ss:$12 sps:$4 sm:$0xff]   ;;  %v1605_v29 = vld [vmem:[%s1733_s12 + $0x154] ss:$12 sps:$4 sm:$0xff]   ;;  %v1608_v32 = vld [vmem:[%s1733_s12 + $0x150] ss:$12 sps:$4 sm:$0xff]  }
  0x15   : > { %839 = vmatprep.mubr.bf16.mxu1 %v1592_v12  ;;  %v1611_v34 = vld [vmem:[%s1733_s12 + $0x4c] ss:$12 sps:$4 sm:$0xff]   ;;  %v1615_v37 = vld [vmem:[%s1733_s12 + $0x48] ss:$12 sps:$4 sm:$0xff]   ;;  %v1619_v39 = vld [vmem:[%s1733_s12 + $0x64] ss:$12 sps:$4 sm:$0xff]  }
  0x16   : > { %v1613_v35 = vld [vmem:[%s1733_s12 + $0x16c] ss:$12 sps:$4 sm:$0xff]   ;;  %v1616_v38 = vld [vmem:[%s1733_s12 + $0x168] ss:$12 sps:$4 sm:$0xff]   ;;  %v1628_v47 = vld [vmem:[%s1733_s12 + $0x50] ss:$12 sps:$4 sm:$0xff]  }
  0x17   : > { %1371 = vmatpush3.bf16.msra.mxu0 %v1580_v9  ;;  %1558 = vmatpush3.bf16.msra.mxu1 %v1580_v9  ;;  %v1621_v41 = vld [vmem:[%s1733_s12 + $0x8] ss:$12 sps:$4 sm:$0xff]   ;;  %v1622_v42 = vld [vmem:[%s1733_s12 + $0x60] ss:$12 sps:$4 sm:$0xff]   ;;  %v1626_v45 = vld [vmem:[%s1733_s12 + $0x38] ss:$12 sps:$4 sm:$0xff]  }
  0x18   : > { %1372 = vmatprep.subr.bf16.mxu0 %v1581_v10  ;;  %1551 = vmatprep.subr.bf16.mxu1 %v1581_v10  ;;  %v1623_v43 = vld [vmem:[%s1733_s12 + $0x20] ss:$12 sps:$4 sm:$0xff]   ;;  %v1624_v44 = vld [vmem:[%s1733_s12 + $0x7c] ss:$12 sps:$4 sm:$0xff]   ;;  %v1627_v46 = vld [vmem:[%s1733_s12 + $0x78] ss:$12 sps:$4 sm:$0xff]  }
  0x19   : > { %v1629_v48 = vld [vmem:[%s1733_s12 + $0x94] ss:$12 sps:$4 sm:$0xff]   ;;  %v1632_v50 = vld [vmem:[%s1733_s12 + $0x90] ss:$12 sps:$4 sm:$0xff]   ;;  %v1634_v52 = vld [vmem:[%s1733_s12 + $0xac] ss:$12 sps:$4 sm:$0xff]  }
  0x1a   : > { %v1631_v49 = vld [vmem:[%s1733_s12 + $0x68] ss:$12 sps:$4 sm:$0xff]   ;;  %v1633_v51 = vld [vmem:[%s1733_s12 + $0x80] ss:$12 sps:$4 sm:$0xff]   ;;  %v1636_v53 = vld [vmem:[%s1733_s12 + $0x98] ss:$12 sps:$4 sm:$0xff]  }
  0x1b   : > { %1373 = vmatpush3.bf16.msra.mxu0 %v1582_v13  ;;  %1559 = vmatpush3.bf16.msra.mxu1 %v1582_v13  ;;  %v1637_v54 = vld [vmem:[%s1733_s12 + $0xa8] ss:$12 sps:$4 sm:$0xff]   ;;  %v1638_v55 = vld [vmem:[%s1733_s12 + $0xb0] ss:$12 sps:$4 sm:$0xff]   ;;  %v1642_v58 = vld [vmem:[%s1733_s12 + $0xc0] ss:$12 sps:$4 sm:$0xff]  }
  0x1c   : > { %1374 = vmatprep.subr.bf16.mxu0 %v1583_v14  ;;  %1552 = vmatprep.subr.bf16.mxu1 %v1583_v14  ;;  %v1639_v56 = vld [vmem:[%s1733_s12 + $0xc4] ss:$12 sps:$4 sm:$0xff]   ;;  %v1641_v57 = vld [vmem:[%s1733_s12 + $0xc8] ss:$12 sps:$4 sm:$0xff]   ;;  %v1643_v59 = vld [vmem:[%s1733_s12 + $0xe0] ss:$12 sps:$4 sm:$0xff]  }
  0x1d   : > { %v1644_v60 = vld [vmem:[%s1733_s12 + $0xdc] ss:$12 sps:$4 sm:$0xff]   ;;  %v1646_v61 = vld [vmem:[%s1733_s12 + $0xf8] ss:$12 sps:$4 sm:$0xff]   ;;  %v1649_v0 = vld [vmem:[%s1733_s12 + $0xf4] ss:$12 sps:$4 sm:$0xff]  }
  0x1e   : > { %v1647_v62 = vld [vmem:[%s1733_s12 + $0xd8] ss:$12 sps:$4 sm:$0xff]   ;;  %v1648_v63 = vld [vmem:[%s1733_s12 + $0x110] ss:$12 sps:$4 sm:$0xff]   ;;  %v1651_v1 = vld [vmem:[%s1733_s12 + $0x128] ss:$12 sps:$4 sm:$0xff]  }
  0x1f   : > { %1375 = vmatpush3.bf16.msra.mxu0 %v1584_v15  ;;  %1560 = vmatpush3.bf16.msra.mxu1 %v1584_v15  ;;  %v1652_v2 = vld [vmem:[%s1733_s12 + $0xf0] ss:$12 sps:$4 sm:$0xff]   ;;  %v1653_v3 = vld [vmem:[%s1733_s12 + $0x140] ss:$12 sps:$4 sm:$0xff]   ;;  %v1656_v5 = vld [vmem:[%s1733_s12 + $0x158] ss:$12 sps:$4 sm:$0xff]  }
  0x20   : > { %1376 = vmatprep.subr.bf16.mxu0 %v1585_v16  ;;  %1553 = vmatprep.subr.bf16.mxu1 %v1585_v16  ;;  %v1654_v4 = vld [vmem:[%s1733_s12 + $0x10c] ss:$12 sps:$4 sm:$0xff]   ;;  %v1657_v6 = vld [vmem:[%s1733_s12 + $0x108] ss:$12 sps:$4 sm:$0xff]   ;;  %v1658_v7 = vld [vmem:[%s1733_s12 + $0x170] ss:$12 sps:$4 sm:$0xff]  }
  0x23   : > { %1377 = vmatpush3.bf16.msra.mxu0 %v1586_v17  ;;  %1561 = vmatpush3.bf16.msra.mxu1 %v1586_v17 }
  0x24   : > { %1498 = vmatprep.subr.bf16.mxu1 %v1593_v18 }
  0x26   : > { %744 = vmatmul.mubr.bf16.vlgmr.msra.gmra.mrb[0].mxu0 %v1587_v19  ;;  %840 = vmatmul.mubr.bf16.vlgmr.msra.gmra.mrb[0].mxu1 %v1590_v20 }
  0x27   : > { %1499 = vmatpush3.bf16.msra.mxu1 %v1593_v18  ;;  %751 = vmatprep.mubr.bf16.mxu0 %v1595_v21 }
  0x28   : > { %1500 = vmatprep.subr.bf16.mxu1 %v1594_v22  ;;  %847 = vmatprep.mubr.bf16.mxu1 %v1597_v23 }
  0x2b   : > { %1501 = vmatpush3.bf16.msra.mxu1 %v1594_v22 }
  0x2c   : > { %1502 = vmatprep.subr.bf16.mxu1 %v1601_v25 }
  0x2e   : > { %752 = vmatmul.mubr.bf16.gmra.mrb[4].mxu0 %v1599_v24  ;;  %848 = vmatmul.mubr.bf16.gmra.mrb[4].mxu1 %v1600_v26 }
  0x2f   : > { %1503 = vmatpush3.bf16.msra.mxu1 %v1601_v25  ;;  %759 = vmatprep.mubr.bf16.mxu0 %v1603_v28 }
  0x30   : > { %1504 = vmatprep.subr.bf16.mxu1 %v1602_v27  ;;  %855 = vmatprep.mubr.bf16.mxu1 %v1605_v29 }
  0x33   : > { %1505 = vmatpush3.bf16.msra.mxu1 %v1602_v27 }
  0x34   : > { %1506 = vmatprep.subr.bf16.mxu1 %v1609_v30 }
  0x36   : > { %760 = vmatmul.mubr.bf16.gmra.mrb[8].mxu0 %v1607_v31  ;;  %856 = vmatmul.mubr.bf16.gmra.mrb[8].mxu1 %v1608_v32 }
  0x37   : > { %1507 = vmatpush3.bf16.msra.mxu1 %v1609_v30  ;;  %767 = vmatprep.mubr.bf16.mxu0 %v1611_v34 }
  0x38   : > { %1508 = vmatprep.subr.bf16.mxu1 %v1610_v33  ;;  %863 = vmatprep.mubr.bf16.mxu1 %v1613_v35 }
  0x3b   : > { %1509 = vmatpush3.bf16.msra.mxu1 %v1610_v33 }
  0x3c   : > { %1510 = vmatprep.subr.bf16.mxu1 %v1617_v36 }
  0x3e   : > { %768 = vmatmul.mubr.bf16.gmra.mrb[12].mxu0 %v1615_v37  ;;  %864 = vmatmul.mubr.bf16.gmra.mrb[12].mxu1 %v1616_v38 }
  0x3f   : > { %1511 = vmatpush3.bf16.msra.mxu1 %v1617_v36  ;;  %775 = vmatprep.mubr.bf16.mxu0 %v1619_v39 }
  0x40   : > { %1512 = vmatprep.subr.bf16.mxu1 %v1618_v40  ;;  %1514 = vmatprep.mubr.bf16.mxu1 %v1621_v41 }
  0x43   : > { %1513 = vmatpush3.bf16.msra.mxu1 %v1618_v40 }
  0x46   : > { %776 = vmatmul.mubr.bf16.gmra.mrb[16].mxu0 %v1622_v42  ;;  %1515 = vmatmul.mubr.bf16.vlgmr.msra.gmra.mrb[16].mxu1 %v1623_v43 }
  0x47   : > { %783 = vmatprep.mubr.bf16.mxu0 %v1624_v44  ;;  %1518 = vmatprep.mubr.bf16.mxu1 %v1626_v45 }
  0x4e   : > { %784 = vmatmul.mubr.bf16.gmra.mrb[20].mxu0 %v1627_v46  ;;  %1519 = vmatmul.mubr.bf16.gmra.mrb[20].mxu1 %v1628_v47 }
  0x4f   : > { %791 = vmatprep.mubr.bf16.mxu0 %v1629_v48  ;;  %1522 = vmatprep.mubr.bf16.mxu1 %v1631_v49 }
  0x56   : > { %792 = vmatmul.mubr.bf16.gmra.mrb[24].mxu0 %v1632_v50  ;;  %1523 = vmatmul.mubr.bf16.gmra.mrb[24].mxu1 %v1633_v51 }
  0x57   : > { %799 = vmatprep.mubr.bf16.mxu0 %v1634_v52  ;;  %1526 = vmatprep.mubr.bf16.mxu1 %v1636_v53 }
  0x5e   : > { %800 = vmatmul.mubr.bf16.gmra.mrb[28].mxu0 %v1637_v54  ;;  %1527 = vmatmul.mubr.bf16.gmra.mrb[28].mxu1 %v1638_v55 }
  0x5f   : > { %807 = vmatprep.mubr.bf16.mxu0 %v1639_v56  ;;  %1530 = vmatprep.mubr.bf16.mxu1 %v1641_v57 }
  0x66   : > { %808 = vmatmul.mubr.bf16.gmra.mrb[32].mxu0 %v1642_v58  ;;  %1531 = vmatmul.mubr.bf16.gmra.mrb[32].mxu1 %v1643_v59 }
  0x67   : > { %815 = vmatprep.mubr.bf16.mxu0 %v1644_v60  ;;  %1534 = vmatprep.mubr.bf16.mxu1 %v1646_v61 }
  0x6e   : > { %816 = vmatmul.mubr.bf16.gmra.mrb[36].mxu0 %v1647_v62  ;;  %1535 = vmatmul.mubr.bf16.gmra.mrb[36].mxu1 %v1648_v63 }
  0x6f   : > { %823 = vmatprep.mubr.bf16.mxu0 %v1649_v0  ;;  %1538 = vmatprep.mubr.bf16.mxu1 %v1651_v1 }
  0x76   : > { %824 = vmatmul.mubr.bf16.gmra.mrb[40].mxu0 %v1652_v2  ;;  %1539 = vmatmul.mubr.bf16.gmra.mrb[40].mxu1 %v1653_v3 }
  0x77   : > { %831 = vmatprep.mubr.bf16.mxu0 %v1654_v4  ;;  %1542 = vmatprep.mubr.bf16.mxu1 %v1656_v5 }
  0x7e   : > { %832 = vmatmul.mubr.bf16.gmra.mrb[44].mxu0 %v1657_v6  ;;  %1543 = vmatmul.mubr.bf16.gmra.mrb[44].mxu1 %v1658_v7 }
  0xf9   : > { %v1378_v8 = vpop.f32.mrb[0].mxu0  ;;  %v1450_v9 = vpop.f32.mrb[0].mxu1 }
  0xfa   : > { %v1379_v10 = vpop.f32.mrb[1].mxu0  ;;  %v1451_v11 = vpop.f32.mrb[1].mxu1 }
  0xfb   : > { %v1380_v12 = vadd.f32 %v1379_v10, %v1378_v8  ;;  %v1828_v13 = vadd.f32 %v1451_v11, %v1450_v9  ;;  %v1381_v14 = vpop.f32.mrb[2].mxu0  ;;  %v1453_v15 = vpop.f32.mrb[2].mxu1 }
  0xfc   : > { %v1382_v16 = vpop.f32.mrb[3].mxu0  ;;  %v1454_v17 = vpop.f32.mrb[3].mxu1 }
  0xfd   : > { %v1383_v18 = vadd.f32 %v1382_v16, %v1381_v14  ;;  %v1830_v19 = vadd.f32 %v1454_v17, %v1453_v15 }
 0x101   : > { %v1384_v20 = vpop.f32.mrb[4].mxu0  ;;  %v1456_v21 = vpop.f32.mrb[4].mxu1 }
 0x102   : > { %v1385_v22 = vpop.f32.mrb[5].mxu0  ;;  %v1457_v23 = vpop.f32.mrb[5].mxu1 }
 0x103   : > { %v1386_v24 = vadd.f32 %v1385_v22, %v1384_v20  ;;  %v1832_v25 = vadd.f32 %v1457_v23, %v1456_v21  ;;  %v1387_v26 = vpop.f32.mrb[6].mxu0  ;;  %v1459_v27 = vpop.f32.mrb[6].mxu1  ;;  %v1847_v23 = vld [vmem:[%s2019_s2] ss:$0 sm:$0xff] }
 0x104   : > { %v1388_v28 = vpop.f32.mrb[7].mxu0  ;;  %v1460_v29 = vpop.f32.mrb[7].mxu1 }
 0x105   : > { %v1389_v30 = vadd.f32 %v1388_v28, %v1387_v26  ;;  %v1834_v31 = vadd.f32 %v1460_v29, %v1459_v27 }
 0x109   : > { %v1390_v32 = vpop.f32.mrb[8].mxu0  ;;  %v1462_v33 = vpop.f32.mrb[8].mxu1 }
 0x10a   : > { %v1391_v34 = vpop.f32.mrb[9].mxu0  ;;  %v1463_v35 = vpop.f32.mrb[9].mxu1 }
 0x10b   : > { %v1392_v36 = vadd.f32 %v1391_v34, %v1390_v32  ;;  %v1836_v37 = vadd.f32 %v1463_v35, %v1462_v33  ;;  %v1393_v38 = vpop.f32.mrb[10].mxu0  ;;  %v1465_v39 = vpop.f32.mrb[10].mxu1 }
 0x10c   : > { %v1394_v40 = vpop.f32.mrb[11].mxu0  ;;  %v1466_v41 = vpop.f32.mrb[11].mxu1 }
 0x10d   : > { %v1395_v42 = vadd.f32 %v1394_v40, %v1393_v38  ;;  %v1838_v43 = vadd.f32 %v1466_v41, %v1465_v39 }
 0x111   : > { %v1396_v44 = vpop.f32.mrb[12].mxu0  ;;  %v1468_v45 = vpop.f32.mrb[12].mxu1 }
 0x112   : > { %v1397_v46 = vpop.f32.mrb[13].mxu0  ;;  %v1469_v47 = vpop.f32.mrb[13].mxu1 }
 0x113   : > { %v1398_v48 = vadd.f32 %v1397_v46, %v1396_v44  ;;  %v1840_v49 = vadd.f32 %v1469_v47, %v1468_v45  ;;  %v1399_v50 = vpop.f32.mrb[14].mxu0  ;;  %v1471_v51 = vpop.f32.mrb[14].mxu1 }
 0x114   : > { %v1400_v52 = vpop.f32.mrb[15].mxu0  ;;  %v1472_v53 = vpop.f32.mrb[15].mxu1 }
 0x115   : > { %v1401_v54 = vadd.f32 %v1400_v52, %v1399_v50  ;;  %v1842_v55 = vadd.f32 %v1472_v53, %v1471_v51 }
 0x119   : > { %v1402_v56 = vpop.f32.mrb[16].mxu0  ;;  %v1516_v57 = vpop.f32.mrb[16].mxu1 }
 0x11a   : > { %v915_v58 = vadd.f32 %v1516_v57, %v1386_v24  ;;  %v1403_v59 = vpop.f32.mrb[17].mxu0  ;;  %v906_v60 = vpop.f32.mrb[17].mxu1 }
 0x11b   : > { %v1404_v61 = vadd.f32 %v1403_v59, %v1402_v56  ;;  %v907_v62 = vadd.f32 %v1380_v12, %v906_v60  ;;  %v1405_v63 = vpop.f32.mrb[18].mxu0  ;;  %v1517_v0 = vpop.f32.mrb[18].mxu1 }
 0x11c   : > { %v918_v1 = vadd.f32 %v1517_v0, %v1389_v30  ;;  %v1406_v2 = vpop.f32.mrb[19].mxu0  ;;  %v909_v3 = vpop.f32.mrb[19].mxu1  ;;  %v1042_v26 = vmul.f32 %v1847_v23, %v915_v58  ;;  %v1853_v30 = vld [vmem:[%s2020_s3] ss:$0 sm:$0xff] }
 0x11d   : > { %v1407_v4 = vadd.f32 %v1406_v2, %v1405_v63  ;;  %v910_v5 = vadd.f32 %v1383_v18, %v909_v3  ;;  %v1040_v32 = vmul.f32 %v1847_v23, %v907_v62 }
 0x11e   : > { %v1043_v38 = vmul.f32 %v1847_v23, %v918_v1 }
 0x11f   : > { %v1041_v44 = vmul.f32 %v1847_v23, %v910_v5  ;;  %v1868_v52 = vadd.f32 %v1853_v30, %v1040_v32 }
 0x120   : > { %v1875_v56 = vadd.f32 %v1853_v30, %v1043_v38 }
 0x121   : > { %v1408_v6 = vpop.f32.mrb[20].mxu0  ;;  %v1520_v7 = vpop.f32.mrb[20].mxu1  ;;  %v1883_v59 = vadd.f32 %v1853_v30, %v1041_v44 }
 0x122   : > { %v931_v8 = vadd.f32 %v1520_v7, %v1398_v48  ;;  %v1409_v9 = vpop.f32.mrb[21].mxu0  ;;  %v922_v10 = vpop.f32.mrb[21].mxu1  ;;  %v1861_v48 = vadd.f32 %v1853_v30, %v1042_v26 }
 0x123   : > { %v1410_v11 = vadd.f32 %v1409_v9, %v1408_v6  ;;  %v923_v14 = vadd.f32 %v1392_v36, %v922_v10  ;;  %v1411_v15 = vpop.f32.mrb[22].mxu0  ;;  %v1521_v16 = vpop.f32.mrb[22].mxu1 }
 0x124   : > { %v934_v17 = vadd.f32 %v1521_v16, %v1401_v54  ;;  %v1412_v20 = vpop.f32.mrb[23].mxu0  ;;  %v925_v21 = vpop.f32.mrb[23].mxu1  ;;  %v1046_v10 = vmul.f32 %v1847_v23, %v931_v8 }
 0x125   : > { %v1413_v12 = vadd.f32 %v1412_v20, %v1411_v15  ;;  %v926_v22 = vadd.f32 %v1395_v42, %v925_v21  ;;  %v1044_v0 = vmul.f32 %v1847_v23, %v923_v14 }
 0x129   : > { %v1414_v18 = vpop.f32.mrb[24].mxu0  ;;  %v1524_v24 = vpop.f32.mrb[24].mxu1 }
 0x12a   : > { %v947_v27 = vadd.f32 %v1524_v24, %v1410_v11  ;;  %v1415_v28 = vpop.f32.mrb[25].mxu0  ;;  %v938_v29 = vpop.f32.mrb[25].mxu1  ;;  %v1045_v11 = vmul.f32 %v1847_v23, %v926_v22  ;;  %v1047_v24 = vmul.f32 %v1847_v23, %v934_v17 }
 0x12b   : > { %v1416_v33 = vadd.f32 %v1415_v28, %v1414_v18  ;;  %v939_v34 = vadd.f32 %v1404_v61, %v938_v29  ;;  %v1417_v35 = vpop.f32.mrb[26].mxu0  ;;  %v1525_v36 = vpop.f32.mrb[26].mxu1  ;;  %v1899_v18 = vadd.f32 %v1853_v30, %v1044_v0  ;;  %v1908_v28 = vadd.f32 %v1853_v30, %v1046_v10 }
 0x12c   : > { %v1050_v39 = vmul.f32 %v1847_v23, %v947_v27  ;;  %v950_v40 = vadd.f32 %v1525_v36, %v1413_v12  ;;  %v1418_v41 = vpop.f32.mrb[27].mxu0  ;;  %v941_v42 = vpop.f32.mrb[27].mxu1  ;;  %v1911_v29 = vadd.f32 %v1853_v30, %v1045_v11  ;;  %v1923_v38 = vadd.f32 %v1853_v30, %v1047_v24 }
 0x12d   : > { %v1048_v45 = vmul.f32 %v1847_v23, %v939_v34  ;;  %v1419_v46 = vadd.f32 %v1418_v41, %v1417_v35  ;;  %v942_v47 = vadd.f32 %v1407_v4, %v941_v42 }
 0x12e   : > { %v1864_v50 = vadd.f32 %v1853_v30, %v1050_v39  ;;  %v1051_v51 = vmul.f32 %v1847_v23, %v950_v40 }
 0x12f   : > { %v1871_v53 = vadd.f32 %v1853_v30, %v1048_v45  ;;  %v1049_v54 = vmul.f32 %v1847_v23, %v942_v47 }
 0x130   : > { %v1113_v57 = vmax.f32 %v1861_v48, %v1864_v50  ;;  %v1880_v58 = vadd.f32 %v1853_v30, %v1051_v51 }
 0x131   : > { %v1111_v60 = vmax.f32 %v1868_v52, %v1871_v53  ;;  %v1888_v61 = vadd.f32 %v1853_v30, %v1049_v54  ;;  %v1420_v62 = vpop.f32.mrb[28].mxu0  ;;  %v1528_v63 = vpop.f32.mrb[28].mxu1 }
 0x132   : > { %v1114_v1 = vmax.f32 %v1875_v56, %v1880_v58  ;;  %v1421_v2 = vpop.f32.mrb[29].mxu0  ;;  %v954_v3 = vpop.f32.mrb[29].mxu1 }
 0x133   : > { %v1112_v4 = vmax.f32 %v1883_v59, %v1888_v61  ;;  %v1422_v5 = vadd.f32 %v1421_v2, %v1420_v62  ;;  %v955_v6 = vadd.f32 %v1416_v33, %v954_v3  ;;  %v1423_v7 = vpop.f32.mrb[30].mxu0  ;;  %v1529_v9 = vpop.f32.mrb[30].mxu1 }
 0x134   : > { %v1424_v15 = vpop.f32.mrb[31].mxu0  ;;  %v957_v16 = vpop.f32.mrb[31].mxu1 }
 0x135   : > { %v963_v20 = vadd.f32 %v1528_v63, %v1422_v5  ;;  %v1052_v14 = vmul.f32 %v1847_v23, %v955_v6  ;;  %v1425_v21 = vadd.f32 %v1424_v15, %v1423_v7  ;;  %v958_v12 = vadd.f32 %v1419_v46, %v957_v16 }
 0x137   : > { %v1054_v26 = vmul.f32 %v1847_v23, %v963_v20  ;;  %v1904_v27 = vadd.f32 %v1853_v30, %v1052_v14  ;;  %v966_v8 = vadd.f32 %v1529_v9, %v1425_v21  ;;  %v1053_v22 = vmul.f32 %v1847_v23, %v958_v12 }
 0x139   : > { %v1914_v32 = vadd.f32 %v1853_v30, %v1054_v26  ;;  %v1115_v17 = vmax.f32 %v1899_v18, %v1904_v27  ;;  %v1055_v33 = vmul.f32 %v1847_v23, %v966_v8  ;;  %v1920_v34 = vadd.f32 %v1853_v30, %v1053_v22  ;;  %v1426_v35 = vpop.f32.mrb[32].mxu0  ;;  %v1532_v36 = vpop.f32.mrb[32].mxu1 }
 0x13a   : > { %v1427_v39 = vpop.f32.mrb[33].mxu0  ;;  %v970_v40 = vpop.f32.mrb[33].mxu1 }
 0x13b   : > { %v1117_v41 = vmax.f32 %v1908_v28, %v1914_v32  ;;  %v1928_v42 = vadd.f32 %v1853_v30, %v1055_v33  ;;  %v1116_v44 = vmax.f32 %v1911_v29, %v1920_v34  ;;  %v1428_v45 = vadd.f32 %v1427_v39, %v1426_v35  ;;  %v1429_v46 = vpop.f32.mrb[34].mxu0  ;;  %v1533_v47 = vpop.f32.mrb[34].mxu1 }
 0x13c   : > { %v1430_v51 = vpop.f32.mrb[35].mxu0  ;;  %v973_v54 = vpop.f32.mrb[35].mxu1 }
 0x13d   : > { %v1118_v62 = vmax.f32 %v1923_v38, %v1928_v42  ;;  %v971_v63 = vadd.f32 %v1428_v45, %v970_v40  ;;  %v1431_v0 = vadd.f32 %v1430_v51, %v1429_v46 }
 0x13f   : > { %v974_v2 = vadd.f32 %v1431_v0, %v973_v54  ;;  %v1056_v35 = vmul.f32 %v1847_v23, %v971_v63 }
 0x141   : > { %v1432_v3 = vpop.f32.mrb[36].mxu0  ;;  %v1934_v5 = vpop.f32.mrb[36].mxu1  ;;  %v1057_v51 = vmul.f32 %v1847_v23, %v974_v2 }
 0x142   : > { %v1433_v6 = vpop.f32.mrb[37].mxu0  ;;  %v986_v7 = vpop.f32.mrb[37].mxu1 }
 0x143   : > { %v1434_v9 = vadd.f32 %v1433_v6, %v1432_v3  ;;  %v1435_v10 = vpop.f32.mrb[38].mxu0  ;;  %v1936_v11 = vpop.f32.mrb[38].mxu1 }
 0x144   : > { %v1436_v15 = vpop.f32.mrb[39].mxu0  ;;  %v989_v16 = vpop.f32.mrb[39].mxu1 }
 0x145   : > { %v979_v20 = vadd.f32 %v1532_v36, %v1434_v9  ;;  %v1437_v14 = vadd.f32 %v1436_v15, %v1435_v10  ;;  %v1095_v15 = vadd.f32 %v1853_v30, %v1056_v35 }
 0x147   : > { %v982_v21 = vadd.f32 %v1533_v47, %v1437_v14  ;;  %v1058_v26 = vmul.f32 %v1847_v23, %v979_v20 }
 0x149   : > { %v1438_v12 = vpop.f32.mrb[40].mxu0  ;;  %v1540_v24 = vpop.f32.mrb[40].mxu1  ;;  %v1059_v36 = vmul.f32 %v1847_v23, %v982_v21 }
 0x14a   : > { %v1011_v8 = vadd.f32 %v1540_v24, %v1832_v25  ;;  %v1439_v22 = vpop.f32.mrb[41].mxu0  ;;  %v1002_v33 = vpop.f32.mrb[41].mxu1  ;;  %v1096_v24 = vadd.f32 %v1853_v30, %v1057_v51 }
 0x14b   : > { %v1440_v39 = vadd.f32 %v1439_v22, %v1438_v12  ;;  %v1003_v40 = vadd.f32 %v1828_v13, %v1002_v33  ;;  %v1441_v45 = vpop.f32.mrb[42].mxu0  ;;  %v1541_v46 = vpop.f32.mrb[42].mxu1  ;;  %v1097_v13 = vadd.f32 %v1853_v30, %v1058_v26 }
 0x14c   : > { %v1066_v47 = vmul.f32 %v1847_v23, %v1011_v8  ;;  %v1014_v54 = vadd.f32 %v1541_v46, %v1834_v31  ;;  %v1442_v0 = vpop.f32.mrb[43].mxu0  ;;  %v1005_v3 = vpop.f32.mrb[43].mxu1 }
 0x14d   : > { %v987_v25 = vadd.f32 %v1440_v39, %v986_v7  ;;  %v1064_v6 = vmul.f32 %v1847_v23, %v1003_v40  ;;  %v1443_v9 = vadd.f32 %v1442_v0, %v1441_v45  ;;  %v1006_v63 = vadd.f32 %v1830_v19, %v1005_v3 }
 0x14e   : > { %v1105_v10 = vadd.f32 %v1853_v30, %v1066_v47  ;;  %v1067_v2 = vmul.f32 %v1847_v23, %v1014_v54  ;;  %v1098_v7 = vadd.f32 %v1853_v30, %v1059_v36 }
 0x14f   : > { %v1103_v20 = vadd.f32 %v1853_v30, %v1064_v6  ;;  %v990_v14 = vadd.f32 %v1443_v9, %v989_v16  ;;  %v1065_v31 = vmul.f32 %v1847_v23, %v1006_v63  ;;  %v1060_v12 = vmul.f32 %v1847_v23, %v987_v25 }
 0x150   : > { %v1121_v21 = vmax.f32 %v1097_v13, %v1105_v10  ;;  %v1106_v19 = vadd.f32 %v1853_v30, %v1067_v2 }
 0x151   : > { %v1119_v26 = vmax.f32 %v1095_v15, %v1103_v20  ;;  %v1104_v8 = vadd.f32 %v1853_v30, %v1065_v31  ;;  %v1444_v22 = vpop.f32.mrb[44].mxu0  ;;  %v1544_v33 = vpop.f32.mrb[44].mxu1  ;;  %v1099_v0 = vadd.f32 %v1853_v30, %v1060_v12  ;;  %v1061_v50 = vmul.f32 %v1847_v23, %v990_v14 }
 0x152   : > { %v1129_v16 = vmax.f32 %v1113_v57, %v1121_v21  ;;  %v1122_v35 = vmax.f32 %v1098_v7, %v1106_v19  ;;  %v1027_v39 = vadd.f32 %v1544_v33, %v1840_v49  ;;  %v1445_v40 = vpop.f32.mrb[45].mxu0  ;;  %v1018_v45 = vpop.f32.mrb[45].mxu1 }
 0x153   : > { %v1127_v46 = vmax.f32 %v1111_v60, %v1119_v26  ;;  %v1120_v51 = vmax.f32 %v1096_v24, %v1104_v8  ;;  %v1446_v36 = vadd.f32 %v1445_v40, %v1444_v22  ;;  %v1447_v47 = vpop.f32.mrb[46].mxu0  ;;  %v1545_v54 = vpop.f32.mrb[46].mxu1  ;;  %v1019_v49 = vadd.f32 %v1836_v37, %v1018_v45 }
 0x154   : > { %v1130_v48 = vmax.f32 %v1114_v1, %v1122_v35  ;;  %v1448_v57 = vpop.f32.mrb[47].mxu0  ;;  %v1021_v3 = vpop.f32.mrb[47].mxu1  ;;  %v1070_v53 = vmul.f32 %v1847_v23, %v1027_v39  ;;  %v1030_v25 = vadd.f32 %v1545_v54, %v1842_v55  ;;  %v1137_v6 = vmax.f32 %v1129_v16, 0.0 }
 0x155   : > { %v1128_v52 = vmax.f32 %v1112_v4, %v1120_v51  ;;  %v995_v60 = vadd.f32 %v1934_v5, %v1446_v36  ;;  %v1068_v56 = vmul.f32 %v1847_v23, %v1019_v49  ;;  %v1449_v58 = vadd.f32 %v1448_v57, %v1447_v47 }
 0x156   : > { %v1138_v9 = vmax.f32 %v1130_v48, 0.0  ;;  %v1135_v1 = vmax.f32 %v1127_v46, 0.0  ;;  %v1022_v61 = vadd.f32 %v1838_v43, %v1021_v3  ;;  %v1071_v5 = vmul.f32 %v1847_v23, %v1030_v25 }
 0x157   : > { %v1136_v37 = vmax.f32 %v1128_v52, 0.0  ;;  %v1062_v59 = vmul.f32 %v1847_v23, %v995_v60  ;;  %v1107_v55 = vadd.f32 %v1853_v30, %v1068_v56  ;;  %v998_v63 = vadd.f32 %v1936_v11, %v1449_v58 }
 0x158   : > { %v1347_v4 = vpack.c.bf16 %v1138_v9, %v1137_v6  ;;  %v1109_v10 = vadd.f32 %v1853_v30, %v1070_v53  ;;  %v1069_v15 = vmul.f32 %v1847_v23, %v1022_v61  ;;  %v1100_v43 = vadd.f32 %v1853_v30, %v1061_v50 }
 0x159   : > { %v1342_v13 = vpack.c.bf16 %v1136_v37, %v1135_v1  ;;  %v1101_v2 = vadd.f32 %v1853_v30, %v1062_v59  ;;  %v1123_v20 = vmax.f32 %v1099_v0, %v1107_v55  ;;  %v1063_v14 = vmul.f32 %v1847_v23, %v998_v63 }
 0x15a   : > { %1359 = vst [vmem:[%s1983_s27 + $0x8] sm:$0xff] %v1347_v4   ;;  %v1108_v7 = vadd.f32 %v1853_v30, %v1069_v15  ;;  %v1110_v21 = vadd.f32 %v1853_v30, %v1071_v5 }
 0x15b   : > { %1343 = vst [vmem:[%s1983_s27] sm:$0xff] %v1342_v13   ;;  %v1125_v31 = vmax.f32 %v1101_v2, %v1109_v10  ;;  %v1131_v11 = vmax.f32 %v1115_v17, %v1123_v20  ;;  %v1102_v12 = vadd.f32 %v1853_v30, %v1063_v14 }
 0x15c   : > { %v1124_v19 = vmax.f32 %v1100_v43, %v1108_v7 }
 0x15d   : > { %v1133_v23 = vmax.f32 %v1117_v41, %v1125_v31  ;;  %v1126_v24 = vmax.f32 %v1102_v12, %v1110_v21  ;;  %v1139_v27 = vmax.f32 %v1131_v11, 0.0 }
 0x15e   : > { %v1132_v26 = vmax.f32 %v1116_v44, %v1124_v19 }
 0x15f   : > { %v1134_v18 = vmax.f32 %v1118_v62, %v1126_v24  ;;  %v1141_v8 = vmax.f32 %v1133_v23, 0.0 }
 0x160   : > { %v1140_v17 = vmax.f32 %v1132_v26, 0.0 }
 0x161   : > { %v1142_v22 = vmax.f32 %v1134_v18, 0.0 }
 0x162   : > { %v1352_v33 = vpack.c.bf16 %v1140_v17, %v1139_v27 }
 0x163   : > { %v1357_v30 = vpack.c.bf16 %v1142_v22, %v1141_v8 }
 0x164   : > { %1360 = vst [vmem:[%s1983_s27 + $0x10] sm:$0xff] %v1352_v33  }
 0x165   : > { %1361 = vst [vmem:[%s1983_s27 + $0x18] sm:$0xff] %v1357_v30  }
 0x166 PF: > { %s14_s15 = sadd.s32 1, %s1665_s15  }
 0x167   : > { %p11_p4 = scmp.ge.s32.totalorder %s14_s15, 4  }
 0x169   :  { %13 = sbr.rel (!%p11_p4) target bundleno = 1 (0x1), region = 66 }

// kernel: simple_cnn_forward.5
= control target key start
LH: loop header
LB: loop body
LE: loop exit
PB: predicated region body
PF: predicated region fallthrough
CT: control target
= control target key end

     0   :  { %v540_v36 = vlaneseq  ;;  %v5617_v37 = vmov 1966171168   ;;  %s7414_s0 = inlined_call_operand.vmem [shape: bf16[2,4096], index: 0, kind: input, shape index: {}]   ;;  %s7415_s1 = inlined_call_operand.vmem [shape: bf16[4096,256], index: 1, kind: input, shape index: {}]   ;;  %s7416_s2 = inlined_call_operand.vmem [shape: f32[1,256], index: 2, kind: input, shape index: {}]   ;;  %s7417_s3 = inlined_call_operand.vmem [shape: bf16[256,128], index: 3, kind: input, shape index: {}]   ;;  %s7418_s4 = inlined_call_operand.vmem [shape: f32[1,128], index: 4, kind: input, shape index: {}]   ;;  %s7419_s5 = inlined_call_operand.hbm [shape: f32[2,128], index: 5, kind: output, shape index: {}]  }
   0x1   :  { %v4805_v0 = vld [vmem:[%s7415_s1 + $0x4] ss:$8 sps:$4 sm:$0xff]   ;;  %v4809_v2 = vld [vmem:[%s7415_s1] ss:$8 sps:$4 sm:$0xff]   ;;  %v4811_v4 = vld [vmem:[%s7415_s1 + $0x14] ss:$8 sps:$4 sm:$0xff]   ;;  %v556_v38 = vunpack.c.l.s4 %v5617_v37 }
   0x2   :  { %v4807_v1 = vld [vmem:[%s7415_s1 + $0x804] ss:$8 sps:$4 sm:$0xff]   ;;  %3342 = vmatprep.subr.bf16.mxu1 %v4805_v0  ;;  %v4810_v3 = vld [vmem:[%s7415_s1 + $0x800] ss:$8 sps:$4 sm:$0xff]   ;;  %v4813_v5 = vld [vmem:[%s7415_s1 + $0x814] ss:$8 sps:$4 sm:$0xff]  }
   0x3   :  { %3670 = vmatprep.subr.bf16.mxu0 %v4807_v1  ;;  %3343 = vmatpush1.bf16.msra.mxu1 %v4809_v2  ;;  %v4815_v6 = vld [vmem:[%s7415_s1 + $0x10] ss:$8 sps:$4 sm:$0xff]   ;;  %v4817_v8 = vld [vmem:[%s7415_s1 + $0x24] ss:$8 sps:$4 sm:$0xff]   ;;  %v4821_v10 = vld [vmem:[%s7415_s1 + $0x20] ss:$8 sps:$4 sm:$0xff]   ;;  %v557_v43 = vunpack.c.0.s8 %v556_v38 }
   0x4   :  { %3671 = vmatpush1.bf16.msra.mxu0 %v4810_v3  ;;  %3344 = vmatprep.subr.bf16.mxu1 %v4811_v4  ;;  %v4816_v7 = vld [vmem:[%s7415_s1 + $0x810] ss:$8 sps:$4 sm:$0xff]   ;;  %v4819_v9 = vld [vmem:[%s7415_s1 + $0x824] ss:$8 sps:$4 sm:$0xff]   ;;  %v4822_v11 = vld [vmem:[%s7415_s1 + $0x820] ss:$8 sps:$4 sm:$0xff]  }
   0x5   :  { %3672 = vmatprep.subr.bf16.mxu0 %v4813_v5  ;;  %v4823_v12 = vld [vmem:[%s7415_s1 + $0x34] ss:$8 sps:$4 sm:$0xff]   ;;  %v4827_v14 = vld [vmem:[%s7415_s1 + $0x30] ss:$8 sps:$4 sm:$0xff]   ;;  %v4829_v16 = vld [vmem:[%s7415_s1 + $0x44] ss:$8 sps:$4 sm:$0xff]  }
   0x6   :  { %v4825_v13 = vld [vmem:[%s7415_s1 + $0x834] ss:$8 sps:$4 sm:$0xff]   ;;  %v4828_v15 = vld [vmem:[%s7415_s1 + $0x830] ss:$8 sps:$4 sm:$0xff]   ;;  %v4831_v17 = vld [vmem:[%s7415_s1 + $0x844] ss:$8 sps:$4 sm:$0xff]  }
   0x7   :  { %3345 = vmatpush1.bf16.msra.mxu1 %v4815_v6  ;;  %v4833_v18 = vld [vmem:[%s7415_s1 + $0x40] ss:$8 sps:$4 sm:$0xff]   ;;  %v4835_v20 = vld [vmem:[%s7415_s1 + $0x54] ss:$8 sps:$4 sm:$0xff]   ;;  %v4839_v22 = vld [vmem:[%s7415_s1 + $0x50] ss:$8 sps:$4 sm:$0xff]  }
   0x8   :  { %3673 = vmatpush1.bf16.msra.mxu0 %v4816_v7  ;;  %3346 = vmatprep.subr.bf16.mxu1 %v4817_v8  ;;  %v4834_v19 = vld [vmem:[%s7415_s1 + $0x840] ss:$8 sps:$4 sm:$0xff]   ;;  %v4837_v21 = vld [vmem:[%s7415_s1 + $0x854] ss:$8 sps:$4 sm:$0xff]   ;;  %v4840_v23 = vld [vmem:[%s7415_s1 + $0x850] ss:$8 sps:$4 sm:$0xff]  }
   0x9   :  { %3674 = vmatprep.subr.bf16.mxu0 %v4819_v9  ;;  %v4841_v24 = vld [vmem:[%s7415_s1 + $0x64] ss:$8 sps:$4 sm:$0xff]   ;;  %v4845_v26 = vld [vmem:[%s7415_s1 + $0x60] ss:$8 sps:$4 sm:$0xff]   ;;  %v4847_v28 = vld [vmem:[%s7415_s1 + $0x74] ss:$8 sps:$4 sm:$0xff]  }
   0xa   :  { %v4843_v25 = vld [vmem:[%s7415_s1 + $0x864] ss:$8 sps:$4 sm:$0xff]   ;;  %v4846_v27 = vld [vmem:[%s7415_s1 + $0x860] ss:$8 sps:$4 sm:$0xff]   ;;  %v4849_v29 = vld [vmem:[%s7415_s1 + $0x874] ss:$8 sps:$4 sm:$0xff]  }
   0xb   :  { %3347 = vmatpush1.bf16.msra.mxu1 %v4821_v10  ;;  %v4851_v30 = vld [vmem:[%s7415_s1 + $0x70] ss:$8 sps:$4 sm:$0xff]   ;;  %v4853_v32 = vld [vmem:[%s7415_s1 + $0x84] ss:$8 sps:$4 sm:$0xff]   ;;  %v4857_v34 = vld [vmem:[%s7415_s1 + $0x80] ss:$8 sps:$4 sm:$0xff]  }
   0xc   :  { %3675 = vmatpush1.bf16.msra.mxu0 %v4822_v11  ;;  %3348 = vmatprep.subr.bf16.mxu1 %v4823_v12  ;;  %v4852_v31 = vld [vmem:[%s7415_s1 + $0x870] ss:$8 sps:$4 sm:$0xff]   ;;  %v4855_v33 = vld [vmem:[%s7415_s1 + $0x884] ss:$8 sps:$4 sm:$0xff]   ;;  %v4858_v35 = vld [vmem:[%s7415_s1 + $0x880] ss:$8 sps:$4 sm:$0xff]  }
   0xd   :  { %3676 = vmatprep.subr.bf16.mxu0 %v4825_v13  ;;  %v4859_v39 = vld [vmem:[%s7415_s1 + $0x94] ss:$8 sps:$4 sm:$0xff]   ;;  %v4863_v41 = vld [vmem:[%s7415_s1 + $0x90] ss:$8 sps:$4 sm:$0xff]   ;;  %v5766_v42 = vshrl.u32 %v540_v36, 7  ;;  %v5795_v52 = vld [vmem:[%s7414_s0] sm:$0xff] }
   0xe   :  { %v4861_v40 = vld [vmem:[%s7415_s1 + $0x894] ss:$8 sps:$4 sm:$0xff]   ;;  %v4864_v44 = vld [vmem:[%s7415_s1 + $0x890] ss:$8 sps:$4 sm:$0xff]   ;;  %v4865_v45 = vld [vmem:[%s7415_s1 + $0xa4] ss:$8 sps:$4 sm:$0xff]  }
   0xf   :  { %3349 = vmatpush1.bf16.msra.mxu1 %v4827_v14  ;;  %v4867_v46 = vld [vmem:[%s7415_s1 + $0x8a4] ss:$8 sps:$4 sm:$0xff]   ;;  %v4869_v47 = vld [vmem:[%s7415_s1 + $0xa0] ss:$8 sps:$4 sm:$0xff]   ;;  %v5784_v49 = vsub.s32 %v557_v43, %v5766_v42  ;;  %v4871_v50 = vld [vmem:[%s7415_s1 + $0xb4] ss:$8 sps:$4 sm:$0xff]  }
  0x10   :  { %3677 = vmatpush1.bf16.msra.mxu0 %v4828_v15  ;;  %3350 = vmatprep.subr.bf16.mxu1 %v4829_v16  ;;  %v4870_v48 = vld [vmem:[%s7415_s1 + $0x8a0] ss:$8 sps:$4 sm:$0xff]   ;;  %v4873_v51 = vld [vmem:[%s7415_s1 + $0x8b4] ss:$8 sps:$4 sm:$0xff]   ;;  %v4875_v53 = vld [vmem:[%s7415_s1 + $0xb0] ss:$8 sps:$4 sm:$0xff]  }
  0x11   :  { %3678 = vmatprep.subr.bf16.mxu0 %v4831_v17  ;;  %v561_v54 = vrot.slane %v5795_v52, %v5784_v49  ;;  %v4876_v55 = vld [vmem:[%s7415_s1 + $0x8b0] ss:$8 sps:$4 sm:$0xff]   ;;  %v4877_v57 = vld [vmem:[%s7415_s1 + $0xc4] ss:$8 sps:$4 sm:$0xff]   ;;  %v4881_v63 = vld [vmem:[%s7415_s1 + $0xc0] ss:$8 sps:$4 sm:$0xff]  }
  0x12   :  { %v5808_v56 = vld [vmem:[%s7414_s0 + $0x10] sm:$0xff]  ;;  %v4879_v58 = vld [vmem:[%s7415_s1 + $0x8c4] ss:$8 sps:$4 sm:$0xff]   ;;  %v4882_v0 = vld [vmem:[%s7415_s1 + $0x8c0] ss:$8 sps:$4 sm:$0xff]  }
  0x13   :  { %3351 = vmatpush1.bf16.msra.mxu1 %v4833_v18  ;;  %v569_v59 = vcombine.high %v561_v54, %v561_v54  ;;  %v659_v60 = vrot.slane %v5808_v56, %v5784_v49  ;;  %v4883_v1 = vld [vmem:[%s7415_s1 + $0xd4] ss:$8 sps:$4 sm:$0xff]   ;;  %v4887_v4 = vld [vmem:[%s7415_s1 + $0xd0] ss:$8 sps:$4 sm:$0xff]   ;;  %v4889_v6 = vld [vmem:[%s7415_s1 + $0xe4] ss:$8 sps:$4 sm:$0xff]   ;;  %v5869_v16 = vrot.slane %v561_v54, %v5784_v49 }
  0x14   :  { %3679 = vmatpush1.bf16.msra.mxu0 %v4834_v19  ;;  %3352 = vmatprep.subr.bf16.mxu1 %v4835_v20  ;;  %v4885_v2 = vld [vmem:[%s7415_s1 + $0x8d4] ss:$8 sps:$4 sm:$0xff]   ;;  %v4888_v5 = vld [vmem:[%s7415_s1 + $0x8d0] ss:$8 sps:$4 sm:$0xff]   ;;  %v4891_v7 = vld [vmem:[%s7415_s1 + $0x8e4] ss:$8 sps:$4 sm:$0xff]  }
  0x15   :  { %3680 = vmatprep.subr.bf16.mxu0 %v4837_v21  ;;  %v591_v61 = vrot.slane %v569_v59, %v5784_v49  ;;  %v667_v62 = vcombine.high %v659_v60, %v659_v60  ;;  %v4893_v8 = vld [vmem:[%s7415_s1 + $0xe0] ss:$8 sps:$4 sm:$0xff]   ;;  %v4895_v10 = vld [vmem:[%s7415_s1 + $0xf4] ss:$8 sps:$4 sm:$0xff]   ;;  %v4899_v12 = vld [vmem:[%s7415_s1 + $0xf0] ss:$8 sps:$4 sm:$0xff]   ;;  %v5872_v17 = vrot.slane %v659_v60, %v5784_v49 }
  0x16   :  { %v4894_v9 = vld [vmem:[%s7415_s1 + $0x8e0] ss:$8 sps:$4 sm:$0xff]   ;;  %v4897_v11 = vld [vmem:[%s7415_s1 + $0x8f4] ss:$8 sps:$4 sm:$0xff]   ;;  %v4900_v13 = vld [vmem:[%s7415_s1 + $0x8f0] ss:$8 sps:$4 sm:$0xff]  }
  0x17   :  { %3353 = vmatpush1.bf16.msra.mxu1 %v4839_v22  ;;  %v689_v3 = vrot.slane %v667_v62, %v5784_v49  ;;  %3374 = vmatprep.mubr.bf16.mxu1 %v591_v61  ;;  %v4904_v14 = vld [vmem:[%s7415_s1 + $0x104] ss:$8 sps:$4 sm:$0xff]   ;;  %v4902_v18 = vld [vmem:[%s7415_s1 + $0x100] ss:$8 sps:$4 sm:$0xff]   ;;  %v4911_v20 = vld [vmem:[%s7415_s1 + $0x114] ss:$8 sps:$4 sm:$0xff]   ;;  %v601_v22 = vcombine.high %v591_v61, %v591_v61 }
  0x18   :  { %3681 = vmatpush1.bf16.msra.mxu0 %v4840_v23  ;;  %3354 = vmatprep.subr.bf16.mxu1 %v4841_v24  ;;  %v4908_v15 = vld [vmem:[%s7415_s1 + $0x904] ss:$8 sps:$4 sm:$0xff]   ;;  %v4906_v19 = vld [vmem:[%s7415_s1 + $0x900] ss:$8 sps:$4 sm:$0xff]   ;;  %v4914_v21 = vld [vmem:[%s7415_s1 + $0x914] ss:$8 sps:$4 sm:$0xff]  }
  0x19   :  { %3682 = vmatprep.subr.bf16.mxu0 %v4843_v25  ;;  %3702 = vmatprep.mubr.bf16.mxu0 %v689_v3  ;;  %v699_v23 = vcombine.high %v689_v3, %v689_v3  ;;  %v4909_v24 = vld [vmem:[%s7415_s1 + $0x110] ss:$8 sps:$4 sm:$0xff]   ;;  %v4927_v36 = vld [vmem:[%s7415_s1 + $0x140] ss:$8 sps:$4 sm:$0xff]   ;;  %v4935_v38 = vld [vmem:[%s7415_s1 + $0x154] ss:$8 sps:$4 sm:$0xff]  }
  0x1a   :  { %v4912_v25 = vld [vmem:[%s7415_s1 + $0x910] ss:$8 sps:$4 sm:$0xff]   ;;  %v4930_v37 = vld [vmem:[%s7415_s1 + $0x940] ss:$8 sps:$4 sm:$0xff]   ;;  %v4941_v43 = vld [vmem:[%s7415_s1 + $0x164] ss:$8 sps:$4 sm:$0xff]  }
  0x1b   :  { %3355 = vmatpush1.bf16.msra.mxu1 %v4845_v26  ;;  %v4917_v26 = vld [vmem:[%s7415_s1 + $0x124] ss:$8 sps:$4 sm:$0xff]   ;;  %v4962_v59 = vld [vmem:[%s7415_s1 + $0x994] ss:$8 sps:$4 sm:$0xff]   ;;  %v4957_v60 = vld [vmem:[%s7415_s1 + $0x190] ss:$8 sps:$4 sm:$0xff]  }
  0x1c   :  { %3683 = vmatpush1.bf16.msra.mxu0 %v4846_v27  ;;  %3356 = vmatprep.subr.bf16.mxu1 %v4847_v28  ;;  %v4920_v27 = vld [vmem:[%s7415_s1 + $0x924] ss:$8 sps:$4 sm:$0xff]   ;;  %v4915_v28 = vld [vmem:[%s7415_s1 + $0x120] ss:$8 sps:$4 sm:$0xff]   ;;  %v4960_v61 = vld [vmem:[%s7415_s1 + $0x990] ss:$8 sps:$4 sm:$0xff]  }
  0x1d   :  { %3684 = vmatprep.subr.bf16.mxu0 %v4849_v29  ;;  %v4918_v29 = vld [vmem:[%s7415_s1 + $0x920] ss:$8 sps:$4 sm:$0xff]   ;;  %v4956_v54 = vld [vmem:[%s7415_s1 + $0x984] ss:$8 sps:$4 sm:$0xff]   ;;  %v4974_v3 = vld [vmem:[%s7415_s1 + $0x9b4] ss:$8 sps:$4 sm:$0xff]  }
  0x1e   :  { %v4965_v62 = vld [vmem:[%s7415_s1 + $0x1a4] ss:$8 sps:$4 sm:$0xff]  }
  0x1f   :  { %3357 = vmatpush1.bf16.msra.mxu1 %v4851_v30  ;;  %v4923_v30 = vld [vmem:[%s7415_s1 + $0x134] ss:$8 sps:$4 sm:$0xff]  }
  0x20   :  { %3685 = vmatpush1.bf16.msra.mxu0 %v4852_v31  ;;  %3358 = vmatprep.subr.bf16.mxu1 %v4853_v32  ;;  %v4926_v31 = vld [vmem:[%s7415_s1 + $0x934] ss:$8 sps:$4 sm:$0xff]   ;;  %v4921_v32 = vld [vmem:[%s7415_s1 + $0x130] ss:$8 sps:$4 sm:$0xff]  }
  0x21   :  { %3686 = vmatprep.subr.bf16.mxu0 %v4855_v33  ;;  %v4924_v33 = vld [vmem:[%s7415_s1 + $0x930] ss:$8 sps:$4 sm:$0xff]  }
  0x23   :  { %3359 = vmatpush1.bf16.msra.mxu1 %v4857_v34  ;;  %v4929_v34 = vld [vmem:[%s7415_s1 + $0x144] ss:$8 sps:$4 sm:$0xff]  }
  0x24   :  { %3687 = vmatpush1.bf16.msra.mxu0 %v4858_v35  ;;  %3360 = vmatprep.subr.bf16.mxu1 %v4859_v39  ;;  %v4932_v35 = vld [vmem:[%s7415_s1 + $0x944] ss:$8 sps:$4 sm:$0xff]   ;;  %v4938_v39 = vld [vmem:[%s7415_s1 + $0x954] ss:$8 sps:$4 sm:$0xff]  }
  0x25   :  { %3688 = vmatprep.subr.bf16.mxu0 %v4861_v40  ;;  %v4933_v40 = vld [vmem:[%s7415_s1 + $0x150] ss:$8 sps:$4 sm:$0xff]  }
  0x27   :  { %3361 = vmatpush1.bf16.msra.mxu1 %v4863_v41  ;;  %v4936_v41 = vld [vmem:[%s7415_s1 + $0x950] ss:$8 sps:$4 sm:$0xff]  }
  0x28   :  { %3689 = vmatpush1.bf16.msra.mxu0 %v4864_v44  ;;  %3362 = vmatprep.subr.bf16.mxu1 %v4865_v45  ;;  %v4944_v44 = vld [vmem:[%s7415_s1 + $0x964] ss:$8 sps:$4 sm:$0xff]   ;;  %v4939_v45 = vld [vmem:[%s7415_s1 + $0x160] ss:$8 sps:$4 sm:$0xff]  }
  0x29   :  { %3690 = vmatprep.subr.bf16.mxu0 %v4867_v46  ;;  %v4942_v46 = vld [vmem:[%s7415_s1 + $0x960] ss:$8 sps:$4 sm:$0xff]  }
  0x2b   :  { %3363 = vmatpush1.bf16.msra.mxu1 %v4869_v47  ;;  %v4947_v47 = vld [vmem:[%s7415_s1 + $0x174] ss:$8 sps:$4 sm:$0xff]  }
  0x2c   :  { %3691 = vmatpush1.bf16.msra.mxu0 %v4870_v48  ;;  %3364 = vmatprep.subr.bf16.mxu1 %v4871_v50  ;;  %v4950_v48 = vld [vmem:[%s7415_s1 + $0x974] ss:$8 sps:$4 sm:$0xff]   ;;  %v4945_v50 = vld [vmem:[%s7415_s1 + $0x170] ss:$8 sps:$4 sm:$0xff]  }
  0x2d   :  { %3692 = vmatprep.subr.bf16.mxu0 %v4873_v51  ;;  %v4948_v51 = vld [vmem:[%s7415_s1 + $0x970] ss:$8 sps:$4 sm:$0xff]  }
  0x2f   :  { %3365 = vmatpush1.bf16.msra.mxu1 %v4875_v53  ;;  %v4953_v53 = vld [vmem:[%s7415_s1 + $0x184] ss:$8 sps:$4 sm:$0xff]  }
  0x30   :  { %3693 = vmatpush1.bf16.msra.mxu0 %v4876_v55  ;;  %3366 = vmatprep.subr.bf16.mxu1 %v4877_v57  ;;  %v4951_v55 = vld [vmem:[%s7415_s1 + $0x180] ss:$8 sps:$4 sm:$0xff]  }
  0x31   :  { %3694 = vmatprep.subr.bf16.mxu0 %v4879_v58  ;;  %v4954_v57 = vld [vmem:[%s7415_s1 + $0x980] ss:$8 sps:$4 sm:$0xff]   ;;  %v4959_v58 = vld [vmem:[%s7415_s1 + $0x194] ss:$8 sps:$4 sm:$0xff]  }
  0x33   :  { %3367 = vmatpush1.bf16.msra.mxu1 %v4881_v63  ;;  %v4968_v63 = vld [vmem:[%s7415_s1 + $0x9a4] ss:$8 sps:$4 sm:$0xff]  }
  0x34   :  { %3695 = vmatpush1.bf16.msra.mxu0 %v4882_v0  ;;  %3368 = vmatprep.subr.bf16.mxu1 %v4883_v1  ;;  %v4963_v0 = vld [vmem:[%s7415_s1 + $0x1a0] ss:$8 sps:$4 sm:$0xff]  }
  0x35   :  { %3696 = vmatprep.subr.bf16.mxu0 %v4885_v2  ;;  %v4966_v1 = vld [vmem:[%s7415_s1 + $0x9a0] ss:$8 sps:$4 sm:$0xff]   ;;  %v4971_v2 = vld [vmem:[%s7415_s1 + $0x1b4] ss:$8 sps:$4 sm:$0xff]  }
  0x37   :  { %3369 = vmatpush1.bf16.msra.mxu1 %v4887_v4  ;;  %v4969_v4 = vld [vmem:[%s7415_s1 + $0x1b0] ss:$8 sps:$4 sm:$0xff]  }
  0x38   :  { %3697 = vmatpush1.bf16.msra.mxu0 %v4888_v5  ;;  %3370 = vmatprep.subr.bf16.mxu1 %v4889_v6  ;;  %v4972_v5 = vld [vmem:[%s7415_s1 + $0x9b0] ss:$8 sps:$4 sm:$0xff]   ;;  %v4977_v6 = vld [vmem:[%s7415_s1 + $0x1c4] ss:$8 sps:$4 sm:$0xff]  }
  0x39   :  { %3698 = vmatprep.subr.bf16.mxu0 %v4891_v7  ;;  %v4980_v7 = vld [vmem:[%s7415_s1 + $0x9c4] ss:$8 sps:$4 sm:$0xff]  }
  0x3b   :  { %3371 = vmatpush1.bf16.msra.mxu1 %v4893_v8  ;;  %v4975_v8 = vld [vmem:[%s7415_s1 + $0x1c0] ss:$8 sps:$4 sm:$0xff]  }
  0x3c   :  { %3699 = vmatpush1.bf16.msra.mxu0 %v4894_v9  ;;  %3372 = vmatprep.subr.bf16.mxu1 %v4895_v10  ;;  %v4978_v9 = vld [vmem:[%s7415_s1 + $0x9c0] ss:$8 sps:$4 sm:$0xff]   ;;  %v4983_v10 = vld [vmem:[%s7415_s1 + $0x1d4] ss:$8 sps:$4 sm:$0xff]  }
  0x3d   :  { %3700 = vmatprep.subr.bf16.mxu0 %v4897_v11  ;;  %v4986_v11 = vld [vmem:[%s7415_s1 + $0x9d4] ss:$8 sps:$4 sm:$0xff]  }
  0x3f   :  { %3373 = vmatpush1.bf16.msra.mxu1 %v4899_v12  ;;  %v4981_v12 = vld [vmem:[%s7415_s1 + $0x1d0] ss:$8 sps:$4 sm:$0xff]  }
  0x40   :  { %3701 = vmatpush1.bf16.msra.mxu0 %v4900_v13  ;;  %3383 = vmatprep.subr.bf16.mxu1 %v4904_v14  ;;  %v4984_v13 = vld [vmem:[%s7415_s1 + $0x9d0] ss:$8 sps:$4 sm:$0xff]   ;;  %v4989_v14 = vld [vmem:[%s7415_s1 + $0x1e4] ss:$8 sps:$4 sm:$0xff]  }
  0x41   :  { %3711 = vmatprep.subr.bf16.mxu0 %v4908_v15  ;;  %v4992_v15 = vld [vmem:[%s7415_s1 + $0x9e4] ss:$8 sps:$4 sm:$0xff]  }
  0x42   :  { %3375 = vmatmul.mubr.bf16.vlgmr.msra.gmra.mrb[0].mxu1 %v5869_v16 }
  0x43   :  { %3703 = vmatmul.mubr.bf16.vlgmr.msra.gmra.mrb[0].mxu0 %v5872_v17  ;;  %3384 = vmatpush1.bf16.msra.mxu1 %v4902_v18  ;;  %v554_v18 = vcombine.high %v5795_v52, %v5795_v52  ;;  %v4998_v52 = vld [vmem:[%s7415_s1 + $0x9f4] ss:$8 sps:$4 sm:$0xff]  }
  0x44   :  { %3712 = vmatpush1.bf16.msra.mxu0 %v4906_v19  ;;  %3385 = vmatprep.subr.bf16.mxu1 %v4911_v20  ;;  %v652_v19 = vcombine.high %v5808_v56, %v5808_v56  ;;  %v4987_v20 = vld [vmem:[%s7415_s1 + $0x1e0] ss:$8 sps:$4 sm:$0xff]  }
  0x45   :  { %3713 = vmatprep.subr.bf16.mxu0 %v4914_v21  ;;  %3415 = vmatprep.mubr.bf16.mxu1 %v601_v22  ;;  %v4990_v21 = vld [vmem:[%s7415_s1 + $0x9e0] ss:$8 sps:$4 sm:$0xff]   ;;  %v4995_v22 = vld [vmem:[%s7415_s1 + $0x1f4] ss:$8 sps:$4 sm:$0xff]   ;;  %v6061_v56 = vrot.slane %v554_v18, %v5784_v49  ;;  %v5065_v18 = vld [vmem:[%s7415_s1 + $0x2b0] ss:$8 sps:$4 sm:$0xff]  }
  0x46   :  { %3743 = vmatprep.mubr.bf16.mxu0 %v699_v23  ;;  %v6064_v23 = vrot.slane %v652_v19, %v5784_v49  ;;  %v5068_v19 = vld [vmem:[%s7415_s1 + $0xab0] ss:$8 sps:$4 sm:$0xff]  }
  0x47   :  { %3386 = vmatpush1.bf16.msra.mxu1 %v4909_v24  ;;  %v4993_v24 = vld [vmem:[%s7415_s1 + $0x1f0] ss:$8 sps:$4 sm:$0xff]  }
  0x48   :  { %3714 = vmatpush1.bf16.msra.mxu0 %v4912_v25  ;;  %3387 = vmatprep.subr.bf16.mxu1 %v4917_v26  ;;  %v4996_v25 = vld [vmem:[%s7415_s1 + $0x9f0] ss:$8 sps:$4 sm:$0xff]   ;;  %v5001_v26 = vld [vmem:[%s7415_s1 + $0x204] ss:$8 sps:$4 sm:$0xff]  }
  0x49   :  { %3715 = vmatprep.subr.bf16.mxu0 %v4920_v27  ;;  %v5004_v27 = vld [vmem:[%s7415_s1 + $0xa04] ss:$8 sps:$4 sm:$0xff]  }
  0x4b   :  { %3388 = vmatpush1.bf16.msra.mxu1 %v4915_v28  ;;  %v570_v28 = vcombine.high %v6061_v56, %v6061_v56 }
  0x4c   :  { %3716 = vmatpush1.bf16.msra.mxu0 %v4918_v29  ;;  %3389 = vmatprep.subr.bf16.mxu1 %v4923_v30  ;;  %v668_v29 = vcombine.high %v6064_v23, %v6064_v23  ;;  %v599_v30 = vcombine.high %v5869_v16, %v5869_v16  ;;  %v5010_v16 = vld [vmem:[%s7415_s1 + $0xa14] ss:$8 sps:$4 sm:$0xff]  }
  0x4d   :  { %3717 = vmatprep.subr.bf16.mxu0 %v4926_v31  ;;  %v697_v31 = vcombine.high %v5872_v17, %v5872_v17  ;;  %v6099_v17 = vrot.slane %v570_v28, %v5784_v49  ;;  %v5085_v28 = vld [vmem:[%s7415_s1 + $0x2e4] ss:$8 sps:$4 sm:$0xff]  }
  0x4f   :  { %3390 = vmatpush1.bf16.msra.mxu1 %v4921_v32  ;;  %v4999_v32 = vld [vmem:[%s7415_s1 + $0x200] ss:$8 sps:$4 sm:$0xff]  }
  0x50   :  { %3718 = vmatpush1.bf16.msra.mxu0 %v4924_v33  ;;  %3391 = vmatprep.subr.bf16.mxu1 %v4929_v34  ;;  %v5002_v33 = vld [vmem:[%s7415_s1 + $0xa00] ss:$8 sps:$4 sm:$0xff]   ;;  %v5007_v34 = vld [vmem:[%s7415_s1 + $0x214] ss:$8 sps:$4 sm:$0xff]  }
  0x51   :  { %3719 = vmatprep.subr.bf16.mxu0 %v4932_v35  ;;  %v6102_v35 = vrot.slane %v668_v29, %v5784_v49  ;;  %v5088_v29 = vld [vmem:[%s7415_s1 + $0xae4] ss:$8 sps:$4 sm:$0xff]  }
  0x53   :  { %3392 = vmatpush1.bf16.msra.mxu1 %v4927_v36  ;;  %v5005_v36 = vld [vmem:[%s7415_s1 + $0x210] ss:$8 sps:$4 sm:$0xff]  }
  0x54   :  { %3720 = vmatpush1.bf16.msra.mxu0 %v4930_v37  ;;  %3393 = vmatprep.subr.bf16.mxu1 %v4935_v38  ;;  %v5008_v37 = vld [vmem:[%s7415_s1 + $0xa10] ss:$8 sps:$4 sm:$0xff]   ;;  %v5013_v38 = vld [vmem:[%s7415_s1 + $0x224] ss:$8 sps:$4 sm:$0xff]  }
  0x55   :  { %3721 = vmatprep.subr.bf16.mxu0 %v4938_v39  ;;  %v5016_v39 = vld [vmem:[%s7415_s1 + $0xa24] ss:$8 sps:$4 sm:$0xff]  }
  0x57   :  { %3394 = vmatpush1.bf16.msra.mxu1 %v4933_v40  ;;  %v5011_v40 = vld [vmem:[%s7415_s1 + $0x220] ss:$8 sps:$4 sm:$0xff]  }
  0x58   :  { %3722 = vmatpush1.bf16.msra.mxu0 %v4936_v41  ;;  %3395 = vmatprep.subr.bf16.mxu1 %v4941_v43  ;;  %v5014_v41 = vld [vmem:[%s7415_s1 + $0xa20] ss:$8 sps:$4 sm:$0xff]   ;;  %v5019_v43 = vld [vmem:[%s7415_s1 + $0x234] ss:$8 sps:$4 sm:$0xff]  }
  0x59   :  { %3723 = vmatprep.subr.bf16.mxu0 %v4944_v44  ;;  %v5022_v44 = vld [vmem:[%s7415_s1 + $0xa34] ss:$8 sps:$4 sm:$0xff]  }
  0x5b   :  { %3396 = vmatpush1.bf16.msra.mxu1 %v4939_v45  ;;  %v5017_v45 = vld [vmem:[%s7415_s1 + $0x230] ss:$8 sps:$4 sm:$0xff]  }
  0x5c   :  { %3724 = vmatpush1.bf16.msra.mxu0 %v4942_v46  ;;  %3397 = vmatprep.subr.bf16.mxu1 %v4947_v47  ;;  %v5020_v46 = vld [vmem:[%s7415_s1 + $0xa30] ss:$8 sps:$4 sm:$0xff]   ;;  %v5025_v47 = vld [vmem:[%s7415_s1 + $0x244] ss:$8 sps:$4 sm:$0xff]  }
  0x5d   :  { %3725 = vmatprep.subr.bf16.mxu0 %v4950_v48  ;;  %v5028_v48 = vld [vmem:[%s7415_s1 + $0xa44] ss:$8 sps:$4 sm:$0xff]  }
  0x5f   :  { %3398 = vmatpush1.bf16.msra.mxu1 %v4945_v50  ;;  %v5023_v50 = vld [vmem:[%s7415_s1 + $0x240] ss:$8 sps:$4 sm:$0xff]  }
  0x60   :  { %3726 = vmatpush1.bf16.msra.mxu0 %v4948_v51  ;;  %3399 = vmatprep.subr.bf16.mxu1 %v4953_v53  ;;  %v5026_v51 = vld [vmem:[%s7415_s1 + $0xa40] ss:$8 sps:$4 sm:$0xff]   ;;  %v5031_v53 = vld [vmem:[%s7415_s1 + $0x254] ss:$8 sps:$4 sm:$0xff]  }
  0x61   :  { %3727 = vmatprep.subr.bf16.mxu0 %v4956_v54  ;;  %v5034_v54 = vld [vmem:[%s7415_s1 + $0xa54] ss:$8 sps:$4 sm:$0xff]  }
  0x63   :  { %3400 = vmatpush1.bf16.msra.mxu1 %v4951_v55  ;;  %v5029_v55 = vld [vmem:[%s7415_s1 + $0x250] ss:$8 sps:$4 sm:$0xff]  }
  0x64   :  { %3728 = vmatpush1.bf16.msra.mxu0 %v4954_v57  ;;  %3401 = vmatprep.subr.bf16.mxu1 %v4959_v58  ;;  %v5032_v57 = vld [vmem:[%s7415_s1 + $0xa50] ss:$8 sps:$4 sm:$0xff]   ;;  %v5037_v58 = vld [vmem:[%s7415_s1 + $0x264] ss:$8 sps:$4 sm:$0xff]  }
  0x65   :  { %3729 = vmatprep.subr.bf16.mxu0 %v4962_v59  ;;  %v5040_v59 = vld [vmem:[%s7415_s1 + $0xa64] ss:$8 sps:$4 sm:$0xff]  }
  0x67   :  { %3402 = vmatpush1.bf16.msra.mxu1 %v4957_v60  ;;  %v5035_v60 = vld [vmem:[%s7415_s1 + $0x260] ss:$8 sps:$4 sm:$0xff]  }
  0x68   :  { %3730 = vmatpush1.bf16.msra.mxu0 %v4960_v61  ;;  %3403 = vmatprep.subr.bf16.mxu1 %v4965_v62  ;;  %v5038_v61 = vld [vmem:[%s7415_s1 + $0xa60] ss:$8 sps:$4 sm:$0xff]   ;;  %v5043_v62 = vld [vmem:[%s7415_s1 + $0x274] ss:$8 sps:$4 sm:$0xff]  }
  0x69   :  { %3731 = vmatprep.subr.bf16.mxu0 %v4968_v63  ;;  %v5046_v63 = vld [vmem:[%s7415_s1 + $0xa74] ss:$8 sps:$4 sm:$0xff]  }
  0x6b   :  { %3404 = vmatpush1.bf16.msra.mxu1 %v4963_v0  ;;  %v5041_v0 = vld [vmem:[%s7415_s1 + $0x270] ss:$8 sps:$4 sm:$0xff]  }
  0x6c   :  { %3732 = vmatpush1.bf16.msra.mxu0 %v4966_v1  ;;  %3405 = vmatprep.subr.bf16.mxu1 %v4971_v2  ;;  %v5044_v1 = vld [vmem:[%s7415_s1 + $0xa70] ss:$8 sps:$4 sm:$0xff]   ;;  %v5049_v2 = vld [vmem:[%s7415_s1 + $0x284] ss:$8 sps:$4 sm:$0xff]  }
  0x6d   :  { %3733 = vmatprep.subr.bf16.mxu0 %v4974_v3  ;;  %v5052_v3 = vld [vmem:[%s7415_s1 + $0xa84] ss:$8 sps:$4 sm:$0xff]  }
  0x6f   :  { %3406 = vmatpush1.bf16.msra.mxu1 %v4969_v4  ;;  %v5047_v4 = vld [vmem:[%s7415_s1 + $0x280] ss:$8 sps:$4 sm:$0xff]  }
  0x70   :  { %3734 = vmatpush1.bf16.msra.mxu0 %v4972_v5  ;;  %3407 = vmatprep.subr.bf16.mxu1 %v4977_v6  ;;  %v5050_v5 = vld [vmem:[%s7415_s1 + $0xa80] ss:$8 sps:$4 sm:$0xff]   ;;  %v5055_v6 = vld [vmem:[%s7415_s1 + $0x294] ss:$8 sps:$4 sm:$0xff]  }
  0x71   :  { %3735 = vmatprep.subr.bf16.mxu0 %v4980_v7  ;;  %v5058_v7 = vld [vmem:[%s7415_s1 + $0xa94] ss:$8 sps:$4 sm:$0xff]  }
  0x73   :  { %3408 = vmatpush1.bf16.msra.mxu1 %v4975_v8  ;;  %v5053_v8 = vld [vmem:[%s7415_s1 + $0x290] ss:$8 sps:$4 sm:$0xff]  }
  0x74   :  { %3736 = vmatpush1.bf16.msra.mxu0 %v4978_v9  ;;  %3409 = vmatprep.subr.bf16.mxu1 %v4983_v10  ;;  %v5056_v9 = vld [vmem:[%s7415_s1 + $0xa90] ss:$8 sps:$4 sm:$0xff]   ;;  %v5061_v10 = vld [vmem:[%s7415_s1 + $0x2a4] ss:$8 sps:$4 sm:$0xff]  }
  0x75   :  { %3737 = vmatprep.subr.bf16.mxu0 %v4986_v11  ;;  %v5064_v11 = vld [vmem:[%s7415_s1 + $0xaa4] ss:$8 sps:$4 sm:$0xff]  }
  0x77   :  { %3410 = vmatpush1.bf16.msra.mxu1 %v4981_v12  ;;  %v5059_v12 = vld [vmem:[%s7415_s1 + $0x2a0] ss:$8 sps:$4 sm:$0xff]  }
  0x78   :  { %3738 = vmatpush1.bf16.msra.mxu0 %v4984_v13  ;;  %3411 = vmatprep.subr.bf16.mxu1 %v4989_v14  ;;  %v5062_v13 = vld [vmem:[%s7415_s1 + $0xaa0] ss:$8 sps:$4 sm:$0xff]   ;;  %v5067_v14 = vld [vmem:[%s7415_s1 + $0x2b4] ss:$8 sps:$4 sm:$0xff]  }
  0x79   :  { %3739 = vmatprep.subr.bf16.mxu0 %v4992_v15  ;;  %v5070_v15 = vld [vmem:[%s7415_s1 + $0xab4] ss:$8 sps:$4 sm:$0xff]  }
  0x7b   :  { %3412 = vmatpush1.bf16.msra.mxu1 %v4987_v20  ;;  %v5073_v20 = vld [vmem:[%s7415_s1 + $0x2c4] ss:$8 sps:$4 sm:$0xff]  }
  0x7c   :  { %3740 = vmatpush1.bf16.msra.mxu0 %v4990_v21  ;;  %3413 = vmatprep.subr.bf16.mxu1 %v4995_v22  ;;  %v5076_v21 = vld [vmem:[%s7415_s1 + $0xac4] ss:$8 sps:$4 sm:$0xff]   ;;  %v5071_v22 = vld [vmem:[%s7415_s1 + $0x2c0] ss:$8 sps:$4 sm:$0xff]  }
  0x7d   :  { %3741 = vmatprep.subr.bf16.mxu0 %v4998_v52  ;;  %v5074_v52 = vld [vmem:[%s7415_s1 + $0xac0] ss:$8 sps:$4 sm:$0xff]  }
  0x7f   :  { %3414 = vmatpush1.bf16.msra.mxu1 %v4993_v24  ;;  %v5079_v24 = vld [vmem:[%s7415_s1 + $0x2d4] ss:$8 sps:$4 sm:$0xff]  }
  0x80   :  { %3742 = vmatpush1.bf16.msra.mxu0 %v4996_v25  ;;  %3424 = vmatprep.subr.bf16.mxu1 %v5001_v26  ;;  %v5082_v25 = vld [vmem:[%s7415_s1 + $0xad4] ss:$8 sps:$4 sm:$0xff]   ;;  %v5077_v26 = vld [vmem:[%s7415_s1 + $0x2d0] ss:$8 sps:$4 sm:$0xff]  }
  0x81   :  { %3752 = vmatprep.subr.bf16.mxu0 %v5004_v27  ;;  %v5080_v27 = vld [vmem:[%s7415_s1 + $0xad0] ss:$8 sps:$4 sm:$0xff]  }
  0x82   :  { %3416 = vmatmul.mubr.bf16.vlgmr.msra.gmra.mrb[0].mxu1 %v599_v30  ;;  %v5083_v30 = vld [vmem:[%s7415_s1 + $0x2e0] ss:$8 sps:$4 sm:$0xff]  }
  0x83   :  { %3744 = vmatmul.mubr.bf16.vlgmr.msra.gmra.mrb[0].mxu0 %v697_v31  ;;  %3425 = vmatpush1.bf16.msra.mxu1 %v4999_v32  ;;  %v5086_v31 = vld [vmem:[%s7415_s1 + $0xae0] ss:$8 sps:$4 sm:$0xff]   ;;  %v5091_v32 = vld [vmem:[%s7415_s1 + $0x2f4] ss:$8 sps:$4 sm:$0xff]  }
  0x84   :  { %3753 = vmatpush1.bf16.msra.mxu0 %v5002_v33  ;;  %3426 = vmatprep.subr.bf16.mxu1 %v5007_v34  ;;  %v5094_v33 = vld [vmem:[%s7415_s1 + $0xaf4] ss:$8 sps:$4 sm:$0xff]   ;;  %v5089_v34 = vld [vmem:[%s7415_s1 + $0x2f0] ss:$8 sps:$4 sm:$0xff]  }
  0x85   :  { %3754 = vmatprep.subr.bf16.mxu0 %v5010_v16  ;;  %3456 = vmatprep.mubr.bf16.mxu1 %v6099_v17  ;;  %v5092_v16 = vld [vmem:[%s7415_s1 + $0xaf0] ss:$8 sps:$4 sm:$0xff]  }
  0x86   :  { %3784 = vmatprep.mubr.bf16.mxu0 %v6102_v35 }
  0x87   :  { %3427 = vmatpush1.bf16.msra.mxu1 %v5005_v36  ;;  %v5097_v36 = vld [vmem:[%s7415_s1 + $0x304] ss:$8 sps:$4 sm:$0xff]  }
  0x88   :  { %3755 = vmatpush1.bf16.msra.mxu0 %v5008_v37  ;;  %3428 = vmatprep.subr.bf16.mxu1 %v5013_v38  ;;  %v5100_v37 = vld [vmem:[%s7415_s1 + $0xb04] ss:$8 sps:$4 sm:$0xff]   ;;  %v6288_v38 = vrot.slane %v6061_v56, %v5784_v49  ;;  %v5103_v56 = vld [vmem:[%s7415_s1 + $0x314] ss:$8 sps:$4 sm:$0xff]  }
  0x89   :  { %3756 = vmatprep.subr.bf16.mxu0 %v5016_v39  ;;  %v6292_v39 = vrot.slane %v6064_v23, %v5784_v49  ;;  %v5106_v23 = vld [vmem:[%s7415_s1 + $0xb14] ss:$8 sps:$4 sm:$0xff]  }
  0x8b   :  { %3429 = vmatpush1.bf16.msra.mxu1 %v5011_v40  ;;  %v5095_v40 = vld [vmem:[%s7415_s1 + $0x300] ss:$8 sps:$4 sm:$0xff]  }
  0x8c   :  { %3757 = vmatpush1.bf16.msra.mxu0 %v5014_v41  ;;  %3430 = vmatprep.subr.bf16.mxu1 %v5019_v43  ;;  %v5098_v41 = vld [vmem:[%s7415_s1 + $0xb00] ss:$8 sps:$4 sm:$0xff]   ;;  %v602_v43 = vcombine.high %v6099_v17, %v6099_v17  ;;  %v5109_v17 = vld [vmem:[%s7415_s1 + $0x324] ss:$8 sps:$4 sm:$0xff]  }
  0x8d   :  { %3758 = vmatprep.subr.bf16.mxu0 %v5022_v44  ;;  %v700_v44 = vcombine.high %v6102_v35, %v6102_v35  ;;  %v5112_v35 = vld [vmem:[%s7415_s1 + $0xb24] ss:$8 sps:$4 sm:$0xff]  }
  0x8f   :  { %3431 = vmatpush1.bf16.msra.mxu1 %v5017_v45  ;;  %v5101_v45 = vld [vmem:[%s7415_s1 + $0x310] ss:$8 sps:$4 sm:$0xff]  }
  0x90   :  { %3759 = vmatpush1.bf16.msra.mxu0 %v5020_v46  ;;  %3432 = vmatprep.subr.bf16.mxu1 %v5025_v47  ;;  %v5104_v46 = vld [vmem:[%s7415_s1 + $0xb10] ss:$8 sps:$4 sm:$0xff]   ;;  %v5107_v47 = vld [vmem:[%s7415_s1 + $0x320] ss:$8 sps:$4 sm:$0xff]  }
  0x91   :  { %3760 = vmatprep.subr.bf16.mxu0 %v5028_v48  ;;  %v5110_v48 = vld [vmem:[%s7415_s1 + $0xb20] ss:$8 sps:$4 sm:$0xff]  }
  0x93   :  { %3433 = vmatpush1.bf16.msra.mxu1 %v5023_v50  ;;  %v5115_v50 = vld [vmem:[%s7415_s1 + $0x334] ss:$8 sps:$4 sm:$0xff]  }
  0x94   :  { %3761 = vmatpush1.bf16.msra.mxu0 %v5026_v51  ;;  %3434 = vmatprep.subr.bf16.mxu1 %v5031_v53  ;;  %v5118_v51 = vld [vmem:[%s7415_s1 + $0xb34] ss:$8 sps:$4 sm:$0xff]   ;;  %v5113_v53 = vld [vmem:[%s7415_s1 + $0x330] ss:$8 sps:$4 sm:$0xff]  }
  0x95   :  { %3762 = vmatprep.subr.bf16.mxu0 %v5034_v54  ;;  %v5116_v54 = vld [vmem:[%s7415_s1 + $0xb30] ss:$8 sps:$4 sm:$0xff]  }
  0x97   :  { %3435 = vmatpush1.bf16.msra.mxu1 %v5029_v55  ;;  %v5121_v55 = vld [vmem:[%s7415_s1 + $0x344] ss:$8 sps:$4 sm:$0xff]  }
  0x98   :  { %3763 = vmatpush1.bf16.msra.mxu0 %v5032_v57  ;;  %3436 = vmatprep.subr.bf16.mxu1 %v5037_v58  ;;  %v5124_v57 = vld [vmem:[%s7415_s1 + $0xb44] ss:$8 sps:$4 sm:$0xff]   ;;  %v5119_v58 = vld [vmem:[%s7415_s1 + $0x340] ss:$8 sps:$4 sm:$0xff]  }
  0x99   :  { %3764 = vmatprep.subr.bf16.mxu0 %v5040_v59  ;;  %v5122_v59 = vld [vmem:[%s7415_s1 + $0xb40] ss:$8 sps:$4 sm:$0xff]  }
  0x9b   :  { %3437 = vmatpush1.bf16.msra.mxu1 %v5035_v60  ;;  %v5127_v60 = vld [vmem:[%s7415_s1 + $0x354] ss:$8 sps:$4 sm:$0xff]  }
  0x9c   :  { %3765 = vmatpush1.bf16.msra.mxu0 %v5038_v61  ;;  %3438 = vmatprep.subr.bf16.mxu1 %v5043_v62  ;;  %v5130_v61 = vld [vmem:[%s7415_s1 + $0xb54] ss:$8 sps:$4 sm:$0xff]   ;;  %v5125_v62 = vld [vmem:[%s7415_s1 + $0x350] ss:$8 sps:$4 sm:$0xff]  }
  0x9d   :  { %3766 = vmatprep.subr.bf16.mxu0 %v5046_v63  ;;  %v5128_v63 = vld [vmem:[%s7415_s1 + $0xb50] ss:$8 sps:$4 sm:$0xff]  }
  0x9f   :  { %3439 = vmatpush1.bf16.msra.mxu1 %v5041_v0  ;;  %v5133_v0 = vld [vmem:[%s7415_s1 + $0x364] ss:$8 sps:$4 sm:$0xff]  }
  0xa0   :  { %3767 = vmatpush1.bf16.msra.mxu0 %v5044_v1  ;;  %3440 = vmatprep.subr.bf16.mxu1 %v5049_v2  ;;  %v5136_v1 = vld [vmem:[%s7415_s1 + $0xb64] ss:$8 sps:$4 sm:$0xff]   ;;  %v5131_v2 = vld [vmem:[%s7415_s1 + $0x360] ss:$8 sps:$4 sm:$0xff]  }
  0xa1   :  { %3768 = vmatprep.subr.bf16.mxu0 %v5052_v3  ;;  %v5134_v3 = vld [vmem:[%s7415_s1 + $0xb60] ss:$8 sps:$4 sm:$0xff]  }
  0xa3   :  { %3441 = vmatpush1.bf16.msra.mxu1 %v5047_v4  ;;  %v5139_v4 = vld [vmem:[%s7415_s1 + $0x374] ss:$8 sps:$4 sm:$0xff]  }
  0xa4   :  { %3769 = vmatpush1.bf16.msra.mxu0 %v5050_v5  ;;  %3442 = vmatprep.subr.bf16.mxu1 %v5055_v6  ;;  %v5142_v5 = vld [vmem:[%s7415_s1 + $0xb74] ss:$8 sps:$4 sm:$0xff]   ;;  %v5137_v6 = vld [vmem:[%s7415_s1 + $0x370] ss:$8 sps:$4 sm:$0xff]  }
  0xa5   :  { %3770 = vmatprep.subr.bf16.mxu0 %v5058_v7  ;;  %v5140_v7 = vld [vmem:[%s7415_s1 + $0xb70] ss:$8 sps:$4 sm:$0xff]  }
  0xa7   :  { %3443 = vmatpush1.bf16.msra.mxu1 %v5053_v8  ;;  %v5145_v8 = vld [vmem:[%s7415_s1 + $0x384] ss:$8 sps:$4 sm:$0xff]  }
  0xa8   :  { %3771 = vmatpush1.bf16.msra.mxu0 %v5056_v9  ;;  %3444 = vmatprep.subr.bf16.mxu1 %v5061_v10  ;;  %v5148_v9 = vld [vmem:[%s7415_s1 + $0xb84] ss:$8 sps:$4 sm:$0xff]   ;;  %v5143_v10 = vld [vmem:[%s7415_s1 + $0x380] ss:$8 sps:$4 sm:$0xff]  }
  0xa9   :  { %3772 = vmatprep.subr.bf16.mxu0 %v5064_v11  ;;  %v5146_v11 = vld [vmem:[%s7415_s1 + $0xb80] ss:$8 sps:$4 sm:$0xff]  }
  0xab   :  { %3445 = vmatpush1.bf16.msra.mxu1 %v5059_v12  ;;  %v5151_v12 = vld [vmem:[%s7415_s1 + $0x394] ss:$8 sps:$4 sm:$0xff]  }
  0xac   :  { %3773 = vmatpush1.bf16.msra.mxu0 %v5062_v13  ;;  %3446 = vmatprep.subr.bf16.mxu1 %v5067_v14  ;;  %v5154_v13 = vld [vmem:[%s7415_s1 + $0xb94] ss:$8 sps:$4 sm:$0xff]   ;;  %v5149_v14 = vld [vmem:[%s7415_s1 + $0x390] ss:$8 sps:$4 sm:$0xff]  }
  0xad   :  { %3774 = vmatprep.subr.bf16.mxu0 %v5070_v15  ;;  %v5152_v15 = vld [vmem:[%s7415_s1 + $0xb90] ss:$8 sps:$4 sm:$0xff]  }
  0xaf   :  { %3447 = vmatpush1.bf16.msra.mxu1 %v5065_v18  ;;  %v5157_v18 = vld [vmem:[%s7415_s1 + $0x3a4] ss:$8 sps:$4 sm:$0xff]  }
  0xb0   :  { %3775 = vmatpush1.bf16.msra.mxu0 %v5068_v19  ;;  %3448 = vmatprep.subr.bf16.mxu1 %v5073_v20  ;;  %v5160_v19 = vld [vmem:[%s7415_s1 + $0xba4] ss:$8 sps:$4 sm:$0xff]   ;;  %v5155_v20 = vld [vmem:[%s7415_s1 + $0x3a0] ss:$8 sps:$4 sm:$0xff]  }
  0xb1   :  { %3776 = vmatprep.subr.bf16.mxu0 %v5076_v21  ;;  %v5158_v21 = vld [vmem:[%s7415_s1 + $0xba0] ss:$8 sps:$4 sm:$0xff]  }
  0xb3   :  { %3449 = vmatpush1.bf16.msra.mxu1 %v5071_v22  ;;  %v5163_v22 = vld [vmem:[%s7415_s1 + $0x3b4] ss:$8 sps:$4 sm:$0xff]  }
  0xb4   :  { %3777 = vmatpush1.bf16.msra.mxu0 %v5074_v52  ;;  %3450 = vmatprep.subr.bf16.mxu1 %v5079_v24  ;;  %v5166_v52 = vld [vmem:[%s7415_s1 + $0xbb4] ss:$8 sps:$4 sm:$0xff]   ;;  %v5161_v24 = vld [vmem:[%s7415_s1 + $0x3b0] ss:$8 sps:$4 sm:$0xff]  }
  0xb5   :  { %3778 = vmatprep.subr.bf16.mxu0 %v5082_v25  ;;  %v5164_v25 = vld [vmem:[%s7415_s1 + $0xbb0] ss:$8 sps:$4 sm:$0xff]  }
  0xb7   :  { %3451 = vmatpush1.bf16.msra.mxu1 %v5077_v26  ;;  %v5169_v26 = vld [vmem:[%s7415_s1 + $0x3c4] ss:$8 sps:$4 sm:$0xff]  }
  0xb8   :  { %3779 = vmatpush1.bf16.msra.mxu0 %v5080_v27  ;;  %3452 = vmatprep.subr.bf16.mxu1 %v5085_v28  ;;  %v5172_v27 = vld [vmem:[%s7415_s1 + $0xbc4] ss:$8 sps:$4 sm:$0xff]   ;;  %v5167_v28 = vld [vmem:[%s7415_s1 + $0x3c0] ss:$8 sps:$4 sm:$0xff]  }
  0xb9   :  { %3780 = vmatprep.subr.bf16.mxu0 %v5088_v29  ;;  %v5170_v29 = vld [vmem:[%s7415_s1 + $0xbc0] ss:$8 sps:$4 sm:$0xff]  }
  0xbb   :  { %3453 = vmatpush1.bf16.msra.mxu1 %v5083_v30  ;;  %v5175_v30 = vld [vmem:[%s7415_s1 + $0x3d4] ss:$8 sps:$4 sm:$0xff]  }
  0xbc   :  { %3781 = vmatpush1.bf16.msra.mxu0 %v5086_v31  ;;  %3454 = vmatprep.subr.bf16.mxu1 %v5091_v32  ;;  %v5178_v31 = vld [vmem:[%s7415_s1 + $0xbd4] ss:$8 sps:$4 sm:$0xff]   ;;  %v5173_v32 = vld [vmem:[%s7415_s1 + $0x3d0] ss:$8 sps:$4 sm:$0xff]  }
  0xbd   :  { %3782 = vmatprep.subr.bf16.mxu0 %v5094_v33  ;;  %v5176_v33 = vld [vmem:[%s7415_s1 + $0xbd0] ss:$8 sps:$4 sm:$0xff]  }
  0xbf   :  { %3455 = vmatpush1.bf16.msra.mxu1 %v5089_v34  ;;  %v5181_v34 = vld [vmem:[%s7415_s1 + $0x3e4] ss:$8 sps:$4 sm:$0xff]  }
  0xc0   :  { %3783 = vmatpush1.bf16.msra.mxu0 %v5092_v16  ;;  %3465 = vmatprep.subr.bf16.mxu1 %v5097_v36  ;;  %v5184_v16 = vld [vmem:[%s7415_s1 + $0xbe4] ss:$8 sps:$4 sm:$0xff]   ;;  %v5179_v36 = vld [vmem:[%s7415_s1 + $0x3e0] ss:$8 sps:$4 sm:$0xff]  }
  0xc1   :  { %3793 = vmatprep.subr.bf16.mxu0 %v5100_v37  ;;  %v5182_v37 = vld [vmem:[%s7415_s1 + $0xbe0] ss:$8 sps:$4 sm:$0xff]  }
  0xc2   :  { %3457 = vmatmul.mubr.bf16.vlgmr.msra.gmra.mrb[0].mxu1 %v6288_v38 }
  0xc3   :  { %3785 = vmatmul.mubr.bf16.vlgmr.msra.gmra.mrb[0].mxu0 %v6292_v39  ;;  %3466 = vmatpush1.bf16.msra.mxu1 %v5095_v40  ;;  %v6477_v40 = vld [vmem:[%s7414_s0 + $0x8] sm:$0xff] }
  0xc4   :  { %3794 = vmatpush1.bf16.msra.mxu0 %v5098_v41  ;;  %3467 = vmatprep.subr.bf16.mxu1 %v5103_v56  ;;  %v6482_v41 = vld [vmem:[%s7414_s0 + $0x18] sm:$0xff] }
  0xc5   :  { %3795 = vmatprep.subr.bf16.mxu0 %v5106_v23  ;;  %3497 = vmatprep.mubr.bf16.mxu1 %v602_v43  ;;  %v5187_v56 = vld [vmem:[%s7415_s1 + $0x3f4] ss:$8 sps:$4 sm:$0xff]   ;;  %v6492_v43 = vrot.slane %v6477_v40, %v5784_v49 }
  0xc6   :  { %3825 = vmatprep.mubr.bf16.mxu0 %v700_v44  ;;  %v5190_v23 = vld [vmem:[%s7415_s1 + $0xbf4] ss:$8 sps:$4 sm:$0xff]   ;;  %v6496_v44 = vrot.slane %v6482_v41, %v5784_v49 }
  0xc7   :  { %3468 = vmatpush1.bf16.msra.mxu1 %v5101_v45  ;;  %v5185_v45 = vld [vmem:[%s7415_s1 + $0x3f0] ss:$8 sps:$4 sm:$0xff]  }
  0xc8   :  { %3796 = vmatpush1.bf16.msra.mxu0 %v5104_v46  ;;  %3469 = vmatprep.subr.bf16.mxu1 %v5109_v17  ;;  %v5188_v46 = vld [vmem:[%s7415_s1 + $0xbf0] ss:$8 sps:$4 sm:$0xff]   ;;  %v5193_v17 = vld [vmem:[%s7415_s1 + $0x404] ss:$8 sps:$4 sm:$0xff]  }
  0xc9   :  { %3797 = vmatprep.subr.bf16.mxu0 %v5112_v35  ;;  %v5196_v35 = vld [vmem:[%s7415_s1 + $0xc04] ss:$8 sps:$4 sm:$0xff]  }
  0xcb   :  { %3470 = vmatpush1.bf16.msra.mxu1 %v5107_v47  ;;  %v618_v47 = vcombine.high %v6492_v43, %v6492_v43 }
  0xcc   :  { %3798 = vmatpush1.bf16.msra.mxu0 %v5110_v48  ;;  %3471 = vmatprep.subr.bf16.mxu1 %v5115_v50  ;;  %v716_v48 = vcombine.high %v6496_v44, %v6496_v44  ;;  %v5191_v50 = vld [vmem:[%s7415_s1 + $0x400] ss:$8 sps:$4 sm:$0xff]  }
  0xcd   :  { %3799 = vmatprep.subr.bf16.mxu0 %v5118_v51  ;;  %v5194_v51 = vld [vmem:[%s7415_s1 + $0xc00] ss:$8 sps:$4 sm:$0xff]  }
  0xcf   :  { %3472 = vmatpush1.bf16.msra.mxu1 %v5113_v53  ;;  %v600_v53 = vcombine.high %v6288_v38, %v6288_v38  ;;  %v6534_v38 = vrot.slane %v716_v48, %v5784_v49  ;;  %v5272_v48 = vld [vmem:[%s7415_s1 + $0xcd0] ss:$8 sps:$4 sm:$0xff]  }
  0xd0   :  { %3800 = vmatpush1.bf16.msra.mxu0 %v5116_v54  ;;  %3473 = vmatprep.subr.bf16.mxu1 %v5121_v55  ;;  %v698_v54 = vcombine.high %v6292_v39, %v6292_v39  ;;  %v5199_v55 = vld [vmem:[%s7415_s1 + $0x414] ss:$8 sps:$4 sm:$0xff]   ;;  %v5197_v39 = vld [vmem:[%s7415_s1 + $0x410] ss:$8 sps:$4 sm:$0xff]  }
  0xd1   :  { %3801 = vmatprep.subr.bf16.mxu0 %v5124_v57  ;;  %v5202_v57 = vld [vmem:[%s7415_s1 + $0xc14] ss:$8 sps:$4 sm:$0xff]  }
  0xd3   :  { %3474 = vmatpush1.bf16.msra.mxu1 %v5119_v58  ;;  %v6531_v58 = vrot.slane %v618_v47, %v5784_v49  ;;  %v5269_v47 = vld [vmem:[%s7415_s1 + $0x4d0] ss:$8 sps:$4 sm:$0xff]  }
  0xd4   :  { %3802 = vmatpush1.bf16.msra.mxu0 %v5122_v59  ;;  %3475 = vmatprep.subr.bf16.mxu1 %v5127_v60  ;;  %v5200_v59 = vld [vmem:[%s7415_s1 + $0xc10] ss:$8 sps:$4 sm:$0xff]   ;;  %v5205_v60 = vld [vmem:[%s7415_s1 + $0x424] ss:$8 sps:$4 sm:$0xff]  }
  0xd5   :  { %3803 = vmatprep.subr.bf16.mxu0 %v5130_v61  ;;  %v5208_v61 = vld [vmem:[%s7415_s1 + $0xc24] ss:$8 sps:$4 sm:$0xff]  }
  0xd7   :  { %3476 = vmatpush1.bf16.msra.mxu1 %v5125_v62  ;;  %v5203_v62 = vld [vmem:[%s7415_s1 + $0x420] ss:$8 sps:$4 sm:$0xff]  }
  0xd8   :  { %3804 = vmatpush1.bf16.msra.mxu0 %v5128_v63  ;;  %3477 = vmatprep.subr.bf16.mxu1 %v5133_v0  ;;  %v5206_v63 = vld [vmem:[%s7415_s1 + $0xc20] ss:$8 sps:$4 sm:$0xff]   ;;  %v5211_v0 = vld [vmem:[%s7415_s1 + $0x434] ss:$8 sps:$4 sm:$0xff]  }
  0xd9   :  { %3805 = vmatprep.subr.bf16.mxu0 %v5136_v1  ;;  %v5214_v1 = vld [vmem:[%s7415_s1 + $0xc34] ss:$8 sps:$4 sm:$0xff]  }
  0xdb   :  { %3478 = vmatpush1.bf16.msra.mxu1 %v5131_v2  ;;  %v5209_v2 = vld [vmem:[%s7415_s1 + $0x430] ss:$8 sps:$4 sm:$0xff]  }
  0xdc   :  { %3806 = vmatpush1.bf16.msra.mxu0 %v5134_v3  ;;  %3479 = vmatprep.subr.bf16.mxu1 %v5139_v4  ;;  %v5212_v3 = vld [vmem:[%s7415_s1 + $0xc30] ss:$8 sps:$4 sm:$0xff]   ;;  %v5217_v4 = vld [vmem:[%s7415_s1 + $0x444] ss:$8 sps:$4 sm:$0xff]  }
  0xdd   :  { %3807 = vmatprep.subr.bf16.mxu0 %v5142_v5  ;;  %v5220_v5 = vld [vmem:[%s7415_s1 + $0xc44] ss:$8 sps:$4 sm:$0xff]  }
  0xdf   :  { %3480 = vmatpush1.bf16.msra.mxu1 %v5137_v6  ;;  %v5215_v6 = vld [vmem:[%s7415_s1 + $0x440] ss:$8 sps:$4 sm:$0xff]  }
  0xe0   :  { %3808 = vmatpush1.bf16.msra.mxu0 %v5140_v7  ;;  %3481 = vmatprep.subr.bf16.mxu1 %v5145_v8  ;;  %v5218_v7 = vld [vmem:[%s7415_s1 + $0xc40] ss:$8 sps:$4 sm:$0xff]   ;;  %v5223_v8 = vld [vmem:[%s7415_s1 + $0x454] ss:$8 sps:$4 sm:$0xff]  }
  0xe1   :  { %3809 = vmatprep.subr.bf16.mxu0 %v5148_v9  ;;  %v5226_v9 = vld [vmem:[%s7415_s1 + $0xc54] ss:$8 sps:$4 sm:$0xff]  }
  0xe3   :  { %3482 = vmatpush1.bf16.msra.mxu1 %v5143_v10  ;;  %v5221_v10 = vld [vmem:[%s7415_s1 + $0x450] ss:$8 sps:$4 sm:$0xff]  }
  0xe4   :  { %3810 = vmatpush1.bf16.msra.mxu0 %v5146_v11  ;;  %3483 = vmatprep.subr.bf16.mxu1 %v5151_v12  ;;  %v5224_v11 = vld [vmem:[%s7415_s1 + $0xc50] ss:$8 sps:$4 sm:$0xff]   ;;  %v5229_v12 = vld [vmem:[%s7415_s1 + $0x464] ss:$8 sps:$4 sm:$0xff]  }
  0xe5   :  { %3811 = vmatprep.subr.bf16.mxu0 %v5154_v13  ;;  %v5232_v13 = vld [vmem:[%s7415_s1 + $0xc64] ss:$8 sps:$4 sm:$0xff]  }
  0xe7   :  { %3484 = vmatpush1.bf16.msra.mxu1 %v5149_v14  ;;  %v5227_v14 = vld [vmem:[%s7415_s1 + $0x460] ss:$8 sps:$4 sm:$0xff]  }
  0xe8   :  { %3812 = vmatpush1.bf16.msra.mxu0 %v5152_v15  ;;  %3485 = vmatprep.subr.bf16.mxu1 %v5157_v18  ;;  %v5230_v15 = vld [vmem:[%s7415_s1 + $0xc60] ss:$8 sps:$4 sm:$0xff]   ;;  %v5235_v18 = vld [vmem:[%s7415_s1 + $0x474] ss:$8 sps:$4 sm:$0xff]  }
  0xe9   :  { %3813 = vmatprep.subr.bf16.mxu0 %v5160_v19  ;;  %v5238_v19 = vld [vmem:[%s7415_s1 + $0xc74] ss:$8 sps:$4 sm:$0xff]  }
  0xeb   :  { %3486 = vmatpush1.bf16.msra.mxu1 %v5155_v20  ;;  %v5233_v20 = vld [vmem:[%s7415_s1 + $0x470] ss:$8 sps:$4 sm:$0xff]  }
  0xec   :  { %3814 = vmatpush1.bf16.msra.mxu0 %v5158_v21  ;;  %3487 = vmatprep.subr.bf16.mxu1 %v5163_v22  ;;  %v5236_v21 = vld [vmem:[%s7415_s1 + $0xc70] ss:$8 sps:$4 sm:$0xff]   ;;  %v5241_v22 = vld [vmem:[%s7415_s1 + $0x484] ss:$8 sps:$4 sm:$0xff]  }
  0xed   :  { %3815 = vmatprep.subr.bf16.mxu0 %v5166_v52  ;;  %v5244_v52 = vld [vmem:[%s7415_s1 + $0xc84] ss:$8 sps:$4 sm:$0xff]  }
  0xef   :  { %3488 = vmatpush1.bf16.msra.mxu1 %v5161_v24  ;;  %v5239_v24 = vld [vmem:[%s7415_s1 + $0x480] ss:$8 sps:$4 sm:$0xff]  }
  0xf0   :  { %3816 = vmatpush1.bf16.msra.mxu0 %v5164_v25  ;;  %3489 = vmatprep.subr.bf16.mxu1 %v5169_v26  ;;  %v5242_v25 = vld [vmem:[%s7415_s1 + $0xc80] ss:$8 sps:$4 sm:$0xff]   ;;  %v5247_v26 = vld [vmem:[%s7415_s1 + $0x494] ss:$8 sps:$4 sm:$0xff]  }
  0xf1   :  { %3817 = vmatprep.subr.bf16.mxu0 %v5172_v27  ;;  %v5250_v27 = vld [vmem:[%s7415_s1 + $0xc94] ss:$8 sps:$4 sm:$0xff]  }
  0xf3   :  { %3490 = vmatpush1.bf16.msra.mxu1 %v5167_v28  ;;  %v5245_v28 = vld [vmem:[%s7415_s1 + $0x490] ss:$8 sps:$4 sm:$0xff]  }
  0xf4   :  { %3818 = vmatpush1.bf16.msra.mxu0 %v5170_v29  ;;  %3491 = vmatprep.subr.bf16.mxu1 %v5175_v30  ;;  %v5248_v29 = vld [vmem:[%s7415_s1 + $0xc90] ss:$8 sps:$4 sm:$0xff]   ;;  %v5253_v30 = vld [vmem:[%s7415_s1 + $0x4a4] ss:$8 sps:$4 sm:$0xff]  }
  0xf5   :  { %3819 = vmatprep.subr.bf16.mxu0 %v5178_v31  ;;  %v5256_v31 = vld [vmem:[%s7415_s1 + $0xca4] ss:$8 sps:$4 sm:$0xff]  }
  0xf7   :  { %3492 = vmatpush1.bf16.msra.mxu1 %v5173_v32  ;;  %v5251_v32 = vld [vmem:[%s7415_s1 + $0x4a0] ss:$8 sps:$4 sm:$0xff]  }
  0xf8   :  { %3820 = vmatpush1.bf16.msra.mxu0 %v5176_v33  ;;  %3493 = vmatprep.subr.bf16.mxu1 %v5181_v34  ;;  %v5254_v33 = vld [vmem:[%s7415_s1 + $0xca0] ss:$8 sps:$4 sm:$0xff]   ;;  %v5259_v34 = vld [vmem:[%s7415_s1 + $0x4b4] ss:$8 sps:$4 sm:$0xff]  }
  0xf9   :  { %3821 = vmatprep.subr.bf16.mxu0 %v5184_v16  ;;  %v5262_v16 = vld [vmem:[%s7415_s1 + $0xcb4] ss:$8 sps:$4 sm:$0xff]  }
  0xfb   :  { %3494 = vmatpush1.bf16.msra.mxu1 %v5179_v36  ;;  %v5257_v36 = vld [vmem:[%s7415_s1 + $0x4b0] ss:$8 sps:$4 sm:$0xff]  }
  0xfc   :  { %3822 = vmatpush1.bf16.msra.mxu0 %v5182_v37  ;;  %3495 = vmatprep.subr.bf16.mxu1 %v5187_v56  ;;  %v5260_v37 = vld [vmem:[%s7415_s1 + $0xcb0] ss:$8 sps:$4 sm:$0xff]   ;;  %v5265_v56 = vld [vmem:[%s7415_s1 + $0x4c4] ss:$8 sps:$4 sm:$0xff]  }
  0xfd   :  { %3823 = vmatprep.subr.bf16.mxu0 %v5190_v23  ;;  %v5268_v23 = vld [vmem:[%s7415_s1 + $0xcc4] ss:$8 sps:$4 sm:$0xff]  }
  0xff   :  { %3496 = vmatpush1.bf16.msra.mxu1 %v5185_v45  ;;  %v5263_v45 = vld [vmem:[%s7415_s1 + $0x4c0] ss:$8 sps:$4 sm:$0xff]  }
 0x100   :  { %3824 = vmatpush1.bf16.msra.mxu0 %v5188_v46  ;;  %3506 = vmatprep.subr.bf16.mxu1 %v5193_v17  ;;  %v5266_v46 = vld [vmem:[%s7415_s1 + $0xcc0] ss:$8 sps:$4 sm:$0xff]   ;;  %v5271_v17 = vld [vmem:[%s7415_s1 + $0x4d4] ss:$8 sps:$4 sm:$0xff]  }
 0x101   :  { %3834 = vmatprep.subr.bf16.mxu0 %v5196_v35  ;;  %v5274_v35 = vld [vmem:[%s7415_s1 + $0xcd4] ss:$8 sps:$4 sm:$0xff]  }
 0x102   :  { %3498 = vmatmul.mubr.bf16.vlgmr.msra.gmra.mrb[0].mxu1 %v600_v53  ;;  %v5275_v53 = vld [vmem:[%s7415_s1 + $0x4e0] ss:$8 sps:$4 sm:$0xff]  }
 0x103   :  { %3826 = vmatmul.mubr.bf16.vlgmr.msra.gmra.mrb[0].mxu0 %v698_v54  ;;  %3507 = vmatpush1.bf16.msra.mxu1 %v5191_v50  ;;  %v5277_v50 = vld [vmem:[%s7415_s1 + $0x4e4] ss:$8 sps:$4 sm:$0xff]   ;;  %v5278_v54 = vld [vmem:[%s7415_s1 + $0xce0] ss:$8 sps:$4 sm:$0xff]  }
 0x104   :  { %3835 = vmatpush1.bf16.msra.mxu0 %v5194_v51  ;;  %3508 = vmatprep.subr.bf16.mxu1 %v5199_v55  ;;  %v5280_v51 = vld [vmem:[%s7415_s1 + $0xce4] ss:$8 sps:$4 sm:$0xff]   ;;  %v5283_v55 = vld [vmem:[%s7415_s1 + $0x4f4] ss:$8 sps:$4 sm:$0xff]  }
 0x105   :  { %3836 = vmatprep.subr.bf16.mxu0 %v5202_v57  ;;  %3538 = vmatprep.mubr.bf16.mxu1 %v6531_v58  ;;  %v5286_v57 = vld [vmem:[%s7415_s1 + $0xcf4] ss:$8 sps:$4 sm:$0xff]  }
 0x106   :  { %3866 = vmatprep.mubr.bf16.mxu0 %v6534_v38 }
 0x107   :  { %3509 = vmatpush1.bf16.msra.mxu1 %v5197_v39  ;;  %v5281_v39 = vld [vmem:[%s7415_s1 + $0x4f0] ss:$8 sps:$4 sm:$0xff]  }
 0x108   :  { %3837 = vmatpush1.bf16.msra.mxu0 %v5200_v59  ;;  %3510 = vmatprep.subr.bf16.mxu1 %v5205_v60  ;;  %v5284_v59 = vld [vmem:[%s7415_s1 + $0xcf0] ss:$8 sps:$4 sm:$0xff]   ;;  %v5289_v60 = vld [vmem:[%s7415_s1 + $0x504] ss:$8 sps:$4 sm:$0xff]  }
 0x109   :  { %3838 = vmatprep.subr.bf16.mxu0 %v5208_v61  ;;  %v5292_v61 = vld [vmem:[%s7415_s1 + $0xd04] ss:$8 sps:$4 sm:$0xff]  }
 0x10b   :  { %3511 = vmatpush1.bf16.msra.mxu1 %v5203_v62  ;;  %v6720_v62 = vrot.slane %v6492_v43, %v5784_v49  ;;  %v5295_v43 = vld [vmem:[%s7415_s1 + $0x514] ss:$8 sps:$4 sm:$0xff]  }
 0x10c   :  { %3839 = vmatpush1.bf16.msra.mxu0 %v5206_v63  ;;  %3512 = vmatprep.subr.bf16.mxu1 %v5211_v0  ;;  %v6724_v63 = vrot.slane %v6496_v44, %v5784_v49  ;;  %v5287_v0 = vld [vmem:[%s7415_s1 + $0x500] ss:$8 sps:$4 sm:$0xff]   ;;  %v5298_v44 = vld [vmem:[%s7415_s1 + $0xd14] ss:$8 sps:$4 sm:$0xff]  }
 0x10d   :  { %3840 = vmatprep.subr.bf16.mxu0 %v5214_v1  ;;  %v5290_v1 = vld [vmem:[%s7415_s1 + $0xd00] ss:$8 sps:$4 sm:$0xff]  }
 0x10f   :  { %3513 = vmatpush1.bf16.msra.mxu1 %v5209_v2  ;;  %v650_v2 = vcombine.high %v6531_v58, %v6531_v58  ;;  %v5301_v58 = vld [vmem:[%s7415_s1 + $0x524] ss:$8 sps:$4 sm:$0xff]  }
 0x110   :  { %3841 = vmatpush1.bf16.msra.mxu0 %v5212_v3  ;;  %3514 = vmatprep.subr.bf16.mxu1 %v5217_v4  ;;  %v748_v3 = vcombine.high %v6534_v38, %v6534_v38  ;;  %v5293_v4 = vld [vmem:[%s7415_s1 + $0x510] ss:$8 sps:$4 sm:$0xff]   ;;  %v5304_v38 = vld [vmem:[%s7415_s1 + $0xd24] ss:$8 sps:$4 sm:$0xff]  }
 0x111   :  { %3842 = vmatprep.subr.bf16.mxu0 %v5220_v5  ;;  %v5296_v5 = vld [vmem:[%s7415_s1 + $0xd10] ss:$8 sps:$4 sm:$0xff]  }
 0x113   :  { %3515 = vmatpush1.bf16.msra.mxu1 %v5215_v6  ;;  %v5299_v6 = vld [vmem:[%s7415_s1 + $0x520] ss:$8 sps:$4 sm:$0xff]  }
 0x114   :  { %3843 = vmatpush1.bf16.msra.mxu0 %v5218_v7  ;;  %3516 = vmatprep.subr.bf16.mxu1 %v5223_v8  ;;  %v5302_v7 = vld [vmem:[%s7415_s1 + $0xd20] ss:$8 sps:$4 sm:$0xff]   ;;  %v5307_v8 = vld [vmem:[%s7415_s1 + $0x534] ss:$8 sps:$4 sm:$0xff]  }
 0x115   :  { %3844 = vmatprep.subr.bf16.mxu0 %v5226_v9  ;;  %v5310_v9 = vld [vmem:[%s7415_s1 + $0xd34] ss:$8 sps:$4 sm:$0xff]  }
 0x117   :  { %3517 = vmatpush1.bf16.msra.mxu1 %v5221_v10  ;;  %v5305_v10 = vld [vmem:[%s7415_s1 + $0x530] ss:$8 sps:$4 sm:$0xff]  }
 0x118   :  { %3845 = vmatpush1.bf16.msra.mxu0 %v5224_v11  ;;  %3518 = vmatprep.subr.bf16.mxu1 %v5229_v12  ;;  %v5308_v11 = vld [vmem:[%s7415_s1 + $0xd30] ss:$8 sps:$4 sm:$0xff]   ;;  %v5313_v12 = vld [vmem:[%s7415_s1 + $0x544] ss:$8 sps:$4 sm:$0xff]  }
 0x119   :  { %3846 = vmatprep.subr.bf16.mxu0 %v5232_v13  ;;  %v5316_v13 = vld [vmem:[%s7415_s1 + $0xd44] ss:$8 sps:$4 sm:$0xff]  }
 0x11b   :  { %3519 = vmatpush1.bf16.msra.mxu1 %v5227_v14  ;;  %v5311_v14 = vld [vmem:[%s7415_s1 + $0x540] ss:$8 sps:$4 sm:$0xff]  }
 0x11c   :  { %3847 = vmatpush1.bf16.msra.mxu0 %v5230_v15  ;;  %3520 = vmatprep.subr.bf16.mxu1 %v5235_v18  ;;  %v5314_v15 = vld [vmem:[%s7415_s1 + $0xd40] ss:$8 sps:$4 sm:$0xff]   ;;  %v5319_v18 = vld [vmem:[%s7415_s1 + $0x554] ss:$8 sps:$4 sm:$0xff]  }
 0x11d   :  { %3848 = vmatprep.subr.bf16.mxu0 %v5238_v19  ;;  %v5322_v19 = vld [vmem:[%s7415_s1 + $0xd54] ss:$8 sps:$4 sm:$0xff]  }
 0x11f   :  { %3521 = vmatpush1.bf16.msra.mxu1 %v5233_v20 }
 0x120   :  { %3849 = vmatpush1.bf16.msra.mxu0 %v5236_v21  ;;  %3522 = vmatprep.subr.bf16.mxu1 %v5241_v22 }
 0x121   :  { %3850 = vmatprep.subr.bf16.mxu0 %v5244_v52 }
 0x123   :  { %3523 = vmatpush1.bf16.msra.mxu1 %v5239_v24 }
 0x124   :  { %3851 = vmatpush1.bf16.msra.mxu0 %v5242_v25  ;;  %3524 = vmatprep.subr.bf16.mxu1 %v5247_v26 }
 0x125   :  { %3852 = vmatprep.subr.bf16.mxu0 %v5250_v27 }
 0x127   :  { %3525 = vmatpush1.bf16.msra.mxu1 %v5245_v28 }
 0x128   :  { %3853 = vmatpush1.bf16.msra.mxu0 %v5248_v29  ;;  %3526 = vmatprep.subr.bf16.mxu1 %v5253_v30 }
 0x129   :  { %3854 = vmatprep.subr.bf16.mxu0 %v5256_v31 }
 0x12b   :  { %3527 = vmatpush1.bf16.msra.mxu1 %v5251_v32 }
 0x12c   :  { %3855 = vmatpush1.bf16.msra.mxu0 %v5254_v33  ;;  %3528 = vmatprep.subr.bf16.mxu1 %v5259_v34 }
 0x12d   :  { %3856 = vmatprep.subr.bf16.mxu0 %v5262_v16 }
 0x12f   :  { %3529 = vmatpush1.bf16.msra.mxu1 %v5257_v36 }
 0x130   :  { %3857 = vmatpush1.bf16.msra.mxu0 %v5260_v37  ;;  %3530 = vmatprep.subr.bf16.mxu1 %v5265_v56 }
 0x131   :  { %3858 = vmatprep.subr.bf16.mxu0 %v5268_v23 }
 0x133   :  { %3531 = vmatpush1.bf16.msra.mxu1 %v5263_v45 }
 0x134   :  { %3859 = vmatpush1.bf16.msra.mxu0 %v5266_v46  ;;  %3532 = vmatprep.subr.bf16.mxu1 %v5271_v17 }
 0x135   :  { %3860 = vmatprep.subr.bf16.mxu0 %v5274_v35 }
 0x137   :  { %3533 = vmatpush1.bf16.msra.mxu1 %v5269_v47 }
 0x138   :  { %3861 = vmatpush1.bf16.msra.mxu0 %v5272_v48  ;;  %3534 = vmatprep.subr.bf16.mxu1 %v5277_v50 }
 0x139   :  { %3862 = vmatprep.subr.bf16.mxu0 %v5280_v51 }
 0x13b   :  { %3535 = vmatpush1.bf16.msra.mxu1 %v5275_v53 }
 0x13c   :  { %3863 = vmatpush1.bf16.msra.mxu0 %v5278_v54  ;;  %3536 = vmatprep.subr.bf16.mxu1 %v5283_v55 }
 0x13d   :  { %3864 = vmatprep.subr.bf16.mxu0 %v5286_v57 }
 0x13f   :  { %3537 = vmatpush1.bf16.msra.mxu1 %v5281_v39 }
 0x140   :  { %3865 = vmatpush1.bf16.msra.mxu0 %v5284_v59  ;;  %3547 = vmatprep.subr.bf16.mxu1 %v5289_v60 }
 0x141   :  { %3875 = vmatprep.subr.bf16.mxu0 %v5292_v61 }
 0x142   :  { %3539 = vmatmul.mubr.bf16.vlgmr.msra.gmra.mrb[0].mxu1 %v6720_v62 }
 0x143   :  { %3867 = vmatmul.mubr.bf16.vlgmr.msra.gmra.mrb[0].mxu0 %v6724_v63  ;;  %3548 = vmatpush1.bf16.msra.mxu1 %v5287_v0 }
 0x144   :  { %3876 = vmatpush1.bf16.msra.mxu0 %v5290_v1  ;;  %3549 = vmatprep.subr.bf16.mxu1 %v5295_v43 }
 0x145   :  { %3877 = vmatprep.subr.bf16.mxu0 %v5298_v44  ;;  %3579 = vmatprep.mubr.bf16.mxu1 %v650_v2 }
 0x146   :  { %3907 = vmatprep.mubr.bf16.mxu0 %v748_v3 }
 0x147   :  { %3550 = vmatpush1.bf16.msra.mxu1 %v5293_v4 }
 0x148   :  { %3878 = vmatpush1.bf16.msra.mxu0 %v5296_v5  ;;  %3551 = vmatprep.subr.bf16.mxu1 %v5301_v58 }
 0x149   :  { %3879 = vmatprep.subr.bf16.mxu0 %v5304_v38 }
 0x14b   :  { %3552 = vmatpush1.bf16.msra.mxu1 %v5299_v6 }
 0x14c   :  { %3880 = vmatpush1.bf16.msra.mxu0 %v5302_v7  ;;  %3553 = vmatprep.subr.bf16.mxu1 %v5307_v8 }
 0x14d   :  { %3881 = vmatprep.subr.bf16.mxu0 %v5310_v9 }
 0x14f   :  { %3554 = vmatpush1.bf16.msra.mxu1 %v5305_v10 }
 0x150   :  { %3882 = vmatpush1.bf16.msra.mxu0 %v5308_v11  ;;  %3555 = vmatprep.subr.bf16.mxu1 %v5313_v12 }
 0x151   :  { %3883 = vmatprep.subr.bf16.mxu0 %v5316_v13 }
 0x152   :  { %10 = vsyncpa [#allocation3], 0  ;;  %v5317_v20 = vld [vmem:[%s7415_s1 + $0x550] ss:$8 sps:$4 sm:$0xff]   ;;  %v5325_v22 = vld [vmem:[%s7415_s1 + $0x564] ss:$8 sps:$4 sm:$0xff]   ;;  %v603_v0 = vcombine.high %v6477_v40, %v6477_v40  ;;  %v701_v1 = vcombine.high %v6482_v41, %v6482_v41  ;;  %v648_v8 = vcombine.high %v6720_v62, %v6720_v62  ;;  %v746_v9 = vcombine.high %v6724_v63, %v6724_v63 }
 0x153   :  { %3556 = vmatpush1.bf16.msra.mxu1 %v5311_v14  ;;  %v5320_v21 = vld [vmem:[%s7415_s1 + $0xd50] ss:$8 sps:$4 sm:$0xff]   ;;  %v5328_v52 = vld [vmem:[%s7415_s1 + $0xd64] ss:$8 sps:$4 sm:$0xff]   ;;  %v5323_v24 = vld [vmem:[%s7415_s1 + $0x560] ss:$8 sps:$4 sm:$0xff]  }
 0x154   :  { %3884 = vmatpush1.bf16.msra.mxu0 %v5314_v15  ;;  %3557 = vmatprep.subr.bf16.mxu1 %v5319_v18  ;;  %v5326_v25 = vld [vmem:[%s7415_s1 + $0xd60] ss:$8 sps:$4 sm:$0xff]   ;;  %v5331_v26 = vld [vmem:[%s7415_s1 + $0x574] ss:$8 sps:$4 sm:$0xff]   ;;  %v5329_v28 = vld [vmem:[%s7415_s1 + $0x570] ss:$8 sps:$4 sm:$0xff]   ;;  %v6917_v41 = vrot.slane %v603_v0, %v5784_v49  ;;  %v6920_v3 = vrot.slane %v701_v1, %v5784_v49 }
 0x155   :  { %3885 = vmatprep.subr.bf16.mxu0 %v5322_v19  ;;  %v5334_v27 = vld [vmem:[%s7415_s1 + $0xd74] ss:$8 sps:$4 sm:$0xff]   ;;  %v5332_v29 = vld [vmem:[%s7415_s1 + $0xd70] ss:$8 sps:$4 sm:$0xff]   ;;  %v5337_v30 = vld [vmem:[%s7415_s1 + $0x584] ss:$8 sps:$4 sm:$0xff]  }
 0x156   :  { %v5340_v31 = vld [vmem:[%s7415_s1 + $0xd84] ss:$8 sps:$4 sm:$0xff]   ;;  %v5335_v32 = vld [vmem:[%s7415_s1 + $0x580] ss:$8 sps:$4 sm:$0xff]   ;;  %v5343_v34 = vld [vmem:[%s7415_s1 + $0x594] ss:$8 sps:$4 sm:$0xff]   ;;  %v619_v6 = vcombine.high %v6917_v41, %v6917_v41  ;;  %v717_v7 = vcombine.high %v6920_v3, %v6920_v3 }
 0x157   :  { %3558 = vmatpush1.bf16.msra.mxu1 %v5317_v20  ;;  %v5338_v33 = vld [vmem:[%s7415_s1 + $0xd80] ss:$8 sps:$4 sm:$0xff]   ;;  %v5346_v16 = vld [vmem:[%s7415_s1 + $0xd94] ss:$8 sps:$4 sm:$0xff]   ;;  %v5341_v36 = vld [vmem:[%s7415_s1 + $0x590] ss:$8 sps:$4 sm:$0xff]  }
 0x158   :  { %3886 = vmatpush1.bf16.msra.mxu0 %v5320_v21  ;;  %3559 = vmatprep.subr.bf16.mxu1 %v5325_v22  ;;  %v5344_v37 = vld [vmem:[%s7415_s1 + $0xd90] ss:$8 sps:$4 sm:$0xff]   ;;  %v5349_v56 = vld [vmem:[%s7415_s1 + $0x5a4] ss:$8 sps:$4 sm:$0xff]   ;;  %v5347_v45 = vld [vmem:[%s7415_s1 + $0x5a0] ss:$8 sps:$4 sm:$0xff]   ;;  %v6955_v63 = vrot.slane %v619_v6, %v5784_v49  ;;  %v6958_v13 = vrot.slane %v717_v7, %v5784_v49 }
 0x159   :  { %3887 = vmatprep.subr.bf16.mxu0 %v5328_v52  ;;  %v5352_v23 = vld [vmem:[%s7415_s1 + $0xda4] ss:$8 sps:$4 sm:$0xff]   ;;  %v5350_v46 = vld [vmem:[%s7415_s1 + $0xda0] ss:$8 sps:$4 sm:$0xff]   ;;  %v5355_v17 = vld [vmem:[%s7415_s1 + $0x5b4] ss:$8 sps:$4 sm:$0xff]  }
 0x15a   :  { %v5358_v35 = vld [vmem:[%s7415_s1 + $0xdb4] ss:$8 sps:$4 sm:$0xff]   ;;  %v5353_v47 = vld [vmem:[%s7415_s1 + $0x5b0] ss:$8 sps:$4 sm:$0xff]   ;;  %v5361_v50 = vld [vmem:[%s7415_s1 + $0x5c4] ss:$8 sps:$4 sm:$0xff]  }
 0x15b   :  { %3560 = vmatpush1.bf16.msra.mxu1 %v5323_v24  ;;  %v5356_v48 = vld [vmem:[%s7415_s1 + $0xdb0] ss:$8 sps:$4 sm:$0xff]   ;;  %v5364_v51 = vld [vmem:[%s7415_s1 + $0xdc4] ss:$8 sps:$4 sm:$0xff]   ;;  %v5359_v53 = vld [vmem:[%s7415_s1 + $0x5c0] ss:$8 sps:$4 sm:$0xff]  }
 0x15c   :  { %3888 = vmatpush1.bf16.msra.mxu0 %v5326_v25  ;;  %3561 = vmatprep.subr.bf16.mxu1 %v5331_v26  ;;  %v5362_v54 = vld [vmem:[%s7415_s1 + $0xdc0] ss:$8 sps:$4 sm:$0xff]   ;;  %v5367_v55 = vld [vmem:[%s7415_s1 + $0x5d4] ss:$8 sps:$4 sm:$0xff]   ;;  %v5365_v39 = vld [vmem:[%s7415_s1 + $0x5d0] ss:$8 sps:$4 sm:$0xff]  }
 0x15d   :  { %3889 = vmatprep.subr.bf16.mxu0 %v5334_v27  ;;  %v5370_v57 = vld [vmem:[%s7415_s1 + $0xdd4] ss:$8 sps:$4 sm:$0xff]   ;;  %v5368_v59 = vld [vmem:[%s7415_s1 + $0xdd0] ss:$8 sps:$4 sm:$0xff]   ;;  %v5373_v60 = vld [vmem:[%s7415_s1 + $0x5e4] ss:$8 sps:$4 sm:$0xff]  }
 0x15e   :  { %v5376_v61 = vld [vmem:[%s7415_s1 + $0xde4] ss:$8 sps:$4 sm:$0xff]   ;;  %v5371_v43 = vld [vmem:[%s7415_s1 + $0x5e0] ss:$8 sps:$4 sm:$0xff]   ;;  %v5379_v2 = vld [vmem:[%s7415_s1 + $0x5f4] ss:$8 sps:$4 sm:$0xff]  }
 0x15f   :  { %3562 = vmatpush1.bf16.msra.mxu1 %v5329_v28  ;;  %v5374_v44 = vld [vmem:[%s7415_s1 + $0xde0] ss:$8 sps:$4 sm:$0xff]   ;;  %v5382_v40 = vld [vmem:[%s7415_s1 + $0xdf4] ss:$8 sps:$4 sm:$0xff]   ;;  %v5377_v4 = vld [vmem:[%s7415_s1 + $0x5f0] ss:$8 sps:$4 sm:$0xff]  }
 0x160   :  { %3890 = vmatpush1.bf16.msra.mxu0 %v5332_v29  ;;  %3563 = vmatprep.subr.bf16.mxu1 %v5337_v30  ;;  %v5380_v5 = vld [vmem:[%s7415_s1 + $0xdf0] ss:$8 sps:$4 sm:$0xff]   ;;  %v5385_v58 = vld [vmem:[%s7415_s1 + $0x604] ss:$8 sps:$4 sm:$0xff]   ;;  %v5383_v10 = vld [vmem:[%s7415_s1 + $0x600] ss:$8 sps:$4 sm:$0xff]  }
 0x161   :  { %3891 = vmatprep.subr.bf16.mxu0 %v5340_v31  ;;  %v5388_v38 = vld [vmem:[%s7415_s1 + $0xe04] ss:$8 sps:$4 sm:$0xff]   ;;  %v5386_v11 = vld [vmem:[%s7415_s1 + $0xe00] ss:$8 sps:$4 sm:$0xff]   ;;  %v5391_v12 = vld [vmem:[%s7415_s1 + $0x614] ss:$8 sps:$4 sm:$0xff]  }
 0x162   :  { %v5394_v62 = vld [vmem:[%s7415_s1 + $0xe14] ss:$8 sps:$4 sm:$0xff]   ;;  %v5389_v14 = vld [vmem:[%s7415_s1 + $0x610] ss:$8 sps:$4 sm:$0xff]   ;;  %v5397_v18 = vld [vmem:[%s7415_s1 + $0x624] ss:$8 sps:$4 sm:$0xff]  }
 0x163   :  { %3564 = vmatpush1.bf16.msra.mxu1 %v5335_v32  ;;  %v5392_v15 = vld [vmem:[%s7415_s1 + $0xe10] ss:$8 sps:$4 sm:$0xff]   ;;  %v5400_v19 = vld [vmem:[%s7415_s1 + $0xe24] ss:$8 sps:$4 sm:$0xff]   ;;  %v5395_v20 = vld [vmem:[%s7415_s1 + $0x620] ss:$8 sps:$4 sm:$0xff]  }
 0x164   :  { %3892 = vmatpush1.bf16.msra.mxu0 %v5338_v33  ;;  %3565 = vmatprep.subr.bf16.mxu1 %v5343_v34  ;;  %v5398_v21 = vld [vmem:[%s7415_s1 + $0xe20] ss:$8 sps:$4 sm:$0xff]   ;;  %v5403_v22 = vld [vmem:[%s7415_s1 + $0x634] ss:$8 sps:$4 sm:$0xff]   ;;  %v5401_v24 = vld [vmem:[%s7415_s1 + $0x630] ss:$8 sps:$4 sm:$0xff]  }
 0x165   :  { %3893 = vmatprep.subr.bf16.mxu0 %v5346_v16  ;;  %v5406_v52 = vld [vmem:[%s7415_s1 + $0xe34] ss:$8 sps:$4 sm:$0xff]   ;;  %v5404_v25 = vld [vmem:[%s7415_s1 + $0xe30] ss:$8 sps:$4 sm:$0xff]   ;;  %v5409_v26 = vld [vmem:[%s7415_s1 + $0x644] ss:$8 sps:$4 sm:$0xff]  }
 0x166   :  { %v5412_v27 = vld [vmem:[%s7415_s1 + $0xe44] ss:$8 sps:$4 sm:$0xff]   ;;  %v5407_v28 = vld [vmem:[%s7415_s1 + $0x640] ss:$8 sps:$4 sm:$0xff]   ;;  %v5415_v30 = vld [vmem:[%s7415_s1 + $0x654] ss:$8 sps:$4 sm:$0xff]  }
 0x167   :  { %3566 = vmatpush1.bf16.msra.mxu1 %v5341_v36  ;;  %v5410_v29 = vld [vmem:[%s7415_s1 + $0xe40] ss:$8 sps:$4 sm:$0xff]   ;;  %v5418_v31 = vld [vmem:[%s7415_s1 + $0xe54] ss:$8 sps:$4 sm:$0xff]   ;;  %v5413_v32 = vld [vmem:[%s7415_s1 + $0x650] ss:$8 sps:$4 sm:$0xff]  }
 0x168   :  { %3894 = vmatpush1.bf16.msra.mxu0 %v5344_v37  ;;  %3567 = vmatprep.subr.bf16.mxu1 %v5349_v56  ;;  %v5416_v33 = vld [vmem:[%s7415_s1 + $0xe50] ss:$8 sps:$4 sm:$0xff]   ;;  %v5421_v34 = vld [vmem:[%s7415_s1 + $0x664] ss:$8 sps:$4 sm:$0xff]   ;;  %v5419_v36 = vld [vmem:[%s7415_s1 + $0x660] ss:$8 sps:$4 sm:$0xff]  }
 0x169   :  { %3895 = vmatprep.subr.bf16.mxu0 %v5352_v23  ;;  %v5424_v16 = vld [vmem:[%s7415_s1 + $0xe64] ss:$8 sps:$4 sm:$0xff]   ;;  %v5422_v37 = vld [vmem:[%s7415_s1 + $0xe60] ss:$8 sps:$4 sm:$0xff]   ;;  %v5427_v56 = vld [vmem:[%s7415_s1 + $0x674] ss:$8 sps:$4 sm:$0xff]  }
 0x16a   :  { %v5430_v23 = vld [vmem:[%s7415_s1 + $0xe74] ss:$8 sps:$4 sm:$0xff]   ;;  %v5449_v0 = vld [vmem:[%s7415_s1 + $0x6b0] ss:$8 sps:$4 sm:$0xff]   ;;  %v5469_v6 = vld [vmem:[%s7415_s1 + $0x6e4] ss:$8 sps:$4 sm:$0xff]  }
 0x16b   :  { %3568 = vmatpush1.bf16.msra.mxu1 %v5347_v45  ;;  %v5425_v45 = vld [vmem:[%s7415_s1 + $0x670] ss:$8 sps:$4 sm:$0xff]   ;;  %v5472_v7 = vld [vmem:[%s7415_s1 + $0xee4] ss:$8 sps:$4 sm:$0xff]   ;;  %s5618_s10 = smov [#allocation2]  }
 0x16c   :  { %3896 = vmatpush1.bf16.msra.mxu0 %v5350_v46  ;;  %3569 = vmatprep.subr.bf16.mxu1 %v5355_v17  ;;  %v5428_v46 = vld [vmem:[%s7415_s1 + $0xe70] ss:$8 sps:$4 sm:$0xff]   ;;  %v5433_v17 = vld [vmem:[%s7415_s1 + $0x684] ss:$8 sps:$4 sm:$0xff]   ;;  %s4184_s11 = sshll.u32 %s5618_s10, 4  ;;  %s4185_s11 = int_to_ptr.vmem [resolvable:$true] %s4184_s11 }
 0x16d   :  { %3897 = vmatprep.subr.bf16.mxu0 %v5358_v35  ;;  %v5436_v35 = vld [vmem:[%s7415_s1 + $0xe84] ss:$8 sps:$4 sm:$0xff]   ;;  %v5452_v1 = vld [vmem:[%s7415_s1 + $0xeb0] ss:$8 sps:$4 sm:$0xff]   ;;  %s5593_s12 = scalar_lea.vmem %s4185_s11, 32  ;;  %p5598_p1 = scmp.lt.s32.totalorder %s4185_s11, %s4185_s11 }
 0x16e   :  { %p5594_p0 = scmp.ne.s32.totalorder %s4185_s11, %s5593_s12  ;;  %p5599_p2 = scmp.lt.s32.totalorder %s5593_s12, %s5593_s12 }
 0x16f   :  { %3570 = vmatpush1.bf16.msra.mxu1 %v5353_v47  ;;  %v5431_v47 = vld [vmem:[%s7415_s1 + $0x680] ss:$8 sps:$4 sm:$0xff]  }
 0x170   :  { %3898 = vmatpush1.bf16.msra.mxu0 %v5356_v48  ;;  %3571 = vmatprep.subr.bf16.mxu1 %v5361_v50  ;;  %v5434_v48 = vld [vmem:[%s7415_s1 + $0xe80] ss:$8 sps:$4 sm:$0xff]   ;;  %v5439_v50 = vld [vmem:[%s7415_s1 + $0x694] ss:$8 sps:$4 sm:$0xff]   ;;  %p5600_p3 = por %p5599_p2, %p5598_p1 }
 0x171   :  { %3899 = vmatprep.subr.bf16.mxu0 %v5364_v51  ;;  %v5442_v51 = vld [vmem:[%s7415_s1 + $0xe94] ss:$8 sps:$4 sm:$0xff]  }
 0x172   :  { %p5601_p4 = pnand %p5600_p3, %p5594_p0 }
 0x173   :  { %3572 = vmatpush1.bf16.msra.mxu1 %v5359_v53  ;;  %v5437_v53 = vld [vmem:[%s7415_s1 + $0x690] ss:$8 sps:$4 sm:$0xff]  }
 0x174   :  { %3900 = vmatpush1.bf16.msra.mxu0 %v5362_v54  ;;  %3573 = vmatprep.subr.bf16.mxu1 %v5367_v55  ;;  %v5440_v54 = vld [vmem:[%s7415_s1 + $0xe90] ss:$8 sps:$4 sm:$0xff]   ;;  %v5445_v55 = vld [vmem:[%s7415_s1 + $0x6a4] ss:$8 sps:$4 sm:$0xff]  }
 0x175   :  { %3901 = vmatprep.subr.bf16.mxu0 %v5370_v57  ;;  %v5448_v57 = vld [vmem:[%s7415_s1 + $0xea4] ss:$8 sps:$4 sm:$0xff]  }
 0x177   :  { %3574 = vmatpush1.bf16.msra.mxu1 %v5365_v39  ;;  %v5443_v39 = vld [vmem:[%s7415_s1 + $0x6a0] ss:$8 sps:$4 sm:$0xff]  }
 0x178   :  { %3902 = vmatpush1.bf16.msra.mxu0 %v5368_v59  ;;  %3575 = vmatprep.subr.bf16.mxu1 %v5373_v60  ;;  %v5446_v59 = vld [vmem:[%s7415_s1 + $0xea0] ss:$8 sps:$4 sm:$0xff]   ;;  %v5451_v60 = vld [vmem:[%s7415_s1 + $0x6b4] ss:$8 sps:$4 sm:$0xff]  }
 0x179   :  { %3903 = vmatprep.subr.bf16.mxu0 %v5376_v61  ;;  %v5454_v61 = vld [vmem:[%s7415_s1 + $0xeb4] ss:$8 sps:$4 sm:$0xff]  }
 0x17b   :  { %3576 = vmatpush1.bf16.msra.mxu1 %v5371_v43  ;;  %v5457_v43 = vld [vmem:[%s7415_s1 + $0x6c4] ss:$8 sps:$4 sm:$0xff]  }
 0x17c   :  { %3904 = vmatpush1.bf16.msra.mxu0 %v5374_v44  ;;  %3577 = vmatprep.subr.bf16.mxu1 %v5379_v2  ;;  %v5460_v44 = vld [vmem:[%s7415_s1 + $0xec4] ss:$8 sps:$4 sm:$0xff]   ;;  %v5455_v2 = vld [vmem:[%s7415_s1 + $0x6c0] ss:$8 sps:$4 sm:$0xff]  }
 0x17d   :  { %3905 = vmatprep.subr.bf16.mxu0 %v5382_v40  ;;  %v5458_v40 = vld [vmem:[%s7415_s1 + $0xec0] ss:$8 sps:$4 sm:$0xff]  }
 0x17f   :  { %3578 = vmatpush1.bf16.msra.mxu1 %v5377_v4  ;;  %v5463_v4 = vld [vmem:[%s7415_s1 + $0x6d4] ss:$8 sps:$4 sm:$0xff]  }
 0x180   :  { %3906 = vmatpush1.bf16.msra.mxu0 %v5380_v5  ;;  %3588 = vmatprep.subr.bf16.mxu1 %v5385_v58  ;;  %v5466_v5 = vld [vmem:[%s7415_s1 + $0xed4] ss:$8 sps:$4 sm:$0xff]   ;;  %v5461_v58 = vld [vmem:[%s7415_s1 + $0x6d0] ss:$8 sps:$4 sm:$0xff]  }
 0x181   :  { %3916 = vmatprep.subr.bf16.mxu0 %v5388_v38  ;;  %v5464_v38 = vld [vmem:[%s7415_s1 + $0xed0] ss:$8 sps:$4 sm:$0xff]  }
 0x182   :  { %3580 = vmatmul.mubr.bf16.vlgmr.msra.gmra.mrb[0].mxu1 %v648_v8  ;;  %v5467_v8 = vld [vmem:[%s7415_s1 + $0x6e0] ss:$8 sps:$4 sm:$0xff]  }
 0x183   :  { %3908 = vmatmul.mubr.bf16.vlgmr.msra.gmra.mrb[0].mxu0 %v746_v9  ;;  %3589 = vmatpush1.bf16.msra.mxu1 %v5383_v10  ;;  %v5470_v9 = vld [vmem:[%s7415_s1 + $0xee0] ss:$8 sps:$4 sm:$0xff]   ;;  %v5475_v10 = vld [vmem:[%s7415_s1 + $0x6f4] ss:$8 sps:$4 sm:$0xff]  }
 0x184   :  { %3917 = vmatpush1.bf16.msra.mxu0 %v5386_v11  ;;  %3590 = vmatprep.subr.bf16.mxu1 %v5391_v12  ;;  %v5478_v11 = vld [vmem:[%s7415_s1 + $0xef4] ss:$8 sps:$4 sm:$0xff]   ;;  %v5473_v12 = vld [vmem:[%s7415_s1 + $0x6f0] ss:$8 sps:$4 sm:$0xff]  }
 0x185   :  { %3918 = vmatprep.subr.bf16.mxu0 %v5394_v62  ;;  %3620 = vmatprep.mubr.bf16.mxu1 %v6955_v63  ;;  %v5476_v62 = vld [vmem:[%s7415_s1 + $0xef0] ss:$8 sps:$4 sm:$0xff]  }
 0x186   :  { %3948 = vmatprep.mubr.bf16.mxu0 %v6958_v13 }
 0x187   :  { %3591 = vmatpush1.bf16.msra.mxu1 %v5389_v14  ;;  %v5482_v14 = vld [vmem:[%s7415_s1 + $0x704] ss:$8 sps:$4 sm:$0xff]  }
 0x188   :  { %3919 = vmatpush1.bf16.msra.mxu0 %v5392_v15  ;;  %3592 = vmatprep.subr.bf16.mxu1 %v5397_v18  ;;  %v5486_v15 = vld [vmem:[%s7415_s1 + $0xf04] ss:$8 sps:$4 sm:$0xff]   ;;  %v7144_v18 = vrot.slane %v6917_v41, %v5784_v49  ;;  %v5489_v41 = vld [vmem:[%s7415_s1 + $0x714] ss:$8 sps:$4 sm:$0xff]  }
 0x189   :  { %3920 = vmatprep.subr.bf16.mxu0 %v5400_v19  ;;  %v7148_v19 = vrot.slane %v6920_v3, %v5784_v49  ;;  %v5492_v49 = vld [vmem:[%s7415_s1 + $0xf14] ss:$8 sps:$4 sm:$0xff]   ;;  %v651_v3 = vcombine.high %v6955_v63, %v6955_v63  ;;  %v5495_v63 = vld [vmem:[%s7415_s1 + $0x724] ss:$8 sps:$4 sm:$0xff]  }
 0x18b   :  { %3593 = vmatpush1.bf16.msra.mxu1 %v5395_v20  ;;  %v5480_v20 = vld [vmem:[%s7415_s1 + $0x700] ss:$8 sps:$4 sm:$0xff]  }
 0x18c   :  { %3921 = vmatpush1.bf16.msra.mxu0 %v5398_v21  ;;  %3594 = vmatprep.subr.bf16.mxu1 %v5403_v22  ;;  %v5484_v21 = vld [vmem:[%s7415_s1 + $0xf00] ss:$8 sps:$4 sm:$0xff]   ;;  %v749_v22 = vcombine.high %v6958_v13, %v6958_v13  ;;  %v5498_v13 = vld [vmem:[%s7415_s1 + $0xf24] ss:$8 sps:$4 sm:$0xff]  }
 0x18d   :  { %3922 = vmatprep.subr.bf16.mxu0 %v5406_v52  ;;  %v5487_v52 = vld [vmem:[%s7415_s1 + $0x710] ss:$8 sps:$4 sm:$0xff]  }
 0x18f   :  { %3595 = vmatpush1.bf16.msra.mxu1 %v5401_v24  ;;  %v5490_v24 = vld [vmem:[%s7415_s1 + $0xf10] ss:$8 sps:$4 sm:$0xff]  }
 0x190   :  { %3923 = vmatpush1.bf16.msra.mxu0 %v5404_v25  ;;  %3596 = vmatprep.subr.bf16.mxu1 %v5409_v26  ;;  %v5493_v25 = vld [vmem:[%s7415_s1 + $0x720] ss:$8 sps:$4 sm:$0xff]  }
 0x191   :  { %3924 = vmatprep.subr.bf16.mxu0 %v5412_v27  ;;  %v5496_v26 = vld [vmem:[%s7415_s1 + $0xf20] ss:$8 sps:$4 sm:$0xff]   ;;  %v5501_v27 = vld [vmem:[%s7415_s1 + $0x734] ss:$8 sps:$4 sm:$0xff]  }
 0x193   :  { %3597 = vmatpush1.bf16.msra.mxu1 %v5407_v28  ;;  %v5504_v28 = vld [vmem:[%s7415_s1 + $0xf34] ss:$8 sps:$4 sm:$0xff]  }
 0x194   :  { %3925 = vmatpush1.bf16.msra.mxu0 %v5410_v29  ;;  %3598 = vmatprep.subr.bf16.mxu1 %v5415_v30  ;;  %v5499_v29 = vld [vmem:[%s7415_s1 + $0x730] ss:$8 sps:$4 sm:$0xff]  }
 0x195   :  { %3926 = vmatprep.subr.bf16.mxu0 %v5418_v31  ;;  %v5502_v30 = vld [vmem:[%s7415_s1 + $0xf30] ss:$8 sps:$4 sm:$0xff]   ;;  %v5507_v31 = vld [vmem:[%s7415_s1 + $0x744] ss:$8 sps:$4 sm:$0xff]  }
 0x197   :  { %3599 = vmatpush1.bf16.msra.mxu1 %v5413_v32  ;;  %v5510_v32 = vld [vmem:[%s7415_s1 + $0xf44] ss:$8 sps:$4 sm:$0xff]  }
 0x198   :  { %3927 = vmatpush1.bf16.msra.mxu0 %v5416_v33  ;;  %3600 = vmatprep.subr.bf16.mxu1 %v5421_v34  ;;  %v5505_v33 = vld [vmem:[%s7415_s1 + $0x740] ss:$8 sps:$4 sm:$0xff]  }
 0x199   :  { %3928 = vmatprep.subr.bf16.mxu0 %v5424_v16  ;;  %v5508_v34 = vld [vmem:[%s7415_s1 + $0xf40] ss:$8 sps:$4 sm:$0xff]   ;;  %v5513_v16 = vld [vmem:[%s7415_s1 + $0x754] ss:$8 sps:$4 sm:$0xff]  }
 0x19b   :  { %3601 = vmatpush1.bf16.msra.mxu1 %v5419_v36  ;;  %v5516_v36 = vld [vmem:[%s7415_s1 + $0xf54] ss:$8 sps:$4 sm:$0xff]  }
 0x19c   :  { %3929 = vmatpush1.bf16.msra.mxu0 %v5422_v37  ;;  %3602 = vmatprep.subr.bf16.mxu1 %v5427_v56  ;;  %v5511_v37 = vld [vmem:[%s7415_s1 + $0x750] ss:$8 sps:$4 sm:$0xff]  }
 0x19d   :  { %3930 = vmatprep.subr.bf16.mxu0 %v5430_v23  ;;  %v5514_v56 = vld [vmem:[%s7415_s1 + $0xf50] ss:$8 sps:$4 sm:$0xff]   ;;  %v5519_v23 = vld [vmem:[%s7415_s1 + $0x764] ss:$8 sps:$4 sm:$0xff]  }
 0x19f   :  { %3603 = vmatpush1.bf16.msra.mxu1 %v5425_v45  ;;  %v5522_v45 = vld [vmem:[%s7415_s1 + $0xf64] ss:$8 sps:$4 sm:$0xff]  }
 0x1a0   :  { %3931 = vmatpush1.bf16.msra.mxu0 %v5428_v46  ;;  %3604 = vmatprep.subr.bf16.mxu1 %v5433_v17  ;;  %v5517_v46 = vld [vmem:[%s7415_s1 + $0x760] ss:$8 sps:$4 sm:$0xff]  }
 0x1a1   :  { %3932 = vmatprep.subr.bf16.mxu0 %v5436_v35  ;;  %v5520_v17 = vld [vmem:[%s7415_s1 + $0xf60] ss:$8 sps:$4 sm:$0xff]   ;;  %v5525_v35 = vld [vmem:[%s7415_s1 + $0x774] ss:$8 sps:$4 sm:$0xff]  }
 0x1a3   :  { %3605 = vmatpush1.bf16.msra.mxu1 %v5431_v47  ;;  %v5528_v47 = vld [vmem:[%s7415_s1 + $0xf74] ss:$8 sps:$4 sm:$0xff]  }
 0x1a4   :  { %3933 = vmatpush1.bf16.msra.mxu0 %v5434_v48  ;;  %3606 = vmatprep.subr.bf16.mxu1 %v5439_v50  ;;  %v5523_v48 = vld [vmem:[%s7415_s1 + $0x770] ss:$8 sps:$4 sm:$0xff]  }
 0x1a5   :  { %3934 = vmatprep.subr.bf16.mxu0 %v5442_v51  ;;  %v5526_v50 = vld [vmem:[%s7415_s1 + $0xf70] ss:$8 sps:$4 sm:$0xff]   ;;  %v5531_v51 = vld [vmem:[%s7415_s1 + $0x784] ss:$8 sps:$4 sm:$0xff]  }
 0x1a7   :  { %3607 = vmatpush1.bf16.msra.mxu1 %v5437_v53  ;;  %v5534_v53 = vld [vmem:[%s7415_s1 + $0xf84] ss:$8 sps:$4 sm:$0xff]  }
 0x1a8   :  { %3935 = vmatpush1.bf16.msra.mxu0 %v5440_v54  ;;  %3608 = vmatprep.subr.bf16.mxu1 %v5445_v55  ;;  %v5529_v54 = vld [vmem:[%s7415_s1 + $0x780] ss:$8 sps:$4 sm:$0xff]  }
 0x1a9   :  { %3936 = vmatprep.subr.bf16.mxu0 %v5448_v57  ;;  %v5532_v55 = vld [vmem:[%s7415_s1 + $0xf80] ss:$8 sps:$4 sm:$0xff]   ;;  %v5537_v57 = vld [vmem:[%s7415_s1 + $0x794] ss:$8 sps:$4 sm:$0xff]  }
 0x1ab   :  { %3609 = vmatpush1.bf16.msra.mxu1 %v5443_v39  ;;  %v5540_v39 = vld [vmem:[%s7415_s1 + $0xf94] ss:$8 sps:$4 sm:$0xff]  }
 0x1ac   :  { %3937 = vmatpush1.bf16.msra.mxu0 %v5446_v59  ;;  %3610 = vmatprep.subr.bf16.mxu1 %v5451_v60  ;;  %v5535_v59 = vld [vmem:[%s7415_s1 + $0x790] ss:$8 sps:$4 sm:$0xff]  }
 0x1ad   :  { %3938 = vmatprep.subr.bf16.mxu0 %v5454_v61  ;;  %v5538_v60 = vld [vmem:[%s7415_s1 + $0xf90] ss:$8 sps:$4 sm:$0xff]   ;;  %v5543_v61 = vld [vmem:[%s7415_s1 + $0x7a4] ss:$8 sps:$4 sm:$0xff]  }
 0x1af   :  { %3611 = vmatpush1.bf16.msra.mxu1 %v5449_v0  ;;  %v5546_v0 = vld [vmem:[%s7415_s1 + $0xfa4] ss:$8 sps:$4 sm:$0xff]  }
 0x1b0   :  { %3939 = vmatpush1.bf16.msra.mxu0 %v5452_v1  ;;  %3612 = vmatprep.subr.bf16.mxu1 %v5457_v43  ;;  %v5541_v1 = vld [vmem:[%s7415_s1 + $0x7a0] ss:$8 sps:$4 sm:$0xff]  }
 0x1b1   :  { %3940 = vmatprep.subr.bf16.mxu0 %v5460_v44  ;;  %v5544_v43 = vld [vmem:[%s7415_s1 + $0xfa0] ss:$8 sps:$4 sm:$0xff]   ;;  %v5549_v44 = vld [vmem:[%s7415_s1 + $0x7b4] ss:$8 sps:$4 sm:$0xff]  }
 0x1b3   :  { %3613 = vmatpush1.bf16.msra.mxu1 %v5455_v2  ;;  %v5552_v2 = vld [vmem:[%s7415_s1 + $0xfb4] ss:$8 sps:$4 sm:$0xff]  }
 0x1b4   :  { %3941 = vmatpush1.bf16.msra.mxu0 %v5458_v40  ;;  %3614 = vmatprep.subr.bf16.mxu1 %v5463_v4  ;;  %v5547_v40 = vld [vmem:[%s7415_s1 + $0x7b0] ss:$8 sps:$4 sm:$0xff]  }
 0x1b5   :  { %3942 = vmatprep.subr.bf16.mxu0 %v5466_v5  ;;  %v5550_v4 = vld [vmem:[%s7415_s1 + $0xfb0] ss:$8 sps:$4 sm:$0xff]   ;;  %v5555_v5 = vld [vmem:[%s7415_s1 + $0x7c4] ss:$8 sps:$4 sm:$0xff]  }
 0x1b7   :  { %3615 = vmatpush1.bf16.msra.mxu1 %v5461_v58  ;;  %v5558_v58 = vld [vmem:[%s7415_s1 + $0xfc4] ss:$8 sps:$4 sm:$0xff]  }
 0x1b8   :  { %3943 = vmatpush1.bf16.msra.mxu0 %v5464_v38  ;;  %3616 = vmatprep.subr.bf16.mxu1 %v5469_v6  ;;  %v5553_v38 = vld [vmem:[%s7415_s1 + $0x7c0] ss:$8 sps:$4 sm:$0xff]  }
 0x1b9   :  { %3944 = vmatprep.subr.bf16.mxu0 %v5472_v7  ;;  %v5556_v6 = vld [vmem:[%s7415_s1 + $0xfc0] ss:$8 sps:$4 sm:$0xff]   ;;  %v5561_v7 = vld [vmem:[%s7415_s1 + $0x7d4] ss:$8 sps:$4 sm:$0xff]  }
 0x1bb   :  { %3617 = vmatpush1.bf16.msra.mxu1 %v5467_v8  ;;  %v5564_v8 = vld [vmem:[%s7415_s1 + $0xfd4] ss:$8 sps:$4 sm:$0xff]  }
 0x1bc   :  { %3945 = vmatpush1.bf16.msra.mxu0 %v5470_v9  ;;  %3618 = vmatprep.subr.bf16.mxu1 %v5475_v10  ;;  %v5559_v9 = vld [vmem:[%s7415_s1 + $0x7d0] ss:$8 sps:$4 sm:$0xff]  }
 0x1bd   :  { %3946 = vmatprep.subr.bf16.mxu0 %v5478_v11  ;;  %v5562_v10 = vld [vmem:[%s7415_s1 + $0xfd0] ss:$8 sps:$4 sm:$0xff]   ;;  %v5567_v11 = vld [vmem:[%s7415_s1 + $0x7e4] ss:$8 sps:$4 sm:$0xff]  }
 0x1bf   :  { %3619 = vmatpush1.bf16.msra.mxu1 %v5473_v12  ;;  %v5570_v12 = vld [vmem:[%s7415_s1 + $0xfe4] ss:$8 sps:$4 sm:$0xff]  }
 0x1c0   :  { %3947 = vmatpush1.bf16.msra.mxu0 %v5476_v62  ;;  %3629 = vmatprep.subr.bf16.mxu1 %v5482_v14  ;;  %v5565_v62 = vld [vmem:[%s7415_s1 + $0x7e0] ss:$8 sps:$4 sm:$0xff]  }
 0x1c1   :  { %3957 = vmatprep.subr.bf16.mxu0 %v5486_v15  ;;  %v5568_v14 = vld [vmem:[%s7415_s1 + $0xfe0] ss:$8 sps:$4 sm:$0xff]   ;;  %v5573_v15 = vld [vmem:[%s7415_s1 + $0x7f4] ss:$8 sps:$4 sm:$0xff]  }
 0x1c2   :  { %3621 = vmatmul.mubr.bf16.vlgmr.msra.gmra.mrb[0].mxu1 %v7144_v18 }
 0x1c3   :  { %3949 = vmatmul.mubr.bf16.vlgmr.msra.gmra.mrb[0].mxu0 %v7148_v19  ;;  %3630 = vmatpush1.bf16.msra.mxu1 %v5480_v20  ;;  %v5576_v20 = vld [vmem:[%s7415_s1 + $0xff4] ss:$8 sps:$4 sm:$0xff]  }
 0x1c4   :  { %3958 = vmatpush1.bf16.msra.mxu0 %v5484_v21  ;;  %3631 = vmatprep.subr.bf16.mxu1 %v5489_v41  ;;  %v5571_v21 = vld [vmem:[%s7415_s1 + $0x7f0] ss:$8 sps:$4 sm:$0xff]  }
 0x1c5   :  { %3959 = vmatprep.subr.bf16.mxu0 %v5492_v49  ;;  %3661 = vmatprep.mubr.bf16.mxu1 %v651_v3  ;;  %v5574_v41 = vld [vmem:[%s7415_s1 + $0xff0] ss:$8 sps:$4 sm:$0xff]   ;;  %v5577_v49 = vld [vmem:[%s7417_s3 + $0x40] sm:$0xff]   ;;  %v649_v3 = vcombine.high %v7144_v18, %v7144_v18  ;;  %v5580_v18 = vld [vmem:[%s7417_s3 + $0x8] sm:$0xff]  }
 0x1c6   :  { %3989 = vmatprep.mubr.bf16.mxu0 %v749_v22  ;;  %v747_v22 = vcombine.high %v7148_v19, %v7148_v19  ;;  %v5581_v19 = vld [vmem:[%s7417_s3 + $0x50] sm:$0xff]  }
 0x1c7   :  { %3632 = vmatpush1.bf16.msra.mxu1 %v5487_v52  ;;  %v5578_v52 = vld [vmem:[%s7417_s3] sm:$0xff]  }
 0x1c8   :  { %3960 = vmatpush1.bf16.msra.mxu0 %v5490_v24  ;;  %3633 = vmatprep.subr.bf16.mxu1 %v5495_v63  ;;  %v5579_v24 = vld [vmem:[%s7417_s3 + $0x48] sm:$0xff]   ;;  %v5582_v63 = vld [vmem:[%s7417_s3 + $0x10] sm:$0xff]  }
 0x1c9   :  { %3961 = vmatprep.subr.bf16.mxu0 %v5498_v13  ;;  %v5583_v13 = vld [vmem:[%s7417_s3 + $0x58] sm:$0xff]  }
 0x1cb   :  { %3634 = vmatpush1.bf16.msra.mxu1 %v5493_v25  ;;  %v5584_v25 = vld [vmem:[%s7417_s3 + $0x18] sm:$0xff]  }
 0x1cc   :  { %3962 = vmatpush1.bf16.msra.mxu0 %v5496_v26  ;;  %3635 = vmatprep.subr.bf16.mxu1 %v5501_v27  ;;  %v5585_v26 = vld [vmem:[%s7417_s3 + $0x60] sm:$0xff]  }
 0x1cd   :  { %3963 = vmatprep.subr.bf16.mxu0 %v5504_v28  ;;  %v5586_v27 = vld [vmem:[%s7417_s3 + $0x20] sm:$0xff]   ;;  %v5587_v28 = vld [vmem:[%s7417_s3 + $0x68] sm:$0xff]  }
 0x1cf   :  { %3636 = vmatpush1.bf16.msra.mxu1 %v5499_v29  ;;  %v5588_v29 = vld [vmem:[%s7417_s3 + $0x28] sm:$0xff]  }
 0x1d0   :  { %3964 = vmatpush1.bf16.msra.mxu0 %v5502_v30  ;;  %3637 = vmatprep.subr.bf16.mxu1 %v5507_v31  ;;  %v5589_v30 = vld [vmem:[%s7417_s3 + $0x70] sm:$0xff]  }
 0x1d1   :  { %3965 = vmatprep.subr.bf16.mxu0 %v5510_v32  ;;  %v5590_v31 = vld [vmem:[%s7417_s3 + $0x30] sm:$0xff]   ;;  %v5591_v32 = vld [vmem:[%s7417_s3 + $0x78] sm:$0xff]  }
 0x1d3   :  { %3638 = vmatpush1.bf16.msra.mxu1 %v5505_v33  ;;  %v5592_v33 = vld [vmem:[%s7417_s3 + $0x38] sm:$0xff]  }
 0x1d4   :  { %3966 = vmatpush1.bf16.msra.mxu0 %v5508_v34  ;;  %3639 = vmatprep.subr.bf16.mxu1 %v5513_v16  ;;  %v542_v34 = vsub.s32 0, %v5766_v42  ;;  %v538_v16 = vld [vmem:[%s7416_s2] sm:$0x3] }
 0x1d5   :  { %3967 = vmatprep.subr.bf16.mxu0 %v5516_v36  ;;  %v546_v36 = vsub.s32 1, %v5766_v42 }
 0x1d7   :  { %3640 = vmatpush1.bf16.msra.mxu1 %v5511_v37  ;;  %v543_v37 = vrot.slane %v538_v16, %v542_v34 }
 0x1d8   :  { %3968 = vmatpush1.bf16.msra.mxu0 %v5514_v56  ;;  %3641 = vmatprep.subr.bf16.mxu1 %v5519_v23  ;;  %v547_v56 = vrot.slane %v538_v16, %v546_v36 }
 0x1d9   :  { %3969 = vmatprep.subr.bf16.mxu0 %v5522_v45 }
 0x1db   :  { %3642 = vmatpush1.bf16.msra.mxu1 %v5517_v46 }
 0x1dc   :  { %3970 = vmatpush1.bf16.msra.mxu0 %v5520_v17  ;;  %3643 = vmatprep.subr.bf16.mxu1 %v5525_v35 }
 0x1dd   :  { %3971 = vmatprep.subr.bf16.mxu0 %v5528_v47 }
 0x1df   :  { %3644 = vmatpush1.bf16.msra.mxu1 %v5523_v48 }
 0x1e0   :  { %3972 = vmatpush1.bf16.msra.mxu0 %v5526_v50  ;;  %3645 = vmatprep.subr.bf16.mxu1 %v5531_v51 }
 0x1e1   :  { %3973 = vmatprep.subr.bf16.mxu0 %v5534_v53 }
 0x1e3   :  { %3646 = vmatpush1.bf16.msra.mxu1 %v5529_v54 }
 0x1e4   :  { %3974 = vmatpush1.bf16.msra.mxu0 %v5532_v55  ;;  %3647 = vmatprep.subr.bf16.mxu1 %v5537_v57 }
 0x1e5   :  { %3975 = vmatprep.subr.bf16.mxu0 %v5540_v39 }
 0x1e7   :  { %3648 = vmatpush1.bf16.msra.mxu1 %v5535_v59 }
 0x1e8   :  { %3976 = vmatpush1.bf16.msra.mxu0 %v5538_v60  ;;  %3649 = vmatprep.subr.bf16.mxu1 %v5543_v61 }
 0x1e9   :  { %3977 = vmatprep.subr.bf16.mxu0 %v5546_v0  ;;  %v4704_v0 = vld [vmem:[%s7418_s4] ss:$0 sm:$0xff] }
 0x1eb   :  { %3650 = vmatpush1.bf16.msra.mxu1 %v5541_v1 }
 0x1ec   :  { %3978 = vmatpush1.bf16.msra.mxu0 %v5544_v43  ;;  %3651 = vmatprep.subr.bf16.mxu1 %v5549_v44 }
 0x1ed   :  { %3979 = vmatprep.subr.bf16.mxu0 %v5552_v2 }
 0x1ef   :  { %3652 = vmatpush1.bf16.msra.mxu1 %v5547_v40 }
 0x1f0   :  { %3980 = vmatpush1.bf16.msra.mxu0 %v5550_v4  ;;  %3653 = vmatprep.subr.bf16.mxu1 %v5555_v5 }
 0x1f1   :  { %3981 = vmatprep.subr.bf16.mxu0 %v5558_v58 }
 0x1f3   :  { %3654 = vmatpush1.bf16.msra.mxu1 %v5553_v38 }
 0x1f4   :  { %3982 = vmatpush1.bf16.msra.mxu0 %v5556_v6  ;;  %3655 = vmatprep.subr.bf16.mxu1 %v5561_v7 }
 0x1f5   :  { %3983 = vmatprep.subr.bf16.mxu0 %v5564_v8 }
 0x1f7   :  { %3656 = vmatpush1.bf16.msra.mxu1 %v5559_v9 }
 0x1f8   :  { %3984 = vmatpush1.bf16.msra.mxu0 %v5562_v10  ;;  %3657 = vmatprep.subr.bf16.mxu1 %v5567_v11 }
 0x1f9   :  { %3985 = vmatprep.subr.bf16.mxu0 %v5570_v12 }
 0x1fb   :  { %3658 = vmatpush1.bf16.msra.mxu1 %v5565_v62 }
 0x1fc   :  { %3986 = vmatpush1.bf16.msra.mxu0 %v5568_v14  ;;  %3659 = vmatprep.subr.bf16.mxu1 %v5573_v15 }
 0x1fd   :  { %3987 = vmatprep.subr.bf16.mxu0 %v5576_v20 }
 0x1ff   :  { %3660 = vmatpush1.bf16.msra.mxu1 %v5571_v21 }
 0x200   :  { %3988 = vmatpush1.bf16.msra.mxu0 %v5574_v41  ;;  %4721 = vmatprep.subr.bf16.mxu1 %v5577_v49 }
 0x202   :  { %3662 = vmatmul.mubr.bf16.vlgmr.msra.gmra.mrb[0].mxu1 %v649_v3 }
 0x203   :  { %3990 = vmatmul.mubr.bf16.vlgmr.msra.gmra.mrb[0].mxu0 %v747_v22  ;;  %4722 = vmatpush3.bf16.msra.mxu1 %v5578_v52 }
 0x204   :  { %4723 = vmatprep.subr.bf16.mxu1 %v5579_v24 }
 0x207   :  { %4724 = vmatpush3.bf16.msra.mxu1 %v5580_v18 }
 0x208   :  { %4725 = vmatprep.subr.bf16.mxu1 %v5581_v19 }
 0x20b   :  { %4726 = vmatpush3.bf16.msra.mxu1 %v5582_v63 }
 0x20c   :  { %4727 = vmatprep.subr.bf16.mxu1 %v5583_v13 }
 0x20f   :  { %4728 = vmatpush3.bf16.msra.mxu1 %v5584_v25 }
 0x210   :  { %4729 = vmatprep.subr.bf16.mxu1 %v5585_v26 }
 0x213   :  { %4730 = vmatpush3.bf16.msra.mxu1 %v5586_v27 }
 0x214   :  { %4731 = vmatprep.subr.bf16.mxu1 %v5587_v28 }
 0x217   :  { %4732 = vmatpush3.bf16.msra.mxu1 %v5588_v29 }
 0x218   :  { %4733 = vmatprep.subr.bf16.mxu1 %v5589_v30 }
 0x21b   :  { %4734 = vmatpush3.bf16.msra.mxu1 %v5590_v31 }
 0x21c   :  { %4735 = vmatprep.subr.bf16.mxu1 %v5591_v32 }
 0x21f   :  { %4736 = vmatpush3.bf16.msra.mxu1 %v5592_v33 }
 0x2d5   :  { %v3663_v23 = vpop.f32.mrb[0].mxu1 }
 0x2d6   :  { %v3991_v45 = vpop.f32.mrb[0].mxu0  ;;  %v4743_v46 = vadd.f32 %v3663_v23, %v543_v37  ;;  %v3665_v17 = vpop.f32.mrb[1].mxu1 }
 0x2d7   :  { %v3993_v35 = vpop.f32.mrb[1].mxu0  ;;  %v4745_v47 = vadd.f32 %v3665_v17, %v547_v56  ;;  %v3667_v48 = vpop.f32.mrb[2].mxu1 }
 0x2d8   :  { %v3995_v50 = vpop.f32.mrb[2].mxu0  ;;  %v4744_v51 = vadd.f32 %v4743_v46, %v3991_v45  ;;  %v3668_v53 = vpop.f32.mrb[3].mxu1 }
 0x2d9   :  { %v3996_v54 = vpop.f32.mrb[3].mxu0  ;;  %v4746_v55 = vadd.f32 %v4745_v47, %v3993_v35 }
 0x2da   :  { %v3998_v57 = vmax.f32 %v4744_v51, 0.0 }
 0x2db   :  { %v3999_v39 = vmax.f32 %v4746_v55, 0.0 }
 0x2dc   :  { %v4000_v60 = vpack.c.bf16 %v3998_v57, %v3998_v57 }
 0x2dd   :  { %v4001_v59 = vpack.c.bf16 %v3999_v39, %v3999_v39 }
 0x2df   :  { %4169 = vmatprep.mubr.bf16.mxu1 %v4001_v59 }
 0x2e0   :  { %4170 = vmatmul.mubr.bf16.vlgmr.msra.gmra.mrb[4].mxu1 %v4000_v60 }
 0x3b3   :  { %v4737_v42 = vpop.f32.mrb[4].mxu1 }
 0x3b4   :  { %v4738_v61 = vpop.f32.mrb[5].mxu1 }
 0x3b5   :  { %v4739_v1 = vadd.f32 %v4738_v61, %v4737_v42  ;;  %v4740_v43 = vpop.f32.mrb[6].mxu1 }
 0x3b6   :  { %v4741_v44 = vpop.f32.mrb[7].mxu1 }
 0x3b7   :  { %v4172_v2 = vadd.f32 %v4739_v1, %v4704_v0 }
 0x3b9   :  { %4177 = vst [vmem:[#allocation2] sm:$0x3] %v4172_v2 }
 0x3ba   :  { %5604 = shalt.err (!%p5601_p4)
}
 0x3bb   :  { %s5605_s15 = scalar_lea.hbm %s7419_s5, 32 }
 0x3bc   :  { %p5606_p5 = scmp.ne.s32.totalorder %s7419_s5, %s5605_s15  ;;  %p5609_p6 = scmp.lt.u32.totalorder %s5605_s15, %s7419_s5 }
 0x3be   :  { %p5611_p7 = pnand %p5609_p6, %p5606_p5 }
 0x3c0   :  { %5614 = shalt.err (!%p5611_p7)
}
 0x3c1   :  { %4187 = dma.vmem_to_hbm [thread:$0]  %s4185_s11, 32, %s7419_s5, [#allocation3]  }
 0x3c2   :  { %5615 = dma.done.wait [#allocation3], 32  }
 0x3c3   :  { %5616 = vsyncadd [#allocation3], 4294967264 }
 0x3c4   :  { %4191 = vsyncpa [#allocation3], 1 }

</bundles_post_ra>
